<compile_context>
chip_gen: v5e
topology: v5e:2x2
jax: 0.10.0
libtpu: 0.0.40
codegen_flags: <defaults>
</compile_context>

<pallas_src>
import math
from functools import partial

import jax
import jax.numpy as jnp
from jax import lax
from jax.experimental import pallas as pl
from jax.experimental.pallas import tpu as pltpu

_BN_EPS = 1e-5


# ----------------------------------------------------------------------------
# Tile selection helpers (avoid pad copies: pick divisors / full dims)
# ----------------------------------------------------------------------------
def _pad_to(x, m, axis):
    pad = (-x.shape[axis]) % m
    if pad == 0:
        return x
    cfg = [(0, 0)] * x.ndim
    cfg[axis] = (0, pad)
    return jnp.pad(x, cfg)


def _largest_divisor(m, cap, mult):
    t = cap - (cap % mult)
    while t >= mult:
        if m % t == 0:
            return t
        t -= mult
    return None


def _pick_row_tile(m, cap=1024):
    """Full dim if small, else largest divisor <= cap preferring 128/16/8 mults."""
    if m <= cap:
        return m
    for mult in (128, 16, 8):
        t = _largest_divisor(m, cap, mult)
        if t is not None:
            return t
    return m                       # fallback: single big tile (not hit for ResNet-50)


def _pick_k_tile(k):
    if k <= 1024:
        return k                   # full-K single block (full array dim is legal)
    for t in (768, 512, 384, 256, 128):
        if k % t == 0:
            return t
    return k


def _pick_n_tile(n):
    if n <= 512:
        return n
    for t in (512, 256, 128):
        if n % t == 0:
            return t
    return n


def _bn_row_tile(m, c):
    cap = max(8, min(1024, (4 * 1024 * 1024) // (c * 8)))
    cap -= cap % 8
    return _pick_row_tile(m, cap)


# ----------------------------------------------------------------------------
# Pallas matmul with fused BN-stats epilogue (and optional fused input affine)
#   A (M, K) bf16 @ B (K, N) bf16 -> Y (M, N) bf16,
#   per-row-tile partial col sums / sumsq (gi, 1, N) f32.
# Grid (i = M tile [parallel], j = N tile [parallel], k = K tile [arbitrary]).
# ----------------------------------------------------------------------------
def _mm_stats_kernel(a_ref, b_ref, y_ref, sum_ref, sq_ref, acc_ref):
    k = pl.program_id(2)

    @pl.when(k == 0)
    def _():
        acc_ref[...] = jnp.zeros_like(acc_ref)

    acc_ref[...] += jnp.dot(a_ref[...], b_ref[...],
                            preferred_element_type=jnp.float32)

    @pl.when(k == pl.num_programs(2) - 1)
    def _():
        acc = acc_ref[...]                       # f32, unrounded
        y_ref[...] = acc.astype(y_ref.dtype)
        sum_ref[...] = jnp.sum(acc, axis=0, keepdims=True).reshape(1, 1, -1)
        sq_ref[...] = jnp.sum(acc * acc, axis=0, keepdims=True).reshape(1, 1, -1)


def _mm_stats_affine_kernel(a_ref, sa_ref, sb_ref, b_ref,
                            y_ref, sum_ref, sq_ref, acc_ref):
    """Same as above but applies relu(a * sa + sb) to the A tile (fused BN of
    the producing conv) before feeding the MXU."""
    k = pl.program_id(2)

    @pl.when(k == 0)
    def _():
        acc_ref[...] = jnp.zeros_like(acc_ref)

    a = jnp.maximum(a_ref[...].astype(jnp.float32) * sa_ref[...] + sb_ref[...], 0.0)
    acc_ref[...] += jnp.dot(a.astype(jnp.bfloat16), b_ref[...],
                            preferred_element_type=jnp.float32)

    @pl.when(k == pl.num_programs(2) - 1)
    def _():
        acc = acc_ref[...]
        y_ref[...] = acc.astype(y_ref.dtype)
        sum_ref[...] = jnp.sum(acc, axis=0, keepdims=True).reshape(1, 1, -1)
        sq_ref[...] = jnp.sum(acc * acc, axis=0, keepdims=True).reshape(1, 1, -1)


def matmul_stats(a, b, in_scale=None, in_bias=None):
    """(M, K) @ (K, N) bf16 with f32 accumulation + partial column stats.

    Returns (y (M, N) bf16, psum (gi, 1, N) f32, psq (gi, 1, N) f32).
    """
    M, K = a.shape
    K2, N = b.shape
    assert K == K2
    a = a.astype(jnp.bfloat16)
    b = b.astype(jnp.bfloat16)

    tm = _pick_row_tile(M, 1024)
    tk = _pick_k_tile(K)
    tn = _pick_n_tile(N)

    # Safety: if M ever needed zero padding, padded rows would pollute the
    # stats under the fused input affine (relu(bias) != 0) -> pre-apply in XLA.
    if in_scale is not None and (M % tm != 0):
        a = jnp.maximum(a.astype(jnp.float32) * in_scale.reshape(1, K)
                        + in_bias.reshape(1, K), 0.0).astype(jnp.bfloat16)
        in_scale = None
        in_bias = None

    a_p = _pad_to(_pad_to(a, tm, 0), tk, 1)      # no-ops for ResNet-50 shapes
    b_p = _pad_to(b, tk, 0)
    Mp, Kp = a_p.shape
    gi, gj, gk = Mp // tm, N // tn, Kp // tk

    out_shape = (jax.ShapeDtypeStruct((Mp, N), jnp.bfloat16),
                 jax.ShapeDtypeStruct((gi, 1, N), jnp.float32),
                 jax.ShapeDtypeStruct((gi, 1, N), jnp.float32))
    out_specs = [pl.BlockSpec((tm, tn), lambda i, j, k: (i, j)),
                 pl.BlockSpec((1, 1, tn), lambda i, j, k: (i, 0, j)),
                 pl.BlockSpec((1, 1, tn), lambda i, j, k: (i, 0, j))]
    a_spec = pl.BlockSpec((tm, tk), lambda i, j, k: (i, k))
    b_spec = pl.BlockSpec((tk, tn), lambda i, j, k: (k, j))
    scratch = [pltpu.VMEM((tm, tn), jnp.float32)]
    cparams = pltpu.CompilerParams(
        dimension_semantics=("parallel", "parallel", "arbitrary"))

    if in_scale is None:
        y, psum, psq = pl.pallas_call(
            _mm_stats_kernel,
            out_shape=out_shape,
            grid_spec=pltpu.PrefetchScalarGridSpec(
                num_scalar_prefetch=0, grid=(gi, gj, gk),
                in_specs=[a_spec, b_spec],
                out_specs=out_specs,
                scratch_shapes=scratch),
            compiler_params=cparams,
        )(a_p, b_p)
    else:
        sa = jnp.pad(in_scale.reshape(1, K).astype(jnp.float32),
                     ((0, 0), (0, Kp - K)))
        sb = jnp.pad(in_bias.reshape(1, K).astype(jnp.float32),
                     ((0, 0), (0, Kp - K)))
        s_spec = pl.BlockSpec((1, tk), lambda i, j, k: (0, k))
        y, psum, psq = pl.pallas_call(
            _mm_stats_affine_kernel,
            out_shape=out_shape,
            grid_spec=pltpu.PrefetchScalarGridSpec(
                num_scalar_prefetch=0, grid=(gi, gj, gk),
                in_specs=[a_spec, s_spec, s_spec, b_spec],
                out_specs=out_specs,
                scratch_shapes=scratch),
            compiler_params=cparams,
        )(a_p, sa, sb, b_p)
    return y[:M], psum, psq


# ----------------------------------------------------------------------------
# Fused BN(conv3) [+ BN(downsample)] + residual add + ReLU elementwise kernel
# ----------------------------------------------------------------------------
def _bn_res_kernel(y_ref, s_ref, b_ref, r_ref, o_ref):
    out = (y_ref[...].astype(jnp.float32) * s_ref[...] + b_ref[...]
           + r_ref[...].astype(jnp.float32))
    o_ref[...] = jnp.maximum(out, 0.0).astype(o_ref.dtype)


def _bn_bn_res_kernel(y_ref, s_ref, b_ref, yd_ref, sd_ref, bd_ref, o_ref):
    out = (y_ref[...].astype(jnp.float32) * s_ref[...] + b_ref[...]
           + yd_ref[...].astype(jnp.float32) * sd_ref[...] + bd_ref[...])
    o_ref[...] = jnp.maximum(out, 0.0).astype(o_ref.dtype)


@jax.jit
def bn_add_relu(y, scale, bias, residual):
    """relu(bn(y) + residual); y/residual NHWC bf16, scale/bias (C,) f32."""
    shape = y.shape
    C = shape[-1]
    y2 = y.reshape(-1, C)
    r2 = residual.astype(jnp.bfloat16).reshape(-1, C)
    M = y2.shape[0]
    tm = _bn_row_tile(M, C)
    y_p = _pad_to(y2, tm, 0)
    r_p = _pad_to(r2, tm, 0)
    Mp = y_p.shape[0]
    out = pl.pallas_call(
        _bn_res_kernel,
        out_shape=jax.ShapeDtypeStruct((Mp, C), jnp.bfloat16),
        grid_spec=pltpu.PrefetchScalarGridSpec(
            num_scalar_prefetch=0, grid=(Mp // tm,),
            in_specs=[pl.BlockSpec((tm, C), lambda i: (i, 0)),
                      pl.BlockSpec((1, C), lambda i: (0, 0)),
                      pl.BlockSpec((1, C), lambda i: (0, 0)),
                      pl.BlockSpec((tm, C), lambda i: (i, 0))],
            out_specs=pl.BlockSpec((tm, C), lambda i: (i, 0))),
        compiler_params=pltpu.CompilerParams(dimension_semantics=("parallel",)),
    )(y_p, scale.reshape(1, C).astype(jnp.float32),
      bias.reshape(1, C).astype(jnp.float32), r_p)
    return out[:M].reshape(shape)


@jax.jit
def bn_bn_add_relu(y, scale, bias, yd, scale_d, bias_d):
    """relu(bn(y) + bn_ds(yd)) — downsample-BN fused into the residual add."""
    shape = y.shape
    C = shape[-1]
    y2 = y.reshape(-1, C)
    d2 = yd.astype(jnp.bfloat16).reshape(-1, C)
    M = y2.shape[0]
    tm = _bn_row_tile(M, C)
    y_p = _pad_to(y2, tm, 0)
    d_p = _pad_to(d2, tm, 0)
    Mp = y_p.shape[0]
    out = pl.pallas_call(
        _bn_bn_res_kernel,
        out_shape=jax.ShapeDtypeStruct((Mp, C), jnp.bfloat16),
        grid_spec=pltpu.PrefetchScalarGridSpec(
            num_scalar_prefetch=0, grid=(Mp // tm,),
            in_specs=[pl.BlockSpec((tm, C), lambda i: (i, 0)),
                      pl.BlockSpec((1, C), lambda i: (0, 0)),
                      pl.BlockSpec((1, C), lambda i: (0, 0)),
                      pl.BlockSpec((tm, C), lambda i: (i, 0)),
                      pl.BlockSpec((1, C), lambda i: (0, 0)),
                      pl.BlockSpec((1, C), lambda i: (0, 0))],
            out_specs=pl.BlockSpec((tm, C), lambda i: (i, 0))),
        compiler_params=pltpu.CompilerParams(dimension_semantics=("parallel",)),
    )(y_p, scale.reshape(1, C).astype(jnp.float32),
      bias.reshape(1, C).astype(jnp.float32),
      d_p, scale_d.reshape(1, C).astype(jnp.float32),
      bias_d.reshape(1, C).astype(jnp.float32))
    return out[:M].reshape(shape)


# ----------------------------------------------------------------------------
# Conv (im2col glue) + fused BN stats; stem pooling; head
# ----------------------------------------------------------------------------
def im2col(x, k, stride, pad):
    """x: (B, H, W, C) -> (B*Ho*Wo, k*k*C), patch order (dy, dx, c)."""
    B, H, W, C = x.shape
    Ho = (H + 2 * pad - k) // stride + 1
    Wo = (W + 2 * pad - k) // stride + 1
    if k == 1 and stride == 1 and pad == 0:
        return x.reshape(B * H * W, C), (H, W)
    if pad:
        x = jnp.pad(x, ((0, 0), (pad, pad), (pad, pad), (0, 0)))
    cols = []
    for di in range(k):
        for dj in range(k):
            cols.append(lax.slice(
                x,
                (0, di, dj, 0),
                (B, di + (Ho - 1) * stride + 1, dj + (Wo - 1) * stride + 1, C),
                (1, stride, stride, 1)))
    patches = jnp.concatenate(cols, axis=-1)            # (B, Ho, Wo, k*k*C)
    return patches.reshape(B * Ho * Wo, k * k * C), (Ho, Wo)


@partial(jax.jit, static_argnames=("stride", "pad"))
def conv_bn_stats(x, w, gamma, beta, stride, pad, in_scale=None, in_bias=None):
    """Conv + BN-statistics.  Returns the *raw* conv output (bf16 NHWC) plus
    the per-channel (scale, bias) that the consumer will apply.

    If (in_scale, in_bias) is given, relu(x*scale+bias) — the BN of the
    producing conv — is fused: in-kernel for 1x1/stride-1 convs, or into the
    XLA im2col producer otherwise.
    """
    B = x.shape[0]
    k = w.shape[0]
    cout = w.shape[-1]
    x = x.astype(jnp.bfloat16)

    fuse_in_kernel = (in_scale is not None) and k == 1 and stride == 1 and pad == 0
    if (in_scale is not None) and not fuse_in_kernel:
        x = jnp.maximum(x.astype(jnp.float32) * in_scale + in_bias,
                        0.0).astype(jnp.bfloat16)

    cols, (Ho, Wo) = im2col(x, k, stride, pad)
    wm = w.reshape(-1, cout).astype(jnp.bfloat16)
    if fuse_in_kernel:
        y, psum, psq = matmul_stats(cols, wm, in_scale, in_bias)
    else:
        y, psum, psq = matmul_stats(cols, wm)

    m_true = B * Ho * Wo
    s = jnp.sum(psum, axis=(0, 1))
    ss = jnp.sum(psq, axis=(0, 1))
    mean = s / m_true
    var = jnp.maximum(ss / m_true - mean * mean, 0.0)   # biased var, clamped >= 0
    scale = gamma.astype(jnp.float32) * lax.rsqrt(var + _BN_EPS)
    bias = beta.astype(jnp.float32) - mean * scale
    return y.reshape(B, Ho, Wo, cout), scale, bias


@jax.jit
def stem_bn_relu_maxpool(y, scale, bias):
    """Stem BN + ReLU folded into the max-pool input; pooling done in bf16."""
    x = jnp.maximum(y.astype(jnp.float32) * scale + bias, 0.0).astype(jnp.bfloat16)
    init = jnp.array(-jnp.inf, dtype=jnp.bfloat16)
    return lax.reduce_window(x, init, lax.max,
                             (1, 3, 3, 1), (1, 2, 2, 1),
                             ((0, 0), (1, 1), (1, 1), (0, 0)))


@jax.jit
def head(x, fc_w, fc_b):
    # AvgPool2d(7, stride=1) on a 7x7 map == global mean; then view(B, 2048).
    feat = jnp.mean(x.astype(jnp.float32), axis=(1, 2))
    return jnp.dot(feat, fc_w) + fc_b[None, :]


# ----------------------------------------------------------------------------
# Parameters (deterministic init mirroring Resnet50.init_param)
# ----------------------------------------------------------------------------
def _conv_init(key, k, cin, cout):
    std = math.sqrt(2.0 / (k * k * cout))        # n = kh*kw*out_channels
    w = jax.random.normal(key, (k, k, cin, cout), jnp.float32) * std
    return w.astype(jnp.bfloat16)


def make_params(key):
    keys = iter(jax.random.split(key, 128))
    P = {}
    P["conv1"] = _conv_init(next(keys), 7, 3, 64)
    P["bn1_g"] = jnp.ones((64,), jnp.float32)
    P["bn1_b"] = jnp.zeros((64,), jnp.float32)

    layer_cfg = [(64, 3, 1), (128, 4, 2), (256, 6, 2), (512, 3, 2)]
    inplanes = 64
    stacks = []
    for planes, blocks, stride in layer_cfg:
        stack = []
        for b_idx in range(blocks):
            blk = {
                "w1": _conv_init(next(keys), 1, inplanes, planes),
                "g1": jnp.ones((planes,), jnp.float32),
                "b1": jnp.zeros((planes,), jnp.float32),
                "w2": _conv_init(next(keys), 3, planes, planes),
                "g2": jnp.ones((planes,), jnp.float32),
                "b2": jnp.zeros((planes,), jnp.float32),
                "w3": _conv_init(next(keys), 1, planes, planes * 4),
                "g3": jnp.ones((planes * 4,), jnp.float32),
                "b3": jnp.zeros((planes * 4,), jnp.float32),
            }
            if b_idx == 0 and (stride != 1 or inplanes != planes * 4):
                blk["ds_w"] = _conv_init(next(keys), 1, inplanes, planes * 4)
                blk["ds_g"] = jnp.ones((planes * 4,), jnp.float32)
                blk["ds_b"] = jnp.zeros((planes * 4,), jnp.float32)
            stack.append(blk)
            inplanes = planes * 4
        stacks.append(stack)
    P["stacks"] = stacks

    # nn.Linear(2048, 2): std = sqrt(2 / (out*in)), bias = 0
    P["fc_w"] = jax.random.normal(next(keys), (2048, 2), jnp.float32) \
        * math.sqrt(2.0 / (2 * 2048))
    P["fc_b"] = jnp.zeros((2,), jnp.float32)
    return P


# ----------------------------------------------------------------------------
# Forward
# ----------------------------------------------------------------------------
def bottleneck(x, blk, stride):
    # conv1 (1x1): input x is already a normalized activation.
    y1, s1, b1 = conv_bn_stats(x, blk["w1"], blk["g1"], blk["b1"],
                               stride=1, pad=0)
    # conv2 (3x3): bn1+relu folded into the im2col producer (XLA fusion).
    y2, s2, b2 = conv_bn_stats(y1, blk["w2"], blk["g2"], blk["b2"],
                               stride=stride, pad=1, in_scale=s1, in_bias=b1)
    # conv3 (1x1): bn2+relu applied inside the matmul kernel on the A tile.
    y3, s3, b3 = conv_bn_stats(y2, blk["w3"], blk["g3"], blk["b3"],
                               stride=1, pad=0, in_scale=s2, in_bias=b2)
    if "ds_w" in blk:
        yd, sd, bd = conv_bn_stats(x, blk["ds_w"], blk["ds_g"], blk["ds_b"],
                                   stride=stride, pad=0)
        return bn_bn_add_relu(y3, s3, b3, yd, sd, bd)
    return bn_add_relu(y3, s3, b3, x)


def resnet50_forward(params, x_nchw):
    x = jnp.transpose(x_nchw, (0, 2, 3, 1)).astype(jnp.bfloat16)   # NCHW -> NHWC
    y0, s0, b0 = conv_bn_stats(x, params["conv1"], params["bn1_g"],
                               params["bn1_b"], stride=2, pad=3)
    x = stem_bn_relu_maxpool(y0, s0, b0)
    for s_idx, stack in enumerate(params["stacks"]):
        for b_idx, blk in enumerate(stack):
            stride = 2 if (s_idx > 0 and b_idx == 0) else 1
            x = bottleneck(x, blk, stride)
    return head(x, params["fc_w"], params["fc_b"])


if __name__ == "__main__":
    root = jax.random.PRNGKey(0)
    pkey, xkey = jax.random.split(root)
    params = make_params(pkey)
    # ResNet-50's avgpool(7) + fc(2048, 2) require 224x224 spatial input.
    x = jax.random.normal(xkey, (2, 3, 224, 224), jnp.float32)
    logits = resnet50_forward(params, x)
    logits = jax.block_until_ready(logits)
    assert logits.shape == (2, 2) and logits.dtype == jnp.float32
    print("KERNEL_OK")
</pallas_src>

<mosaic_0001>
module attributes {stable_mosaic.version = 11 : i64} {
  func.func @_mm_stats_kernel(%arg0: i32, %arg1: i32, %arg2: i32, %arg3: memref<896x147xbf16, #tpu.memory_space<vmem>>, %arg4: memref<147x64xbf16, #tpu.memory_space<vmem>>, %arg5: memref<896x64xbf16, #tpu.memory_space<vmem>>, %arg6: memref<1x1x64xf32, #tpu.memory_space<vmem>>, %arg7: memref<1x1x64xf32, #tpu.memory_space<vmem>>, %arg8: memref<896x64xf32, #tpu.memory_space<vmem>>) attributes {dimension_semantics = [#tpu.dimension_semantics<parallel>, #tpu.dimension_semantics<parallel>, #tpu.dimension_semantics<arbitrary>], iteration_bounds = array<i64: 28, 1, 1>, scalar_prefetch = 0 : i64, scratch_operands = 1 : i64, tpu.core_type = #tpu.core_type<tc>, window_params = [{transform_indices = @transform_0, window_bounds = array<i64: 896, 147>}, {transform_indices = @transform_1, window_bounds = array<i64: 147, 64>}, {transform_indices = @transform_2, window_bounds = array<i64: 896, 64>}, {transform_indices = @transform_3, window_bounds = array<i64: 1, 1, 64>}, {transform_indices = @transform_4, window_bounds = array<i64: 1, 1, 64>}]} {
    %c0_i32 = arith.constant 0 : i32
    %0 = arith.cmpi eq, %arg2, %c0_i32 : i32
    %1 = arith.extui %0 : i1 to i32
    %c0_i32_0 = arith.constant 0 : i32
    %2 = arith.cmpi ne, %1, %c0_i32_0 : i32
    scf.if %2 {
      %cst_10 = arith.constant 0.000000e+00 : f32
      %12 = vector.broadcast %cst_10 : f32 to vector<896x64xf32>
      %c0_11 = arith.constant 0 : index
      %c0_12 = arith.constant 0 : index
      %13 = vector.load %arg8[%c0_11, %c0_12] : memref<896x64xf32, #tpu.memory_space<vmem>>, vector<896x64xf32>
      tpu.vector_store %arg8[%c0_11, %c0_12], %12 {strides = array<i32>} : memref<896x64xf32, #tpu.memory_space<vmem>>, vector<896x64xf32>,
    } else {
    }
    %c0 = arith.constant 0 : index
    %c0_1 = arith.constant 0 : index
    %3 = vector.load %arg8[%c0, %c0_1] : memref<896x64xf32, #tpu.memory_space<vmem>>, vector<896x64xf32>
    %c0_2 = arith.constant 0 : index
    %c0_3 = arith.constant 0 : index
    %4 = vector.load %arg3[%c0_2, %c0_3] : memref<896x147xbf16, #tpu.memory_space<vmem>>, vector<896x147xbf16>
    %c0_4 = arith.constant 0 : index
    %c0_5 = arith.constant 0 : index
    %5 = vector.load %arg4[%c0_4, %c0_5] : memref<147x64xbf16, #tpu.memory_space<vmem>>, vector<147x64xbf16>
    %cst = arith.constant dense<0.000000e+00> : vector<896x64xf32>
    %6 = tpu.matmul %4, %5, %cst {dimension_numbers = #tpu.dot_dimension_numbers<[1], [0], [0], [1], [0, 0, 1, 1], [], []>} : vector<896x147xbf16>, vector<147x64xbf16>, vector<896x64xf32> -> vector<896x64xf32>
    %7 = arith.addf %3, %6 : vector<896x64xf32>
    %c0_6 = arith.constant 0 : index
    %c0_7 = arith.constant 0 : index
    %8 = vector.load %arg8[%c0_6, %c0_7] : memref<896x64xf32, #tpu.memory_space<vmem>>, vector<896x64xf32>
    tpu.vector_store %arg8[%c0_6, %c0_7], %7 {strides = array<i32>} : memref<896x64xf32, #tpu.memory_space<vmem>>, vector<896x64xf32>,
    %c0_i32_8 = arith.constant 0 : i32
    %9 = arith.cmpi eq, %arg2, %c0_i32_8 : i32
    %10 = arith.extui %9 : i1 to i32
    %c0_i32_9 = arith.constant 0 : i32
    %11 = arith.cmpi ne, %10, %c0_i32_9 : i32
    scf.if %11 {
      %c0_10 = arith.constant 0 : index
      %c0_11 = arith.constant 0 : index
      %12 = vector.load %arg8[%c0_10, %c0_11] : memref<896x64xf32, #tpu.memory_space<vmem>>, vector<896x64xf32>
      %13 = arith.truncf %12 : vector<896x64xf32> to vector<896x64xbf16>
      %c0_12 = arith.constant 0 : index
      %c0_13 = arith.constant 0 : index
      %14 = vector.load %arg5[%c0_12, %c0_13] : memref<896x64xbf16, #tpu.memory_space<vmem>>, vector<896x64xbf16>
      tpu.vector_store %arg5[%c0_12, %c0_13], %13 {strides = array<i32>} : memref<896x64xbf16, #tpu.memory_space<vmem>>, vector<896x64xbf16>,
      %cst_14 = arith.constant dense<0.000000e+00> : vector<64xf32>
      %15 = vector.multi_reduction <add>, %12, %cst_14 [0] : vector<896x64xf32> to vector<64xf32>
      %16 = vector.shape_cast %15 : vector<64xf32> to vector<1x64xf32>
      %17 = vector.shape_cast %16 : vector<1x64xf32> to vector<1x1x64xf32>
      %c0_15 = arith.constant 0 : index
      %c0_16 = arith.constant 0 : index
      %c0_17 = arith.constant 0 : index
      %18 = vector.load %arg6[%c0_15, %c0_16, %c0_17] : memref<1x1x64xf32, #tpu.memory_space<vmem>>, vector<1x1x64xf32>
      tpu.vector_store %arg6[%c0_15, %c0_16, %c0_17], %17 {strides = array<i32>} : memref<1x1x64xf32, #tpu.memory_space<vmem>>, vector<1x1x64xf32>,
      %19 = arith.mulf %12, %12 : vector<896x64xf32>
      %cst_18 = arith.constant dense<0.000000e+00> : vector<64xf32>
      %20 = vector.multi_reduction <add>, %19, %cst_18 [0] : vector<896x64xf32> to vector<64xf32>
      %21 = vector.shape_cast %20 : vector<64xf32> to vector<1x64xf32>
      %22 = vector.shape_cast %21 : vector<1x64xf32> to vector<1x1x64xf32>
      %c0_19 = arith.constant 0 : index
      %c0_20 = arith.constant 0 : index
      %c0_21 = arith.constant 0 : index
      %23 = vector.load %arg7[%c0_19, %c0_20, %c0_21] : memref<1x1x64xf32, #tpu.memory_space<vmem>>, vector<1x1x64xf32>
      tpu.vector_store %arg7[%c0_19, %c0_20, %c0_21], %22 {strides = array<i32>} : memref<1x1x64xf32, #tpu.memory_space<vmem>>, vector<1x1x64xf32>,
    } else {
    }
    return
  }
  func.func @transform_0(%arg0: i32, %arg1: i32, %arg2: i32) -> (i32, i32) {
    %c0_i32 = arith.constant 0 : i32
    return %arg0, %arg2 : i32, i32
  }
  func.func @transform_1(%arg0: i32, %arg1: i32, %arg2: i32) -> (i32, i32) {
    %c0_i32 = arith.constant 0 : i32
    return %arg2, %arg1 : i32, i32
  }
  func.func @transform_2(%arg0: i32, %arg1: i32, %arg2: i32) -> (i32, i32) {
    %c0_i32 = arith.constant 0 : i32
    return %arg0, %arg1 : i32, i32
  }
  func.func @transform_3(%arg0: i32, %arg1: i32, %arg2: i32) -> (i32, i32, i32) {
    %c0_i32 = arith.constant 0 : i32
    %c0_i32_0 = arith.constant 0 : i32
    return %arg0, %c0_i32, %arg1 : i32, i32, i32
  }
  func.func @transform_4(%arg0: i32, %arg1: i32, %arg2: i32) -> (i32, i32, i32) {
    %c0_i32 = arith.constant 0 : i32
    %c0_i32_0 = arith.constant 0 : i32
    return %arg0, %c0_i32, %arg1 : i32, i32, i32
  }
}

</mosaic_0001>

<bundles_post_ra>
// kernel: conv_bn_stats.1
= control target key start
LH: loop header
LB: loop body
LE: loop exit
PB: predicated region body
PF: predicated region fallthrough
CT: control target
= control target key end

     0   :  { %s4089_s15 = smov 0   ;;  %s4091_s16 = smov 0   ;;  %s5596_s0 = inlined_call_operand.vmem [shape: bf16[25088,147], index: 0, kind: input, shape index: {}]   ;;  %s5597_s1 = inlined_call_operand.vmem [shape: bf16[147,64], index: 1, kind: input, shape index: {}]   ;;  %s5598_s2 = inlined_call_operand.vmem [shape: bf16[25088,64], index: 2, kind: output, shape index: {0}]   ;;  %s5599_s3 = inlined_call_operand.vmem [shape: f32[28,1,64], index: 3, kind: output, shape index: {1}]   ;;  %s5600_s4 = inlined_call_operand.vmem [shape: f32[28,1,64], index: 4, kind: output, shape index: {2}]  }
   0x1   :  { %s4093_s17 = smov 0  }
   0x2 LB: > { %s34_s18 = sadd.s32 1, %s4056_s16  ;;  %p3304_p0 = scmp.ge.s32.totalorder %s4060_s17, 1  ;;  %s4060_s17 = sphi %s4093_s17, %s15_s17   ;;  %s4056_s16 = sphi %s4091_s16, %s5602_s16   ;;  %s4052_s15 = sphi %s4089_s15, %s5601_s15  }
   0x3   : > { %p36_p1 = scmp.ge.s32.totalorder %s34_s18, 28  ;;  %p217_p2 = scmp.lt.s32.totalorder %s4060_s17, 29 }
   0x5   : > { %s5604_s18 = smov (%p36_p1, %s34_s18), 0  ;;  %p218_p3 = pnand %p3304_p0, %p217_p2 }
   0x6   : > { %s271_s23 = smul.u32 (!%p218_p3), 112, %s4052_s15  ;;  %p301_p5 = scmp.lt.s32.totalorder (!%p218_p3), %s4052_s15, 27 }
   0x7   : > { %221 = sbr.rel (%p218_p3) target bundleno = 753 (0x2f1), region = 28 }
   0x8   : > { %p273_p4 = scmp.lt.s32.totalorder (!%p218_p3), %s271_s23, 3135 }
   0xc   : > { %v3970_v0 = vld [vmem:[%s5597_s1 + $0x38] sm:$0xff]  ;;  %v673_v1 = vld [vmem:[%s5597_s1 + $0x48] sm:$0x3]  ;;  %vm1404_vm0 = vcmask 1040384   ;;  %vm1405_vm1 = vcmask 1041408   ;;  %v3969_v3 = vld [vmem:[%s5597_s1 + $0x30] sm:$0xff] }
   0xd   : > { %v1215_v2 = vunpack.c.l.b16 %v673_v1  ;;  %1411 = vmatpush.bf16.msra.mxu0 %v3970_v0  ;;  %v4062_v4 = vmov 65535   ;;  %3972 = vmatpush.bf16.msra.mxu2 %v3970_v0  ;;  %s5606_s23 = smov (!%p273_p4, %s271_s23), 3135  ;;  %v3968_v9 = vld [vmem:[%s5597_s1 + $0x28] sm:$0xff]  ;;  %v3971_v10 = vld [vmem:[%s5597_s1 + $0x40] sm:$0xff]  ;;  %vm1235_vm2 = vcmask 154624   ;;  %v3966_v15 = vld [vmem:[%s5597_s1 + $0x18] sm:$0xff] }
   0xe   : > { %v1406_v5 = vsel %vm1404_vm0, 4294967295, %v4062_v4  ;;  %s3850_s30 = sshll.u32 %s5606_s23, 3  ;;  %v3967_v14 = vld [vmem:[%s5597_s1 + $0x20] sm:$0xff]  ;;  %v3965_v16 = vld [vmem:[%s5597_s1 + $0x10] sm:$0xff]  ;;  %v3964_v17 = vld [vmem:[%s5597_s1 + $0x8] sm:$0xff]  ;;  %vm318_vm3 = vcmask 523264  }
   0xf   : > { %v1225_v6 = vpack.c.b16 %v1215_v2, %v1215_v2  ;;  %v1407_v7 = vsel %vm1405_vm1, %v1406_v5, 0  ;;  %s4131_s7 = scalar_lea.vmem %s5596_s0, %s3850_s30  ;;  %v3963_v21 = vld [vmem:[%s5597_s1] sm:$0xff]  ;;  %v4063_v2 = vmov 0.0   ;;  %s3307_s22 = sshll.u32 %s5606_s23, 2  ;;  %vm2441_vm4 = vcmask 519168  }
  0x10   : > { %v3851_v11 = vld [vmem:[%s4131_s7 + $0x4] sm:$0xf]  ;;  %v3312_v12 = vld [vmem:[%s4131_s7 + $0x8] sm:$0xf0]  ;;  %v3853_v18 = vld [vmem:[%s4131_s7 + $0x14] sm:$0xf]  ;;  %s4309_s26 = scalar_lea.vmem %s5598_s2, %s3307_s22 }
  0x11   : > { %v1409_v8 = vand.u32 %v1407_v7, %v1225_v6  ;;  %1412 = vmatpush.bf16.msra.mxu0 %v3969_v3  ;;  %3973 = vmatpush.bf16.msra.mxu2 %v3969_v3  ;;  %v3315_v13 = vor.u32 %v3851_v11, %v3312_v12  ;;  %v3320_v19 = vld [vmem:[%s4131_s7 + $0x18] sm:$0xf0]  ;;  %v3310_v22 = vld [vmem:[%s4131_s7] sm:$0xf]  ;;  %v3852_v23 = vld [vmem:[%s4131_s7 + $0x4] sm:$0xf0] }
  0x12   : > { %v3323_v20 = vor.u32 %v3853_v18, %v3320_v19  ;;  %v3311_v24 = vor.u32 %v3852_v23, %v3310_v22  ;;  %v3855_v25 = vld [vmem:[%s4131_s7 + $0x24] sm:$0xf]  ;;  %v3328_v26 = vld [vmem:[%s4131_s7 + $0x28] sm:$0xf0]  ;;  %v3318_v28 = vld [vmem:[%s4131_s7 + $0x10] sm:$0xf] }
  0x13   : > { %1706 = vmatpush.bf16.msra.mxu1 %v1409_v8  ;;  %3980 = vmatpush.bf16.msra.mxu3 %v1409_v8  ;;  %v3331_v27 = vor.u32 %v3855_v25, %v3328_v26  ;;  %v3854_v29 = vld [vmem:[%s4131_s7 + $0x14] sm:$0xf0]  ;;  %v3857_v31 = vld [vmem:[%s4131_s7 + $0x34] sm:$0xf]  ;;  %v3336_v32 = vld [vmem:[%s4131_s7 + $0x38] sm:$0xf0] }
  0x14   : > { %v3319_v30 = vor.u32 %v3854_v29, %v3318_v28  ;;  %v3339_v33 = vor.u32 %v3857_v31, %v3336_v32  ;;  %v3326_v34 = vld [vmem:[%s4131_s7 + $0x20] sm:$0xf]  ;;  %v3856_v35 = vld [vmem:[%s4131_s7 + $0x24] sm:$0xf0]  ;;  %v3859_v37 = vld [vmem:[%s4131_s7 + $0x44] sm:$0xf] }
  0x15   : > { %1413 = vmatpush.bf16.msra.mxu0 %v3968_v9  ;;  %3974 = vmatpush.bf16.msra.mxu2 %v3968_v9  ;;  %v3327_v36 = vor.u32 %v3856_v35, %v3326_v34  ;;  %v3344_v38 = vld [vmem:[%s4131_s7 + $0x48] sm:$0xf0]  ;;  %v3334_v40 = vld [vmem:[%s4131_s7 + $0x30] sm:$0xf]  ;;  %v3858_v41 = vld [vmem:[%s4131_s7 + $0x34] sm:$0xf0] }
  0x16   : > { %v3347_v39 = vor.u32 %v3859_v37, %v3344_v38  ;;  %v3335_v42 = vor.u32 %v3858_v41, %v3334_v40  ;;  %v3861_v43 = vld [vmem:[%s4131_s7 + $0x54] sm:$0xf]  ;;  %v3352_v44 = vld [vmem:[%s4131_s7 + $0x58] sm:$0xf0]  ;;  %v3342_v46 = vld [vmem:[%s4131_s7 + $0x40] sm:$0xf] }
  0x17   : > { %1707 = vmatpush.bf16.msra.mxu1 %v3971_v10  ;;  %3981 = vmatpush.bf16.msra.mxu3 %v3971_v10  ;;  %v3355_v45 = vor.u32 %v3861_v43, %v3352_v44  ;;  %v3860_v47 = vld [vmem:[%s4131_s7 + $0x44] sm:$0xf0]  ;;  %v3534_v49 = vld [vmem:[%s4131_s7 + $0x1c0] sm:$0xf]  ;;  %v3863_v52 = vld [vmem:[%s4131_s7 + $0x64] sm:$0xf] }
  0x18   : > { %v3343_v48 = vor.u32 %v3860_v47, %v3342_v46  ;;  %v3908_v50 = vld [vmem:[%s4131_s7 + $0x1c4] sm:$0xf0]  ;;  %v3360_v53 = vld [vmem:[%s4131_s7 + $0x68] sm:$0xf0]  ;;  %v3350_v55 = vld [vmem:[%s4131_s7 + $0x50] sm:$0xf] }
  0x19   : > { %1414 = vmatpush.bf16.msra.mxu0 %v3967_v14  ;;  %3975 = vmatpush.bf16.msra.mxu2 %v3967_v14  ;;  %v3535_v51 = vor.u32 %v3908_v50, %v3534_v49  ;;  %v3363_v54 = vor.u32 %v3863_v52, %v3360_v53  ;;  %v3862_v56 = vld [vmem:[%s4131_s7 + $0x54] sm:$0xf0]  ;;  %v3542_v58 = vld [vmem:[%s4131_s7 + $0x1d0] sm:$0xf]  ;;  %v3909_v60 = vld [vmem:[%s4131_s7 + $0x1d4] sm:$0xf] }
  0x1a   : > { %3792 = vmatmul.msk.bf16.vlgmr.msra.gmra.mxu1 %vm1235_vm2, %v3315_v13  ;;  %v3351_v57 = vor.u32 %v3862_v56, %v3350_v55  ;;  %v3910_v59 = vld [vmem:[%s4131_s7 + $0x1d4] sm:$0xf0]  ;;  %v3544_v62 = vld [vmem:[%s4131_s7 + $0x1d8] sm:$0xf0]  ;;  %v3865_v0 = vld [vmem:[%s4131_s7 + $0x74] sm:$0xf] }
  0x1b   : > { %v3543_v61 = vor.u32 %v3910_v59, %v3542_v58  ;;  %v3547_v63 = vor.u32 %v3909_v60, %v3544_v62  ;;  %v3368_v1 = vld [vmem:[%s4131_s7 + $0x78] sm:$0xf0]  ;;  %319 = vst.msk [vmem:[#allocation2] sm:$0xff] %vm318_vm3, %v4063_v2  ;;  %v3358_v4 = vld [vmem:[%s4131_s7 + $0x60] sm:$0xf]  ;;  %s5608_s15 = smov (!%p301_p5, %s4052_s15), 27 }
  0x1c   : > { %v3371_v3 = vor.u32 %v3865_v0, %v3368_v1  ;;  %v3864_v5 = vld [vmem:[%s4131_s7 + $0x64] sm:$0xf0]  ;;  %320 = vst.msk [vmem:[#allocation2 + $0x8] sm:$0xff] %vm318_vm3, %v4063_v2  ;;  %v3550_v7 = vld [vmem:[%s4131_s7 + $0x1e0] sm:$0xf]  ;;  %s306_s28 = scalar_lea.vmem %s5599_s3, %s5608_s15  ;;  %vm2783_vm5 = vcmask 516096   ;;  %s312_s5 = scalar_lea.vmem %s5600_s4, %s5608_s15 }
  0x1d   : > { %1415 = vmatpush.bf16.msra.mxu0 %v3966_v15  ;;  %3976 = vmatpush.bf16.msra.mxu2 %v3966_v15  ;;  %321 = vst.msk [vmem:[#allocation2 + $0x10] sm:$0xff] %vm318_vm3, %v4063_v2  ;;  %v3359_v6 = vor.u32 %v3864_v5, %v3358_v4  ;;  %v3912_v8 = vld [vmem:[%s4131_s7 + $0x1e4] sm:$0xf0]  ;;  %v3911_v10 = vld [vmem:[%s4131_s7 + $0x1e4] sm:$0xf] }
  0x1e   : > { %3821 = vmatmul.msk.bf16.vlgmr.msra.gmra.mxu3 %vm1235_vm2, %v3547_v63  ;;  %322 = vst.msk [vmem:[#allocation2 + $0x18] sm:$0xff] %vm318_vm3, %v4063_v2  ;;  %v3551_v9 = vor.u32 %v3912_v8, %v3550_v7  ;;  %v3552_v11 = vld [vmem:[%s4131_s7 + $0x1e8] sm:$0xf0]  ;;  %v3867_v13 = vld [vmem:[%s4131_s7 + $0x84] sm:$0xf] }
  0x1f   : > { %323 = vst.msk [vmem:[#allocation2 + $0x20] sm:$0xff] %vm318_vm3, %v4063_v2  ;;  %v3555_v12 = vor.u32 %v3911_v10, %v3552_v11  ;;  %v3376_v14 = vld [vmem:[%s4131_s7 + $0x88] sm:$0xf0]  ;;  %v3869_v19 = vld [vmem:[%s4131_s7 + $0x94] sm:$0xf] }
  0x20   : > { %324 = vst.msk [vmem:[#allocation2 + $0x28] sm:$0xff] %vm318_vm3, %v4063_v2  ;;  %v3379_v15 = vor.u32 %v3867_v13, %v3376_v14  ;;  %v3374_v22 = vld [vmem:[%s4131_s7 + $0x80] sm:$0xf]  ;;  %v3868_v23 = vld [vmem:[%s4131_s7 + $0x84] sm:$0xf0] }
  0x21   : > { %1416 = vmatpush.bf16.msra.mxu0 %v3965_v16  ;;  %3977 = vmatpush.bf16.msra.mxu2 %v3965_v16  ;;  %325 = vst.msk [vmem:[#allocation2 + $0x30] sm:$0xff] %vm318_vm3, %v4063_v2  ;;  %v3366_v16 = vld [vmem:[%s4131_s7 + $0x70] sm:$0xf]  ;;  %v3871_v37 = vld [vmem:[%s4131_s7 + $0xa4] sm:$0xf] }
  0x22   : > { %326 = vst.msk [vmem:[#allocation2 + $0x38] sm:$0xff] %vm318_vm3, %v4063_v2  ;;  %v431_v26 = vld [vmem:[#allocation2] sm:$0xff]  ;;  %v3392_v38 = vld [vmem:[%s4131_s7 + $0xa8] sm:$0xf0]  ;;  %v3382_v41 = vld [vmem:[%s4131_s7 + $0x90] sm:$0xf] }
  0x23   : > { %327 = vst.msk [vmem:[#allocation2 + $0x40] sm:$0xff] %vm318_vm3, %v4063_v2  ;;  %v3558_v44 = vld [vmem:[%s4131_s7 + $0x1f0] sm:$0xf]  ;;  %v3913_v47 = vld [vmem:[%s4131_s7 + $0x1f4] sm:$0xf]  ;;  %v432_v5 = vld [vmem:[#allocation2 + $0x8] sm:$0xff] }
  0x24   : > { %328 = vst.msk [vmem:[#allocation2 + $0x48] sm:$0xff] %vm318_vm3, %v4063_v2  ;;  %v3873_v52 = vld [vmem:[%s4131_s7 + $0xb4] sm:$0xf]  ;;  %v3400_v53 = vld [vmem:[%s4131_s7 + $0xb8] sm:$0xf0] }
  0x25   : > { %1417 = vmatpush.bf16.msra.mxu0 %v3964_v17  ;;  %3978 = vmatpush.bf16.msra.mxu2 %v3964_v17  ;;  %329 = vst.msk [vmem:[#allocation2 + $0x50] sm:$0xff] %vm318_vm3, %v4063_v2  ;;  %v3866_v17 = vld [vmem:[%s4131_s7 + $0x74] sm:$0xf0]  ;;  %v3403_v55 = vor.u32 %v3873_v52, %v3400_v53  ;;  %v3390_v56 = vld [vmem:[%s4131_s7 + $0xa0] sm:$0xf]  ;;  %v433_v7 = vld [vmem:[#allocation2 + $0x10] sm:$0xff] }
  0x26   : > { %330 = vst.msk [vmem:[#allocation2 + $0x58] sm:$0xff] %vm318_vm3, %v4063_v2  ;;  %v3367_v18 = vor.u32 %v3866_v17, %v3366_v16  ;;  %v3566_v59 = vld [vmem:[%s4131_s7 + $0x200] sm:$0xf]  ;;  %v3916_v60 = vld [vmem:[%s4131_s7 + $0x204] sm:$0xf0] }
  0x27   : > { %331 = vst.msk [vmem:[#allocation2 + $0x60] sm:$0xff] %vm318_vm3, %v4063_v2  ;;  %v3915_v62 = vld [vmem:[%s4131_s7 + $0x204] sm:$0xf]  ;;  %v3568_v63 = vld [vmem:[%s4131_s7 + $0x208] sm:$0xf0]  ;;  %v3567_v0 = vor.u32 %v3916_v60, %v3566_v59 }
  0x28   : > { %332 = vst.msk [vmem:[#allocation2 + $0x68] sm:$0xff] %vm318_vm3, %v4063_v2  ;;  %v3571_v1 = vor.u32 %v3915_v62, %v3568_v63  ;;  %v435_v13 = vld [vmem:[#allocation2 + $0x20] sm:$0xff]  ;;  %v3408_v16 = vld [vmem:[%s4131_s7 + $0xc8] sm:$0xf0] }
  0x29   : > { %1418 = vmatpush.bf16.msra.mxu0 %v3963_v21  ;;  %3979 = vmatpush.bf16.msra.mxu2 %v3963_v21  ;;  %333 = vst.msk [vmem:[#allocation2 + $0x70] sm:$0xff] %vm318_vm3, %v4063_v2 }
  0x2a   : > { %3793 = vmatmul.msk.bf16.gmra.mxu1 %vm1235_vm2, %v3323_v20  ;;  %334 = vst.msk [vmem:[#allocation2 + $0x78] sm:$0xff] %vm318_vm3, %v4063_v2  ;;  %v3384_v20 = vld [vmem:[%s4131_s7 + $0x98] sm:$0xf0] }
  0x2b   : > { %335 = vst.msk [vmem:[#allocation2 + $0x80] sm:$0xff] %vm318_vm3, %v4063_v2  ;;  %v3387_v21 = vor.u32 %v3869_v19, %v3384_v20 }
  0x2c   : > { %1419 = vmatmul.bf16.vlgmr.msra.gmra.mxu0 %v3311_v24  ;;  %1559 = vmatmul.bf16.vlgmr.msra.gmra.mxu2 %v3535_v51  ;;  %336 = vst.msk [vmem:[#allocation2 + $0x88] sm:$0xff] %vm318_vm3, %v4063_v2  ;;  %v3375_v24 = vor.u32 %v3868_v23, %v3374_v22  ;;  %v3398_v22 = vld [vmem:[%s4131_s7 + $0xb0] sm:$0xf]  ;;  %v3874_v23 = vld [vmem:[%s4131_s7 + $0xb4] sm:$0xf0] }
  0x2d   : > { %337 = vst.msk [vmem:[#allocation2 + $0x90] sm:$0xff] %vm318_vm3, %v4063_v2 }
  0x2e   : > { %3822 = vmatmul.msk.bf16.gmra.mxu3 %vm1235_vm2, %v3555_v12  ;;  %338 = vst.msk [vmem:[#allocation2 + $0x98] sm:$0xff] %vm318_vm3, %v4063_v2 }
  0x2f   : > { %339 = vst.msk [vmem:[#allocation2 + $0xa0] sm:$0xff] %vm318_vm3, %v4063_v2 }
  0x30   : > { %340 = vst.msk [vmem:[#allocation2 + $0xa8] sm:$0xff] %vm318_vm3, %v4063_v2 }
  0x31   : > { %341 = vst.msk [vmem:[#allocation2 + $0xb0] sm:$0xff] %vm318_vm3, %v4063_v2 }
  0x32   : > { %342 = vst.msk [vmem:[#allocation2 + $0xb8] sm:$0xff] %vm318_vm3, %v4063_v2 }
  0x33   : > { %343 = vst.msk [vmem:[#allocation2 + $0xc0] sm:$0xff] %vm318_vm3, %v4063_v2 }
  0x34   : > { %344 = vst.msk [vmem:[#allocation2 + $0xc8] sm:$0xff] %vm318_vm3, %v4063_v2 }
  0x35   : > { %345 = vst.msk [vmem:[#allocation2 + $0xd0] sm:$0xff] %vm318_vm3, %v4063_v2 }
  0x36   : > { %346 = vst.msk [vmem:[#allocation2 + $0xd8] sm:$0xff] %vm318_vm3, %v4063_v2 }
  0x37   : > { %347 = vst.msk [vmem:[#allocation2 + $0xe0] sm:$0xff] %vm318_vm3, %v4063_v2 }
  0x38   : > { %348 = vst.msk [vmem:[#allocation2 + $0xe8] sm:$0xff] %vm318_vm3, %v4063_v2 }
  0x39   : > { %349 = vst.msk [vmem:[#allocation2 + $0xf0] sm:$0xff] %vm318_vm3, %v4063_v2 }
  0x3a   : > { %3794 = vmatmul.msk.bf16.gmra.mxu1 %vm1235_vm2, %v3331_v27  ;;  %350 = vst.msk [vmem:[#allocation2 + $0xf8] sm:$0xff] %vm318_vm3, %v4063_v2 }
  0x3b   : > { %351 = vst.msk [vmem:[#allocation2 + $0x100] sm:$0xff] %vm318_vm3, %v4063_v2 }
  0x3c   : > { %1424 = vmatmul.bf16.gmra.mxu0 %v3319_v30  ;;  %1564 = vmatmul.bf16.gmra.mxu2 %v3543_v61  ;;  %352 = vst.msk [vmem:[#allocation2 + $0x108] sm:$0xff] %vm318_vm3, %v4063_v2 }
  0x3d   : > { %353 = vst.msk [vmem:[#allocation2 + $0x110] sm:$0xff] %vm318_vm3, %v4063_v2 }
  0x3e   : > { %354 = vst.msk [vmem:[#allocation2 + $0x118] sm:$0xff] %vm318_vm3, %v4063_v2 }
  0x3f   : > { %355 = vst.msk [vmem:[#allocation2 + $0x120] sm:$0xff] %vm318_vm3, %v4063_v2 }
  0x40   : > { %356 = vst.msk [vmem:[#allocation2 + $0x128] sm:$0xff] %vm318_vm3, %v4063_v2 }
  0x41   : > { %357 = vst.msk [vmem:[#allocation2 + $0x130] sm:$0xff] %vm318_vm3, %v4063_v2 }
  0x42   : > { %358 = vst.msk [vmem:[#allocation2 + $0x138] sm:$0xff] %vm318_vm3, %v4063_v2 }
  0x43   : > { %359 = vst.msk [vmem:[#allocation2 + $0x140] sm:$0xff] %vm318_vm3, %v4063_v2 }
  0x44   : > { %360 = vst.msk [vmem:[#allocation2 + $0x148] sm:$0xff] %vm318_vm3, %v4063_v2 }
  0x45   : > { %361 = vst.msk [vmem:[#allocation2 + $0x150] sm:$0xff] %vm318_vm3, %v4063_v2 }
  0x46   : > { %362 = vst.msk [vmem:[#allocation2 + $0x158] sm:$0xff] %vm318_vm3, %v4063_v2 }
  0x47   : > { %363 = vst.msk [vmem:[#allocation2 + $0x160] sm:$0xff] %vm318_vm3, %v4063_v2 }
  0x48   : > { %364 = vst.msk [vmem:[#allocation2 + $0x168] sm:$0xff] %vm318_vm3, %v4063_v2 }
  0x49   : > { %365 = vst.msk [vmem:[#allocation2 + $0x170] sm:$0xff] %vm318_vm3, %v4063_v2 }
  0x4a   : > { %3795 = vmatmul.msk.bf16.gmra.mxu1 %vm1235_vm2, %v3339_v33  ;;  %366 = vst.msk [vmem:[#allocation2 + $0x178] sm:$0xff] %vm318_vm3, %v4063_v2 }
  0x4b   : > { %367 = vst.msk [vmem:[#allocation2 + $0x180] sm:$0xff] %vm318_vm3, %v4063_v2 }
  0x4c   : > { %1429 = vmatmul.bf16.gmra.mxu0 %v3327_v36  ;;  %1569 = vmatmul.bf16.gmra.mxu2 %v3551_v9  ;;  %368 = vst.msk [vmem:[#allocation2 + $0x188] sm:$0xff] %vm318_vm3, %v4063_v2  ;;  %v434_v9 = vld [vmem:[#allocation2 + $0x18] sm:$0xff] }
  0x4d   : > { %369 = vst.msk [vmem:[#allocation2 + $0x190] sm:$0xff] %vm318_vm3, %v4063_v2 }
  0x4e   : > { %370 = vst.msk [vmem:[#allocation2 + $0x198] sm:$0xff] %vm318_vm3, %v4063_v2 }
  0x4f   : > { %371 = vst.msk [vmem:[#allocation2 + $0x1a0] sm:$0xff] %vm318_vm3, %v4063_v2 }
  0x50   : > { %372 = vst.msk [vmem:[#allocation2 + $0x1a8] sm:$0xff] %vm318_vm3, %v4063_v2 }
  0x51   : > { %373 = vst.msk [vmem:[#allocation2 + $0x1b0] sm:$0xff] %vm318_vm3, %v4063_v2 }
  0x52   : > { %374 = vst.msk [vmem:[#allocation2 + $0x1b8] sm:$0xff] %vm318_vm3, %v4063_v2 }
  0x53   : > { %375 = vst.msk [vmem:[#allocation2 + $0x1c0] sm:$0xff] %vm318_vm3, %v4063_v2 }
  0x54   : > { %376 = vst.msk [vmem:[#allocation2 + $0x1c8] sm:$0xff] %vm318_vm3, %v4063_v2 }
  0x55   : > { %377 = vst.msk [vmem:[#allocation2 + $0x1d0] sm:$0xff] %vm318_vm3, %v4063_v2 }
  0x56   : > { %378 = vst.msk [vmem:[#allocation2 + $0x1d8] sm:$0xff] %vm318_vm3, %v4063_v2 }
  0x57   : > { %379 = vst.msk [vmem:[#allocation2 + $0x1e0] sm:$0xff] %vm318_vm3, %v4063_v2 }
  0x58   : > { %380 = vst.msk [vmem:[#allocation2 + $0x1e8] sm:$0xff] %vm318_vm3, %v4063_v2 }
  0x59   : > { %381 = vst.msk [vmem:[#allocation2 + $0x1f0] sm:$0xff] %vm318_vm3, %v4063_v2 }
  0x5a   : > { %3796 = vmatmul.msk.bf16.gmra.mxu1 %vm1235_vm2, %v3347_v39  ;;  %382 = vst.msk [vmem:[#allocation2 + $0x1f8] sm:$0xff] %vm318_vm3, %v4063_v2  ;;  %v3395_v39 = vor.u32 %v3871_v37, %v3392_v38 }
  0x5b   : > { %383 = vst.msk [vmem:[#allocation2 + $0x200] sm:$0xff] %vm318_vm3, %v4063_v2 }
  0x5c   : > { %1434 = vmatmul.bf16.gmra.mxu0 %v3335_v42  ;;  %384 = vst.msk [vmem:[#allocation2 + $0x208] sm:$0xff] %vm318_vm3, %v4063_v2  ;;  %v3870_v42 = vld [vmem:[%s4131_s7 + $0x94] sm:$0xf0] }
  0x5d   : > { %385 = vst.msk [vmem:[#allocation2 + $0x210] sm:$0xff] %vm318_vm3, %v4063_v2  ;;  %v3383_v43 = vor.u32 %v3870_v42, %v3382_v41 }
  0x5e   : > { %386 = vst.msk [vmem:[#allocation2 + $0x218] sm:$0xff] %vm318_vm3, %v4063_v2 }
  0x5f   : > { %387 = vst.msk [vmem:[#allocation2 + $0x220] sm:$0xff] %vm318_vm3, %v4063_v2 }
  0x60   : > { %388 = vst.msk [vmem:[#allocation2 + $0x228] sm:$0xff] %vm318_vm3, %v4063_v2 }
  0x61   : > { %389 = vst.msk [vmem:[#allocation2 + $0x230] sm:$0xff] %vm318_vm3, %v4063_v2 }
  0x62   : > { %390 = vst.msk [vmem:[#allocation2 + $0x238] sm:$0xff] %vm318_vm3, %v4063_v2 }
  0x63   : > { %391 = vst.msk [vmem:[#allocation2 + $0x240] sm:$0xff] %vm318_vm3, %v4063_v2 }
  0x64   : > { %392 = vst.msk [vmem:[#allocation2 + $0x248] sm:$0xff] %vm318_vm3, %v4063_v2 }
  0x65   : > { %393 = vst.msk [vmem:[#allocation2 + $0x250] sm:$0xff] %vm318_vm3, %v4063_v2 }
  0x66   : > { %394 = vst.msk [vmem:[#allocation2 + $0x258] sm:$0xff] %vm318_vm3, %v4063_v2 }
  0x67   : > { %395 = vst.msk [vmem:[#allocation2 + $0x260] sm:$0xff] %vm318_vm3, %v4063_v2 }
  0x68   : > { %396 = vst.msk [vmem:[#allocation2 + $0x268] sm:$0xff] %vm318_vm3, %v4063_v2 }
  0x69   : > { %397 = vst.msk [vmem:[#allocation2 + $0x270] sm:$0xff] %vm318_vm3, %v4063_v2 }
  0x6a   : > { %3797 = vmatmul.msk.bf16.gmra.mxu1 %vm1235_vm2, %v3355_v45  ;;  %398 = vst.msk [vmem:[#allocation2 + $0x278] sm:$0xff] %vm318_vm3, %v4063_v2  ;;  %v3914_v45 = vld [vmem:[%s4131_s7 + $0x1f4] sm:$0xf0] }
  0x6b   : > { %399 = vst.msk [vmem:[#allocation2 + $0x280] sm:$0xff] %vm318_vm3, %v4063_v2  ;;  %v3559_v46 = vor.u32 %v3914_v45, %v3558_v44 }
  0x6c   : > { %1439 = vmatmul.bf16.gmra.mxu0 %v3343_v48  ;;  %400 = vst.msk [vmem:[#allocation2 + $0x288] sm:$0xff] %vm318_vm3, %v4063_v2  ;;  %v3560_v48 = vld [vmem:[%s4131_s7 + $0x1f8] sm:$0xf0] }
  0x6d   : > { %401 = vst.msk [vmem:[#allocation2 + $0x290] sm:$0xff] %vm318_vm3, %v4063_v2  ;;  %v3563_v49 = vor.u32 %v3913_v47, %v3560_v48  ;;  %1574 = vmatmul.bf16.gmra.mxu2 %v3559_v46 }
  0x6e   : > { %402 = vst.msk [vmem:[#allocation2 + $0x298] sm:$0xff] %vm318_vm3, %v4063_v2 }
  0x6f   : > { %403 = vst.msk [vmem:[#allocation2 + $0x2a0] sm:$0xff] %vm318_vm3, %v4063_v2  ;;  %3823 = vmatmul.msk.bf16.gmra.mxu3 %vm1235_vm2, %v3563_v49 }
  0x70   : > { %404 = vst.msk [vmem:[#allocation2 + $0x2a8] sm:$0xff] %vm318_vm3, %v4063_v2 }
  0x71   : > { %405 = vst.msk [vmem:[#allocation2 + $0x2b0] sm:$0xff] %vm318_vm3, %v4063_v2 }
  0x72   : > { %406 = vst.msk [vmem:[#allocation2 + $0x2b8] sm:$0xff] %vm318_vm3, %v4063_v2 }
  0x73   : > { %407 = vst.msk [vmem:[#allocation2 + $0x2c0] sm:$0xff] %vm318_vm3, %v4063_v2 }
  0x74   : > { %408 = vst.msk [vmem:[#allocation2 + $0x2c8] sm:$0xff] %vm318_vm3, %v4063_v2 }
  0x75   : > { %409 = vst.msk [vmem:[#allocation2 + $0x2d0] sm:$0xff] %vm318_vm3, %v4063_v2 }
  0x76   : > { %410 = vst.msk [vmem:[#allocation2 + $0x2d8] sm:$0xff] %vm318_vm3, %v4063_v2 }
  0x77   : > { %411 = vst.msk [vmem:[#allocation2 + $0x2e0] sm:$0xff] %vm318_vm3, %v4063_v2 }
  0x78   : > { %412 = vst.msk [vmem:[#allocation2 + $0x2e8] sm:$0xff] %vm318_vm3, %v4063_v2 }
  0x79   : > { %413 = vst.msk [vmem:[#allocation2 + $0x2f0] sm:$0xff] %vm318_vm3, %v4063_v2 }
  0x7a   : > { %3798 = vmatmul.msk.bf16.gmra.mxu1 %vm1235_vm2, %v3363_v54  ;;  %414 = vst.msk [vmem:[#allocation2 + $0x2f8] sm:$0xff] %vm318_vm3, %v4063_v2 }
  0x7b   : > { %415 = vst.msk [vmem:[#allocation2 + $0x300] sm:$0xff] %vm318_vm3, %v4063_v2 }
  0x7c   : > { %1444 = vmatmul.bf16.gmra.mxu0 %v3351_v57  ;;  %416 = vst.msk [vmem:[#allocation2 + $0x308] sm:$0xff] %vm318_vm3, %v4063_v2  ;;  %v3872_v57 = vld [vmem:[%s4131_s7 + $0xa4] sm:$0xf0] }
  0x7d   : > { %417 = vst.msk [vmem:[#allocation2 + $0x310] sm:$0xff] %vm318_vm3, %v4063_v2  ;;  %v3391_v58 = vor.u32 %v3872_v57, %v3390_v56  ;;  %1579 = vmatmul.bf16.gmra.mxu2 %v3567_v0 }
  0x7e   : > { %418 = vst.msk [vmem:[#allocation2 + $0x318] sm:$0xff] %vm318_vm3, %v4063_v2 }
  0x7f   : > { %419 = vst.msk [vmem:[#allocation2 + $0x320] sm:$0xff] %vm318_vm3, %v4063_v2  ;;  %3824 = vmatmul.msk.bf16.gmra.mxu3 %vm1235_vm2, %v3571_v1 }
  0x80   : > { %420 = vst.msk [vmem:[#allocation2 + $0x328] sm:$0xff] %vm318_vm3, %v4063_v2 }
  0x81   : > { %421 = vst.msk [vmem:[#allocation2 + $0x330] sm:$0xff] %vm318_vm3, %v4063_v2 }
  0x82   : > { %422 = vst.msk [vmem:[#allocation2 + $0x338] sm:$0xff] %vm318_vm3, %v4063_v2 }
  0x83   : > { %423 = vst.msk [vmem:[#allocation2 + $0x340] sm:$0xff] %vm318_vm3, %v4063_v2 }
  0x84   : > { %424 = vst.msk [vmem:[#allocation2 + $0x348] sm:$0xff] %vm318_vm3, %v4063_v2 }
  0x85   : > { %425 = vst.msk [vmem:[#allocation2 + $0x350] sm:$0xff] %vm318_vm3, %v4063_v2 }
  0x86   : > { %426 = vst.msk [vmem:[#allocation2 + $0x358] sm:$0xff] %vm318_vm3, %v4063_v2 }
  0x87   : > { %427 = vst.msk [vmem:[#allocation2 + $0x360] sm:$0xff] %vm318_vm3, %v4063_v2 }
  0x88   : > { %428 = vst.msk [vmem:[#allocation2 + $0x368] sm:$0xff] %vm318_vm3, %v4063_v2 }
  0x89   : > { %429 = vst.msk [vmem:[#allocation2 + $0x370] sm:$0xff] %vm318_vm3, %v4063_v2 }
  0x8a   : > { %3799 = vmatmul.msk.bf16.gmra.mxu1 %vm1235_vm2, %v3371_v3  ;;  %430 = vst.msk [vmem:[#allocation2 + $0x378] sm:$0xff] %vm318_vm3, %v4063_v2  ;;  %v437_v2 = vld [vmem:[#allocation2 + $0x30] sm:$0xff] }
  0x8c   : > { %1449 = vmatmul.bf16.gmra.mxu0 %v3359_v6 }
  0x97   : > { %v1709_v25 = vpop.f32.mrf.mxu1 }
  0x9a   : > { %3800 = vmatmul.msk.bf16.gmra.mxu1 %vm1235_vm2, %v3379_v15  ;;  %v3875_v15 = vld [vmem:[%s4131_s7 + $0xc4] sm:$0xf] }
  0x9c   : > { %1454 = vmatmul.bf16.gmra.mxu0 %v3367_v18  ;;  %v436_v18 = vld [vmem:[#allocation2 + $0x28] sm:$0xff] }
  0x9f   : > { %v4321_v32 = vpop.f32.mrf.mxu1 }
  0xa7   : > { %v4343_v33 = vpop.f32.mrf.mxu1 }
  0xa9   : > { %v1420_v27 = vpop.f32.mrf.mxu0 }
  0xaa   : > { %3801 = vmatmul.msk.bf16.gmra.mxu1 %vm1235_vm2, %v3387_v21  ;;  %v1710_v28 = vadd.f32 %v1709_v25, %v1420_v27  ;;  %v3411_v21 = vor.u32 %v3875_v15, %v3408_v16  ;;  %v3918_v27 = vld [vmem:[%s4131_s7 + $0x214] sm:$0xf0] }
  0xac   : > { %v1989_v29 = vadd.f32 %v1710_v28, %v431_v26  ;;  %1459 = vmatmul.bf16.gmra.mxu0 %v3375_v24  ;;  %v3574_v26 = vld [vmem:[%s4131_s7 + $0x210] sm:$0xf]  ;;  %v3399_v28 = vor.u32 %v3874_v23, %v3398_v22 }
  0xae   : > { %2102 = vst.msk [vmem:[#allocation2] sm:$0xff] %vm318_vm3, %v1989_v29  ;;  %v3917_v29 = vld [vmem:[%s4131_s7 + $0x214] sm:$0xf] }
  0xaf   : > { %v4367_v34 = vpop.f32.mrf.mxu1 }
  0xb1   : > { %v4375_v35 = vpop.f32.mrf.mxu0 }
  0xb2   : > { %v1712_v3 = vadd.f32 %v4321_v32, %v4375_v35  ;;  %v3575_v35 = vor.u32 %v3918_v27, %v3574_v26  ;;  %v3582_v26 = vld [vmem:[%s4131_s7 + $0x220] sm:$0xf]  ;;  %v3920_v27 = vld [vmem:[%s4131_s7 + $0x224] sm:$0xf0] }
  0xb4   : > { %v1990_v12 = vadd.f32 %v1712_v3, %v432_v5  ;;  %1584 = vmatmul.bf16.gmra.mxu2 %v3575_v35  ;;  %v3416_v3 = vld [vmem:[%s4131_s7 + $0xd8] sm:$0xf0] }
  0xb5   : > { %v4311_v30 = vld [vmem:[#allocation2] sm:$0xff] }
  0xb6   : > { %v2329_v31 = vpack.c.bf16 %v4311_v30, %v4311_v30  ;;  %2103 = vst.msk [vmem:[#allocation2 + $0x8] sm:$0xff] %vm318_vm3, %v1990_v12  ;;  %v2554_v38 = vsel %vm318_vm3, %v4311_v30, 0.0 }
  0xb7   : > { %v4391_v36 = vpop.f32.mrf.mxu1 }
  0xb8   : > { %2442 = vst.msk [vmem:[%s4309_s26] sm:$0xf] %vm2441_vm4, %v2329_v31  ;;  %v3576_v31 = vld [vmem:[%s4131_s7 + $0x218] sm:$0xf0] }
  0xb9   : > { %v1425_v40 = vpop.f32.mrf.mxu0 }
  0xba   : > { %3802 = vmatmul.msk.bf16.gmra.mxu1 %vm1235_vm2, %v3395_v39  ;;  %v1715_v6 = vadd.f32 %v4343_v33, %v1425_v40  ;;  %v2785_v33 = vmul.f32 %v4311_v30, %v4311_v30 }
  0xbc   : > { %1464 = vmatmul.bf16.gmra.mxu0 %v3383_v43  ;;  %v1991_v17 = vadd.f32 %v1715_v6, %v433_v7  ;;  %v2897_v40 = vsel %vm318_vm3, %v2785_v33, 0.0 }
  0xbd   : > { %v2218_v39 = vld [vmem:[#allocation2 + $0x8] sm:$0xff] }
  0xbe   : > { %2104 = vst.msk [vmem:[#allocation2 + $0x10] sm:$0xff] %vm318_vm3, %v1991_v17  ;;  %v2330_v41 = vpack.c.bf16 %v2218_v39, %v2218_v39  ;;  %v2555_v42 = vsel %vm318_vm3, %v2218_v39, 0.0  ;;  %v2786_v43 = vmul.f32 %v2218_v39, %v2218_v39  ;;  %v3406_v17 = vld [vmem:[%s4131_s7 + $0xc0] sm:$0xf] }
  0xbf   : > { %v1721_v50 = vpop.f32.mrf.mxu1  ;;  %v2556_v46 = vadd.f32 %v2555_v42, %v2554_v38 }
  0xc0   : > { %2443 = vst.msk [vmem:[%s4309_s26 + $0x4] sm:$0xf] %vm2441_vm4, %v2330_v41 }
  0xc1   : > { %v1427_v51 = vpop.f32.mrf.mxu0 }
  0xc2   : > { %v1717_v8 = vadd.f32 %v4367_v34, %v1427_v51 }
  0xc4   : > { %v1992_v19 = vadd.f32 %v1717_v8, %v434_v9  ;;  %v438_v8 = vld [vmem:[#allocation2 + $0x38] sm:$0xff] }
  0xc5   : > { %v2219_v44 = vld [vmem:[#allocation2 + $0x10] sm:$0xff] }
  0xc6   : > { %2105 = vst.msk [vmem:[#allocation2 + $0x18] sm:$0xff] %vm318_vm3, %v1992_v19  ;;  %v2331_v47 = vpack.c.bf16 %v2219_v44, %v2219_v44  ;;  %v2557_v48 = vsel %vm318_vm3, %v2219_v44, 0.0  ;;  %v2787_v30 = vmul.f32 %v2219_v44, %v2219_v44 }
  0xc7   : > { %v4437_v54 = vpop.f32.mrf.mxu1  ;;  %v2558_v56 = vadd.f32 %v2557_v48, %v2556_v46  ;;  %v440_v46 = vld [vmem:[#allocation2 + $0x48] sm:$0xff] }
  0xc8   : > { %2444 = vst.msk [vmem:[%s4309_s26 + $0x8] sm:$0xf] %vm2441_vm4, %v2331_v47  ;;  %v2900_v57 = vsel %vm318_vm3, %v2787_v30, 0.0 }
  0xc9   : > { %v1430_v61 = vpop.f32.mrf.mxu0 }
  0xca   : > { %3803 = vmatmul.msk.bf16.gmra.mxu1 %vm1235_vm2, %v3403_v55  ;;  %v1720_v10 = vadd.f32 %v4391_v36, %v1430_v61  ;;  %v3579_v36 = vor.u32 %v3917_v29, %v3576_v31  ;;  %v3877_v61 = vld [vmem:[%s4131_s7 + $0xd4] sm:$0xf] }
  0xcb   : > { %v3419_v16 = vor.u32 %v3877_v61, %v3416_v3 }
  0xcc   : > { %1469 = vmatmul.bf16.gmra.mxu0 %v3391_v58  ;;  %v1993_v20 = vadd.f32 %v1720_v10, %v435_v13  ;;  %3825 = vmatmul.msk.bf16.gmra.mxu3 %vm1235_vm2, %v3579_v36 }
  0xcd   : > { %v2220_v49 = vld [vmem:[#allocation2 + $0x18] sm:$0xff] }
  0xce   : > { %2106 = vst.msk [vmem:[#allocation2 + $0x20] sm:$0xff] %vm318_vm3, %v1993_v20  ;;  %v2332_v51 = vpack.c.bf16 %v2220_v49, %v2220_v49  ;;  %v2559_v52 = vsel %vm318_vm3, %v2220_v49, 0.0  ;;  %v2788_v53 = vmul.f32 %v2220_v49, %v2220_v49  ;;  %v3879_v49 = vld [vmem:[%s4131_s7 + $0xe4] sm:$0xf] }
  0xcf   : > { %v4464_v4 = vpop.f32.mrf.mxu1  ;;  %v2560_v6 = vadd.f32 %v2559_v52, %v2558_v56  ;;  %v3414_v56 = vld [vmem:[%s4131_s7 + $0xd0] sm:$0xf] }
  0xd0   : > { %2445 = vst.msk [vmem:[%s4309_s26 + $0xc] sm:$0xf] %vm2441_vm4, %v2332_v51  ;;  %v2902_v62 = vsel %vm318_vm3, %v2788_v53, 0.0 }
  0xd1   : > { %v1432_v11 = vpop.f32.mrf.mxu0 }
  0xd2   : > { %v1722_v14 = vadd.f32 %v1721_v50, %v1432_v11  ;;  %v2898_v50 = vsel %vm318_vm3, %v2786_v43, 0.0 }
  0xd3   : > { %v2899_v55 = vadd.f32 %v2898_v50, %v2897_v40  ;;  %v3424_v50 = vld [vmem:[%s4131_s7 + $0xe8] sm:$0xf0] }
  0xd4   : > { %v1994_v24 = vadd.f32 %v1722_v14, %v436_v18  ;;  %v3876_v18 = vld [vmem:[%s4131_s7 + $0xc4] sm:$0xf0] }
  0xd5   : > { %v2901_v5 = vadd.f32 %v2900_v57, %v2899_v55  ;;  %v3407_v31 = vor.u32 %v3876_v18, %v3406_v17  ;;  %v3427_v55 = vor.u32 %v3879_v49, %v3424_v50  ;;  %v3878_v57 = vld [vmem:[%s4131_s7 + $0xd4] sm:$0xf0] }
  0xd6   : > { %2107 = vst.msk [vmem:[#allocation2 + $0x28] sm:$0xff] %vm318_vm3, %v1994_v24  ;;  %v3415_v3 = vor.u32 %v3878_v57, %v3414_v56 }
  0xd7   : > { %v4489_v25 = vpop.f32.mrf.mxu1  ;;  %v2903_v12 = vadd.f32 %v2902_v62, %v2901_v5  ;;  %v3590_v62 = vld [vmem:[%s4131_s7 + $0x230] sm:$0xf]  ;;  %v3592_v5 = vld [vmem:[%s4131_s7 + $0x238] sm:$0xf0] }
  0xd9   : > { %v1435_v32 = vpop.f32.mrf.mxu0 }
  0xda   : > { %3804 = vmatmul.msk.bf16.gmra.mxu1 %vm1235_vm2, %v3411_v21  ;;  %v1725_v34 = vadd.f32 %v4437_v54, %v1435_v32  ;;  %v2221_v54 = vld [vmem:[#allocation2 + $0x20] sm:$0xff] }
  0xdb   : > { %v2333_v58 = vpack.c.bf16 %v2221_v54, %v2221_v54  ;;  %v2561_v63 = vsel %vm318_vm3, %v2221_v54, 0.0  ;;  %v2789_v0 = vmul.f32 %v2221_v54, %v2221_v54 }
  0xdc   : > { %v1995_v37 = vadd.f32 %v1725_v34, %v437_v2  ;;  %1474 = vmatmul.bf16.gmra.mxu0 %v3399_v28  ;;  %v2562_v13 = vadd.f32 %v2561_v63, %v2560_v6  ;;  %v3919_v28 = vld [vmem:[%s4131_s7 + $0x224] sm:$0xf]  ;;  %v3584_v2 = vld [vmem:[%s4131_s7 + $0x228] sm:$0xf0]  ;;  %v3922_v63 = vld [vmem:[%s4131_s7 + $0x234] sm:$0xf0] }
  0xdd   : > { %v2222_v59 = vld [vmem:[#allocation2 + $0x28] sm:$0xff]  ;;  %2446 = vst.msk [vmem:[%s4309_s26 + $0x10] sm:$0xf] %vm2441_vm4, %v2333_v58  ;;  %v2904_v9 = vsel %vm318_vm3, %v2789_v0, 0.0  ;;  %v439_v34 = vld [vmem:[#allocation2 + $0x40] sm:$0xff]  ;;  %v3587_v39 = vor.u32 %v3919_v28, %v3584_v2 }
  0xde   : > { %2108 = vst.msk [vmem:[#allocation2 + $0x30] sm:$0xff] %vm318_vm3, %v1995_v37  ;;  %v2334_v1 = vpack.c.bf16 %v2222_v59, %v2222_v59  ;;  %v2790_v7 = vmul.f32 %v2222_v59, %v2222_v59  ;;  %v2563_v10 = vsel %vm318_vm3, %v2222_v59, 0.0  ;;  %v2905_v24 = vadd.f32 %v2904_v9, %v2903_v12  ;;  %v3921_v0 = vld [vmem:[%s4131_s7 + $0x234] sm:$0xf]  ;;  %v3880_v2 = vld [vmem:[%s4131_s7 + $0xe4] sm:$0xf0] }
  0xdf   : > { %v4508_v45 = vpop.f32.mrf.mxu1  ;;  %v3583_v37 = vor.u32 %v3920_v27, %v3582_v26  ;;  %3826 = vmatmul.msk.bf16.gmra.mxu3 %vm1235_vm2, %v3587_v39  ;;  %v3432_v26 = vld [vmem:[%s4131_s7 + $0xf8] sm:$0xf0]  ;;  %v3923_v39 = vld [vmem:[%s4131_s7 + $0x244] sm:$0xf] }
  0xe0   : > { %2447 = vst.msk [vmem:[%s4309_s26 + $0x14] sm:$0xf] %vm2441_vm4, %v2334_v1  ;;  %v2906_v14 = vsel %vm318_vm3, %v2790_v7, 0.0  ;;  %v441_v7 = vld [vmem:[#allocation2 + $0x50] sm:$0xff] }
  0xe1   : > { %v1437_v60 = vpop.f32.mrf.mxu0  ;;  %v2907_v32 = vadd.f32 %v2906_v14, %v2905_v24  ;;  %1589 = vmatmul.bf16.gmra.mxu2 %v3583_v37  ;;  %v3598_v37 = vld [vmem:[%s4131_s7 + $0x240] sm:$0xf] }
  0xe2   : > { %v1727_v11 = vadd.f32 %v4464_v4, %v1437_v60  ;;  %v2564_v4 = vadd.f32 %v2563_v10, %v2562_v13  ;;  %v3591_v10 = vor.u32 %v3922_v63, %v3590_v62  ;;  %v3440_v62 = vld [vmem:[%s4131_s7 + $0x108] sm:$0xf0]  ;;  %v489_v63 = vld [vmem:[#allocation2 + $0x1d0] sm:$0xff] }
  0xe4   : > { %v1996_v22 = vadd.f32 %v1727_v11, %v438_v8  ;;  %v3595_v11 = vor.u32 %v3921_v0, %v3592_v5  ;;  %v1854_v0 = vpop.f32.mrf.mxu3 }
  0xe5   : > { %v2223_v15 = vld [vmem:[#allocation2 + $0x30] sm:$0xff] }
  0xe6   : > { %v2335_v19 = vpack.c.bf16 %v2223_v15, %v2223_v15  ;;  %v2565_v20 = vsel %vm318_vm3, %v2223_v15, 0.0  ;;  %v2791_v21 = vmul.f32 %v2223_v15, %v2223_v15  ;;  %2109 = vst.msk [vmem:[#allocation2 + $0x38] sm:$0xff] %vm318_vm3, %v1996_v22 }
  0xe7   : > { %v1734_v23 = vpop.f32.mrf.mxu1  ;;  %v2566_v33 = vadd.f32 %v2565_v20, %v2564_v4  ;;  %v3881_v4 = vld [vmem:[%s4131_s7 + $0xf4] sm:$0xf] }
  0xe8   : > { %2448 = vst.msk [vmem:[%s4309_s26 + $0x18] sm:$0xf] %vm2441_vm4, %v2335_v19  ;;  %v2908_v29 = vsel %vm318_vm3, %v2791_v21, 0.0  ;;  %v442_v21 = vld [vmem:[#allocation2 + $0x58] sm:$0xff] }
  0xe9   : > { %v1440_v35 = vpop.f32.mrf.mxu0  ;;  %v2909_v38 = vadd.f32 %v2908_v29, %v2907_v32  ;;  %v3435_v29 = vor.u32 %v3881_v4, %v3432_v26 }
  0xea   : > { %3805 = vmatmul.msk.bf16.gmra.mxu1 %vm1235_vm2, %v3419_v16  ;;  %v1730_v36 = vadd.f32 %v4489_v25, %v1440_v35 }
  0xec   : > { %v1997_v40 = vadd.f32 %v1730_v36, %v439_v34  ;;  %1479 = vmatmul.bf16.gmra.mxu0 %v3407_v31  ;;  %v3422_v31 = vld [vmem:[%s4131_s7 + $0xe0] sm:$0xf] }
  0xed   : > { %v2224_v42 = vld [vmem:[#allocation2 + $0x38] sm:$0xff] }
  0xee   : > { %2110 = vst.msk [vmem:[#allocation2 + $0x40] sm:$0xff] %vm318_vm3, %v1997_v40  ;;  %v2336_v43 = vpack.c.bf16 %v2224_v42, %v2224_v42  ;;  %v2567_v25 = vsel %vm318_vm3, %v2224_v42, 0.0  ;;  %v2792_v44 = vmul.f32 %v2224_v42, %v2224_v42  ;;  %v3600_v42 = vld [vmem:[%s4131_s7 + $0x248] sm:$0xf0] }
  0xef   : > { %v1736_v41 = vpop.f32.mrf.mxu1  ;;  %v2568_v48 = vadd.f32 %v2567_v25, %v2566_v33  ;;  %3827 = vmatmul.msk.bf16.gmra.mxu3 %vm1235_vm2, %v3595_v11  ;;  %v443_v25 = vld [vmem:[#allocation2 + $0x60] sm:$0xff] }
  0xf0   : > { %2449 = vst.msk [vmem:[%s4309_s26 + $0x1c] sm:$0xf] %vm2441_vm4, %v2336_v43  ;;  %v2910_v51 = vsel %vm318_vm3, %v2792_v44, 0.0 }
  0xf1   : > { %v1442_v47 = vpop.f32.mrf.mxu0  ;;  %v2911_v52 = vadd.f32 %v2910_v51, %v2909_v38  ;;  %1594 = vmatmul.bf16.gmra.mxu2 %v3591_v10  ;;  %v3924_v38 = vld [vmem:[%s4131_s7 + $0x244] sm:$0xf0] }
  0xf2   : > { %v1732_v30 = vadd.f32 %v4508_v45, %v1442_v47 }
  0xf4   : > { %v1998_v53 = vadd.f32 %v1732_v30, %v440_v46  ;;  %v3603_v30 = vor.u32 %v3923_v39, %v3600_v42 }
  0xf5   : > { %v2225_v54 = vld [vmem:[#allocation2 + $0x40] sm:$0xff] }
  0xf6   : > { %v2337_v58 = vpack.c.bf16 %v2225_v54, %v2225_v54  ;;  %v2569_v45 = vsel %vm318_vm3, %v2225_v54, 0.0  ;;  %v2793_v59 = vmul.f32 %v2225_v54, %v2225_v54  ;;  %2111 = vst.msk [vmem:[#allocation2 + $0x48] sm:$0xff] %vm318_vm3, %v1998_v53 }
  0xf7   : > { %v1739_v60 = vpop.f32.mrf.mxu1  ;;  %v2570_v61 = vadd.f32 %v2569_v45, %v2568_v48  ;;  %v3599_v48 = vor.u32 %v3924_v38, %v3598_v37 }
  0xf8   : > { %2450 = vst.msk [vmem:[%s4309_s26 + $0x20] sm:$0xf] %vm2441_vm4, %v2337_v58  ;;  %v2912_v1 = vsel %vm318_vm3, %v2793_v59, 0.0  ;;  %v444_v58 = vld [vmem:[#allocation2 + $0x68] sm:$0xff] }
  0xf9   : > { %v2913_v6 = vadd.f32 %v2912_v1, %v2911_v52  ;;  %v1445_v8 = vpop.f32.mrf.mxu0 }
  0xfa   : > { %3806 = vmatmul.msk.bf16.gmra.mxu1 %vm1235_vm2, %v3427_v55  ;;  %v1735_v9 = vadd.f32 %v1734_v23, %v1445_v8  ;;  %v4573_v23 = vpop.f32.mrf.mxu2  ;;  %v3882_v8 = vld [vmem:[%s4131_s7 + $0xf4] sm:$0xf0] }
  0xfc   : > { %v1999_v12 = vadd.f32 %v1735_v9, %v441_v7  ;;  %1484 = vmatmul.bf16.gmra.mxu0 %v3415_v3  ;;  %v3430_v7 = vld [vmem:[%s4131_s7 + $0xf0] sm:$0xf] }
  0xfd   : > { %v2226_v13 = vld [vmem:[#allocation2 + $0x48] sm:$0xff] }
  0xfe   : > { %v2338_v14 = vpack.c.bf16 %v2226_v13, %v2226_v13  ;;  %v2571_v15 = vsel %vm318_vm3, %v2226_v13, 0.0  ;;  %v2794_v16 = vmul.f32 %v2226_v13, %v2226_v13  ;;  %2112 = vst.msk [vmem:[#allocation2 + $0x50] sm:$0xff] %vm318_vm3, %v1999_v12 }
  0xff   : > { %v1741_v17 = vpop.f32.mrf.mxu1  ;;  %v2572_v18 = vadd.f32 %v2571_v15, %v2570_v61  ;;  %3828 = vmatmul.msk.bf16.gmra.mxu3 %vm1235_vm2, %v3603_v30  ;;  %v3883_v61 = vld [vmem:[%s4131_s7 + $0x104] sm:$0xf]  ;;  %v3885_v30 = vld [vmem:[%s4131_s7 + $0x114] sm:$0xf] }
 0x100   : > { %2451 = vst.msk [vmem:[%s4309_s26 + $0x24] sm:$0xf] %vm2441_vm4, %v2338_v14  ;;  %v2914_v19 = vsel %vm318_vm3, %v2794_v16, 0.0  ;;  %v3606_v14 = vld [vmem:[%s4131_s7 + $0x250] sm:$0xf] }
 0x101   : > { %v2915_v20 = vadd.f32 %v2914_v19, %v2913_v6  ;;  %v1447_v22 = vpop.f32.mrf.mxu0  ;;  %1599 = vmatmul.bf16.gmra.mxu2 %v3599_v48  ;;  %v3443_v6 = vor.u32 %v3883_v61, %v3440_v62  ;;  %v3926_v16 = vld [vmem:[%s4131_s7 + $0x254] sm:$0xf0]  ;;  %v3431_v19 = vor.u32 %v3882_v8, %v3430_v7  ;;  %v3616_v8 = vld [vmem:[%s4131_s7 + $0x268] sm:$0xf0] }
 0x102   : > { %v1737_v24 = vadd.f32 %v1736_v41, %v1447_v22  ;;  %v3423_v41 = vor.u32 %v3880_v2, %v3422_v31  ;;  %v4591_v46 = vpop.f32.mrf.mxu2  ;;  %v445_v22 = vld [vmem:[#allocation2 + $0x70] sm:$0xff] }
 0x104   : > { %v2000_v27 = vadd.f32 %v1737_v24, %v442_v21 }
 0x105   : > { %v2227_v28 = vld [vmem:[#allocation2 + $0x50] sm:$0xff] }
 0x106   : > { %v2339_v32 = vpack.c.bf16 %v2227_v28, %v2227_v28  ;;  %v2573_v33 = vsel %vm318_vm3, %v2227_v28, 0.0  ;;  %v2795_v34 = vmul.f32 %v2227_v28, %v2227_v28  ;;  %2113 = vst.msk [vmem:[#allocation2 + $0x58] sm:$0xff] %vm318_vm3, %v2000_v27  ;;  %v3607_v27 = vor.u32 %v3926_v16, %v3606_v14  ;;  %v490_v28 = vld [vmem:[#allocation2 + $0x1d8] sm:$0xff]  ;;  %v492_v16 = vld [vmem:[#allocation2 + $0x1e8] sm:$0xff] }
 0x107   : > { %v4581_v35 = vpop.f32.mrf.mxu1  ;;  %v2574_v36 = vadd.f32 %v2573_v33, %v2572_v18 }
 0x108   : > { %2452 = vst.msk [vmem:[%s4309_s26 + $0x28] sm:$0xf] %vm2441_vm4, %v2339_v32  ;;  %v2916_v40 = vsel %vm318_vm3, %v2795_v34, 0.0 }
 0x109   : > { %v2917_v43 = vadd.f32 %v2916_v40, %v2915_v20  ;;  %v1450_v44 = vpop.f32.mrf.mxu0  ;;  %v3608_v20 = vld [vmem:[%s4131_s7 + $0x258] sm:$0xf0] }
 0x10a   : > { %3807 = vmatmul.msk.bf16.gmra.mxu1 %vm1235_vm2, %v3435_v29  ;;  %v1740_v47 = vadd.f32 %v1739_v60, %v1450_v44  ;;  %v1565_v59 = vpop.f32.mrf.mxu2  ;;  %v1856_v29 = vpop.f32.mrf.mxu3 }
 0x10b   : > { %v1855_v1 = vadd.f32 %v1854_v0, %v1565_v59 }
 0x10c   : > { %v2001_v49 = vadd.f32 %v1740_v47, %v443_v25  ;;  %1489 = vmatmul.bf16.gmra.mxu0 %v3423_v41  ;;  %v446_v25 = vld [vmem:[#allocation2 + $0x78] sm:$0xff] }
 0x10d   : > { %v2228_v50 = vld [vmem:[#allocation2 + $0x58] sm:$0xff]  ;;  %v2047_v9 = vadd.f32 %v1855_v1, %v489_v63  ;;  %v3614_v63 = vld [vmem:[%s4131_s7 + $0x260] sm:$0xf] }
 0x10e   : > { %v2340_v51 = vpack.c.bf16 %v2228_v50, %v2228_v50  ;;  %v2575_v52 = vsel %vm318_vm3, %v2228_v50, 0.0  ;;  %v2796_v53 = vmul.f32 %v2228_v50, %v2228_v50  ;;  %2114 = vst.msk [vmem:[#allocation2 + $0x60] sm:$0xff] %vm318_vm3, %v2001_v49  ;;  %v3448_v49 = vld [vmem:[%s4131_s7 + $0x118] sm:$0xf0]  ;;  %v491_v50 = vld [vmem:[#allocation2 + $0x1e0] sm:$0xff] }
 0x10f   : > { %v4595_v54 = vpop.f32.mrf.mxu1  ;;  %v2576_v55 = vadd.f32 %v2575_v52, %v2574_v36  ;;  %2160 = vst.msk [vmem:[#allocation2 + $0x1d0] sm:$0xff] %vm318_vm3, %v2047_v9 }
 0x110   : > { %2453 = vst.msk [vmem:[%s4309_s26 + $0x2c] sm:$0xf] %vm2441_vm4, %v2340_v51  ;;  %v2918_v56 = vsel %vm318_vm3, %v2796_v53, 0.0 }
 0x111   : > { %v2919_v57 = vadd.f32 %v2918_v56, %v2917_v43  ;;  %v1452_v45 = vpop.f32.mrf.mxu0  ;;  %1604 = vmatmul.bf16.gmra.mxu2 %v3607_v27  ;;  %v3451_v56 = vor.u32 %v3885_v30, %v3448_v49  ;;  %v3622_v49 = vld [vmem:[%s4131_s7 + $0x270] sm:$0xf] }
 0x112   : > { %v1742_v60 = vadd.f32 %v1741_v17, %v1452_v45  ;;  %v3925_v17 = vld [vmem:[%s4131_s7 + $0x254] sm:$0xf]  ;;  %v1567_v4 = vpop.f32.mrf.mxu2  ;;  %v1859_v51 = vpop.f32.mrf.mxu3 }
 0x113   : > { %v3611_v31 = vor.u32 %v3925_v17, %v3608_v20  ;;  %v1857_v2 = vadd.f32 %v1856_v29, %v1567_v4 }
 0x114   : > { %v2002_v3 = vadd.f32 %v1742_v60, %v444_v58  ;;  %v3884_v58 = vld [vmem:[%s4131_s7 + $0x104] sm:$0xf0] }
 0x115   : > { %v2229_v5 = vld [vmem:[#allocation2 + $0x60] sm:$0xff]  ;;  %v2048_v34 = vadd.f32 %v1857_v2, %v490_v28  ;;  %3829 = vmatmul.msk.bf16.gmra.mxu3 %vm1235_vm2, %v3611_v31 }
 0x116   : > { %v2341_v10 = vpack.c.bf16 %v2229_v5, %v2229_v5  ;;  %v2577_v11 = vsel %vm318_vm3, %v2229_v5, 0.0  ;;  %v2797_v12 = vmul.f32 %v2229_v5, %v2229_v5  ;;  %2115 = vst.msk [vmem:[#allocation2 + $0x68] sm:$0xff] %vm318_vm3, %v2002_v3  ;;  %v3928_v3 = vld [vmem:[%s4131_s7 + $0x264] sm:$0xf0]  ;;  %v3927_v5 = vld [vmem:[%s4131_s7 + $0x264] sm:$0xf] }
 0x117   : > { %v4607_v13 = vpop.f32.mrf.mxu1  ;;  %v2578_v15 = vadd.f32 %v2577_v11, %v2576_v55  ;;  %2161 = vst.msk [vmem:[#allocation2 + $0x1d8] sm:$0xff] %vm318_vm3, %v2048_v34 }
 0x118   : > { %2454 = vst.msk [vmem:[%s4309_s26 + $0x30] sm:$0xf] %vm2441_vm4, %v2341_v10  ;;  %v2920_v18 = vsel %vm318_vm3, %v2797_v12, 0.0  ;;  %v447_v10 = vld [vmem:[#allocation2 + $0x80] sm:$0xff] }
 0x119   : > { %v2921_v21 = vadd.f32 %v2920_v18, %v2919_v57  ;;  %v1455_v24 = vpop.f32.mrf.mxu0  ;;  %v3438_v57 = vld [vmem:[%s4131_s7 + $0x100] sm:$0xf]  ;;  %v3619_v18 = vor.u32 %v3927_v5, %v3616_v8 }
 0x11a   : > { %3808 = vmatmul.msk.bf16.gmra.mxu1 %vm1235_vm2, %v3443_v6  ;;  %v1745_v26 = vadd.f32 %v4581_v35, %v1455_v24  ;;  %v2275_v35 = vld [vmem:[#allocation2 + $0x1d0] sm:$0xff]  ;;  %v1570_v47 = vpop.f32.mrf.mxu2  ;;  %v3439_v7 = vor.u32 %v3884_v58, %v3438_v57  ;;  %v1861_v17 = vpop.f32.mrf.mxu3 }
 0x11b   : > { %v2387_v41 = vpack.c.bf16 %v2275_v35, %v2275_v35  ;;  %v1860_v52 = vadd.f32 %v1859_v51, %v1570_v47  ;;  %v3929_v51 = vld [vmem:[%s4131_s7 + $0x274] sm:$0xf] }
 0x11c   : > { %v2003_v32 = vadd.f32 %v1745_v26, %v445_v22  ;;  %1494 = vmatmul.bf16.gmra.mxu0 %v3431_v19  ;;  %v449_v57 = vld [vmem:[#allocation2 + $0x90] sm:$0xff] }
 0x11d   : > { %v2230_v33 = vld [vmem:[#allocation2 + $0x68] sm:$0xff]  ;;  %2500 = vst.msk [vmem:[%s4309_s26 + $0xe8] sm:$0xf] %vm2441_vm4, %v2387_v41  ;;  %v2049_v45 = vadd.f32 %v1860_v52, %v491_v50  ;;  %v3446_v41 = vld [vmem:[%s4131_s7 + $0x110] sm:$0xf] }
 0x11e   : > { %v2342_v36 = vpack.c.bf16 %v2230_v33, %v2230_v33  ;;  %v2579_v37 = vsel %vm318_vm3, %v2230_v33, 0.0  ;;  %v2798_v38 = vmul.f32 %v2230_v33, %v2230_v33  ;;  %2116 = vst.msk [vmem:[#allocation2 + $0x70] sm:$0xff] %vm318_vm3, %v2003_v32  ;;  %v2276_v62 = vld [vmem:[#allocation2 + $0x1d8] sm:$0xff]  ;;  %v448_v32 = vld [vmem:[#allocation2 + $0x88] sm:$0xff] }
 0x11f   : > { %v4621_v39 = vpop.f32.mrf.mxu1  ;;  %v2580_v40 = vadd.f32 %v2579_v37, %v2578_v15  ;;  %v2388_v1 = vpack.c.bf16 %v2276_v62, %v2276_v62  ;;  %2162 = vst.msk [vmem:[#allocation2 + $0x1e0] sm:$0xff] %vm318_vm3, %v2049_v45  ;;  %v3615_v15 = vor.u32 %v3928_v3, %v3614_v63  ;;  %v3456_v37 = vld [vmem:[%s4131_s7 + $0x128] sm:$0xf0]  ;;  %v3930_v50 = vld [vmem:[%s4131_s7 + $0x274] sm:$0xf0] }
 0x120   : > { %2455 = vst.msk [vmem:[%s4309_s26 + $0x34] sm:$0xf] %vm2441_vm4, %v2342_v36  ;;  %v2922_v42 = vsel %vm318_vm3, %v2798_v38, 0.0  ;;  %v3887_v36 = vld [vmem:[%s4131_s7 + $0x124] sm:$0xf] }
 0x121   : > { %v2923_v43 = vadd.f32 %v2922_v42, %v2921_v21  ;;  %v1457_v44 = vpop.f32.mrf.mxu0  ;;  %2501 = vst.msk [vmem:[%s4309_s26 + $0xec] sm:$0xf] %vm2441_vm4, %v2388_v1  ;;  %1609 = vmatmul.bf16.gmra.mxu2 %v3615_v15  ;;  %v3886_v42 = vld [vmem:[%s4131_s7 + $0x114] sm:$0xf0]  ;;  %v3464_v15 = vld [vmem:[%s4131_s7 + $0x138] sm:$0xf0] }
 0x122   : > { %v1747_v48 = vadd.f32 %v4595_v54, %v1457_v44  ;;  %v1572_v12 = vpop.f32.mrf.mxu2 }
 0x123   : > { %v1862_v19 = vadd.f32 %v1861_v17, %v1572_v12  ;;  %v1864_v12 = vpop.f32.mrf.mxu3 }
 0x124   : > { %v2004_v53 = vadd.f32 %v1747_v48, %v446_v25 }
 0x125   : > { %v2231_v55 = vld [vmem:[#allocation2 + $0x70] sm:$0xff]  ;;  %v2050_v22 = vadd.f32 %v1862_v19, %v492_v16  ;;  %3830 = vmatmul.msk.bf16.gmra.mxu3 %vm1235_vm2, %v3619_v18 }
 0x126   : > { %v2343_v59 = vpack.c.bf16 %v2231_v55, %v2231_v55  ;;  %v2581_v60 = vsel %vm318_vm3, %v2231_v55, 0.0  ;;  %v2799_v54 = vmul.f32 %v2231_v55, %v2231_v55  ;;  %2117 = vst.msk [vmem:[#allocation2 + $0x78] sm:$0xff] %vm318_vm3, %v2004_v53  ;;  %v2277_v27 = vld [vmem:[#allocation2 + $0x1e0] sm:$0xff]  ;;  %v3447_v53 = vor.u32 %v3886_v42, %v3446_v41  ;;  %v3624_v55 = vld [vmem:[%s4131_s7 + $0x278] sm:$0xf0] }
 0x127   : > { %v4637_v61 = vpop.f32.mrf.mxu1  ;;  %v2582_v0 = vadd.f32 %v2581_v60, %v2580_v40  ;;  %v2389_v29 = vpack.c.bf16 %v2277_v27, %v2277_v27  ;;  %2163 = vst.msk [vmem:[#allocation2 + $0x1e8] sm:$0xff] %vm318_vm3, %v2050_v22  ;;  %v3459_v40 = vor.u32 %v3887_v36, %v3456_v37  ;;  %v3627_v60 = vor.u32 %v3929_v51, %v3624_v55  ;;  %v3888_v22 = vld [vmem:[%s4131_s7 + $0x124] sm:$0xf0]  ;;  %v3630_v27 = vld [vmem:[%s4131_s7 + $0x280] sm:$0xf] }
 0x128   : > { %2456 = vst.msk [vmem:[%s4309_s26 + $0x38] sm:$0xf] %vm2441_vm4, %v2343_v59  ;;  %v2924_v6 = vsel %vm318_vm3, %v2799_v54, 0.0  ;;  %v3623_v59 = vor.u32 %v3930_v50, %v3622_v49  ;;  %v451_v36 = vld [vmem:[#allocation2 + $0xa0] sm:$0xff] }
 0x129   : > { %v2925_v9 = vadd.f32 %v2924_v6, %v2923_v43  ;;  %v1460_v11 = vpop.f32.mrf.mxu0  ;;  %2502 = vst.msk [vmem:[%s4309_s26 + $0xf0] sm:$0xf] %vm2441_vm4, %v2389_v29  ;;  %v3932_v29 = vld [vmem:[%s4131_s7 + $0x284] sm:$0xf0] }
 0x12a   : > { %3809 = vmatmul.msk.bf16.gmra.mxu1 %vm1235_vm2, %v3451_v56  ;;  %v1750_v14 = vadd.f32 %v4607_v13, %v1460_v11  ;;  %v493_v11 = vld [vmem:[#allocation2 + $0x1f0] sm:$0xff]  ;;  %v3631_v42 = vor.u32 %v3932_v29, %v3630_v27 }
 0x12b   : > { %v1866_v41 = vpop.f32.mrf.mxu3 }
 0x12c   : > { %v2005_v20 = vadd.f32 %v1750_v14, %v447_v10  ;;  %1499 = vmatmul.bf16.gmra.mxu0 %v3439_v7  ;;  %v450_v7 = vld [vmem:[#allocation2 + $0x98] sm:$0xff]  ;;  %v3889_v14 = vld [vmem:[%s4131_s7 + $0x134] sm:$0xf] }
 0x12d   : > { %v2232_v21 = vld [vmem:[#allocation2 + $0x78] sm:$0xff] }
 0x12e   : > { %v2344_v24 = vpack.c.bf16 %v2232_v21, %v2232_v21  ;;  %v2583_v4 = vsel %vm318_vm3, %v2232_v21, 0.0  ;;  %v2800_v26 = vmul.f32 %v2232_v21, %v2232_v21  ;;  %2118 = vst.msk [vmem:[#allocation2 + $0x80] sm:$0xff] %vm318_vm3, %v2005_v20  ;;  %v2278_v47 = vld [vmem:[#allocation2 + $0x1e8] sm:$0xff]  ;;  %v3467_v20 = vor.u32 %v3889_v14, %v3464_v15  ;;  %v3454_v21 = vld [vmem:[%s4131_s7 + $0x120] sm:$0xf] }
 0x12f   : > { %v1756_v13 = vpop.f32.mrf.mxu1  ;;  %v2584_v28 = vadd.f32 %v2583_v4, %v2582_v0  ;;  %v2390_v30 = vpack.c.bf16 %v2278_v47, %v2278_v47  ;;  %v3638_v14 = vld [vmem:[%s4131_s7 + $0x290] sm:$0xf] }
 0x130   : > { %2457 = vst.msk [vmem:[%s4309_s26 + $0x3c] sm:$0xf] %vm2441_vm4, %v2344_v24  ;;  %v2926_v31 = vsel %vm318_vm3, %v2800_v26, 0.0 }
 0x131   : > { %v2927_v2 = vadd.f32 %v2926_v31, %v2925_v9  ;;  %v1462_v33 = vpop.f32.mrf.mxu0  ;;  %2503 = vst.msk [vmem:[%s4309_s26 + $0xf4] sm:$0xf] %vm2441_vm4, %v2390_v30  ;;  %1614 = vmatmul.bf16.gmra.mxu2 %v3623_v59  ;;  %v1575_v9 = vpop.f32.mrf.mxu2  ;;  %v3931_v31 = vld [vmem:[%s4131_s7 + $0x284] sm:$0xf] }
 0x132   : > { %v1752_v34 = vadd.f32 %v4621_v39, %v1462_v33  ;;  %v1865_v16 = vadd.f32 %v1864_v12, %v1575_v9  ;;  %v3632_v33 = vld [vmem:[%s4131_s7 + $0x288] sm:$0xf0] }
 0x134   : > { %v2006_v38 = vadd.f32 %v1752_v34, %v448_v32  ;;  %v2051_v19 = vadd.f32 %v1865_v16, %v493_v11  ;;  %v3455_v32 = vor.u32 %v3888_v22, %v3454_v21  ;;  %v3640_v21 = vld [vmem:[%s4131_s7 + $0x298] sm:$0xf0] }
 0x135   : > { %v2233_v35 = vld [vmem:[#allocation2 + $0x80] sm:$0xff]  ;;  %3831 = vmatmul.msk.bf16.gmra.mxu3 %vm1235_vm2, %v3627_v60 }
 0x136   : > { %v2345_v43 = vpack.c.bf16 %v2233_v35, %v2233_v35  ;;  %v2585_v25 = vsel %vm318_vm3, %v2233_v35, 0.0  ;;  %v2801_v44 = vmul.f32 %v2233_v35, %v2233_v35  ;;  %2119 = vst.msk [vmem:[#allocation2 + $0x88] sm:$0xff] %vm318_vm3, %v2006_v38  ;;  %v495_v60 = vld [vmem:[#allocation2 + $0x200] sm:$0xff] }
 0x137   : > { %v4667_v39 = vpop.f32.mrf.mxu1  ;;  %v2586_v48 = vadd.f32 %v2585_v25, %v2584_v28  ;;  %2164 = vst.msk [vmem:[#allocation2 + $0x1f0] sm:$0xff] %vm318_vm3, %v2051_v19  ;;  %v3635_v25 = vor.u32 %v3931_v31, %v3632_v33 }
 0x138   : > { %2458 = vst.msk [vmem:[%s4309_s26 + $0x40] sm:$0xf] %vm2441_vm4, %v2345_v43  ;;  %v2928_v52 = vsel %vm318_vm3, %v2801_v44, 0.0 }
 0x139   : > { %v2929_v56 = vadd.f32 %v2928_v52, %v2927_v2  ;;  %v1465_v58 = vpop.f32.mrf.mxu0  ;;  %v1577_v38 = vpop.f32.mrf.mxu2 }
 0x13a   : > { %3810 = vmatmul.msk.bf16.gmra.mxu1 %vm1235_vm2, %v3459_v40  ;;  %v1755_v45 = vadd.f32 %v4637_v61, %v1465_v58  ;;  %v494_v40 = vld [vmem:[#allocation2 + $0x1f8] sm:$0xff]  ;;  %v1867_v43 = vadd.f32 %v1866_v41, %v1577_v38 }
 0x13c   : > { %v2007_v54 = vadd.f32 %v1755_v45, %v449_v57  ;;  %1504 = vmatmul.bf16.gmra.mxu0 %v3447_v53  ;;  %v452_v57 = vld [vmem:[#allocation2 + $0xa8] sm:$0xff] }
 0x13d   : > { %v2234_v62 = vld [vmem:[#allocation2 + $0x88] sm:$0xff] }
 0x13e   : > { %v2346_v63 = vpack.c.bf16 %v2234_v62, %v2234_v62  ;;  %v2587_v0 = vsel %vm318_vm3, %v2234_v62, 0.0  ;;  %v2802_v1 = vmul.f32 %v2234_v62, %v2234_v62  ;;  %2120 = vst.msk [vmem:[#allocation2 + $0x90] sm:$0xff] %vm318_vm3, %v2007_v54  ;;  %v2279_v51 = vld [vmem:[#allocation2 + $0x1f0] sm:$0xff]  ;;  %v1869_v54 = vpop.f32.mrf.mxu3  ;;  %v3891_v62 = vld [vmem:[%s4131_s7 + $0x144] sm:$0xf] }
 0x13f   : > { %v4682_v3 = vpop.f32.mrf.mxu1  ;;  %v2588_v5 = vadd.f32 %v2587_v0, %v2586_v48  ;;  %v2052_v48 = vadd.f32 %v1867_v43, %v494_v40  ;;  %v2391_v53 = vpack.c.bf16 %v2279_v51, %v2279_v51  ;;  %v3893_v51 = vld [vmem:[%s4131_s7 + $0x154] sm:$0xf] }
 0x140   : > { %2459 = vst.msk [vmem:[%s4309_s26 + $0x44] sm:$0xf] %vm2441_vm4, %v2346_v63  ;;  %v2930_v61 = vsel %vm318_vm3, %v2802_v1, 0.0  ;;  %v3472_v63 = vld [vmem:[%s4131_s7 + $0x148] sm:$0xf0] }
 0x141   : > { %v2931_v6 = vadd.f32 %v2930_v61, %v2929_v56  ;;  %v1467_v8 = vpop.f32.mrf.mxu0  ;;  %1619 = vmatmul.bf16.gmra.mxu2 %v3631_v42  ;;  %2165 = vst.msk [vmem:[#allocation2 + $0x1f8] sm:$0xff] %vm318_vm3, %v2052_v48  ;;  %v1580_v45 = vpop.f32.mrf.mxu2 }
 0x142   : > { %v1757_v10 = vadd.f32 %v1756_v13, %v1467_v8  ;;  %2504 = vst.msk [vmem:[%s4309_s26 + $0xf8] sm:$0xf] %vm2441_vm4, %v2391_v53  ;;  %v1870_v0 = vadd.f32 %v1869_v54, %v1580_v45  ;;  %v3890_v8 = vld [vmem:[%s4131_s7 + $0x134] sm:$0xf0]  ;;  %v3470_v45 = vld [vmem:[%s4131_s7 + $0x140] sm:$0xf] }
 0x144   : > { %v2008_v17 = vadd.f32 %v1757_v10, %v450_v7  ;;  %v2053_v61 = vadd.f32 %v1870_v0, %v495_v60  ;;  %v3462_v7 = vld [vmem:[%s4131_s7 + $0x130] sm:$0xf]  ;;  %v3646_v0 = vld [vmem:[%s4131_s7 + $0x2a0] sm:$0xf] }
 0x145   : > { %v2235_v18 = vld [vmem:[#allocation2 + $0x90] sm:$0xff]  ;;  %3832 = vmatmul.msk.bf16.gmra.mxu3 %vm1235_vm2, %v3635_v25 }
 0x146   : > { %v2347_v24 = vpack.c.bf16 %v2235_v18, %v2235_v18  ;;  %v2589_v4 = vsel %vm318_vm3, %v2235_v18, 0.0  ;;  %v2803_v26 = vmul.f32 %v2235_v18, %v2235_v18  ;;  %2121 = vst.msk [vmem:[#allocation2 + $0x98] sm:$0xff] %vm318_vm3, %v2008_v17  ;;  %v3934_v17 = vld [vmem:[%s4131_s7 + $0x294] sm:$0xf0]  ;;  %v3933_v18 = vld [vmem:[%s4131_s7 + $0x294] sm:$0xf]  ;;  %v1871_v29 = vpop.f32.mrf.mxu3 }
 0x147   : > { %v4694_v13 = vpop.f32.mrf.mxu1  ;;  %v2590_v28 = vadd.f32 %v2589_v4, %v2588_v5  ;;  %2166 = vst.msk [vmem:[#allocation2 + $0x200] sm:$0xff] %vm318_vm3, %v2053_v61  ;;  %v3639_v31 = vor.u32 %v3934_v17, %v3638_v14  ;;  %v3936_v61 = vld [vmem:[%s4131_s7 + $0x2a4] sm:$0xf0] }
 0x148   : > { %2460 = vst.msk [vmem:[%s4309_s26 + $0x48] sm:$0xf] %vm2441_vm4, %v2347_v24  ;;  %v2932_v2 = vsel %vm318_vm3, %v2803_v26, 0.0  ;;  %v2280_v11 = vld [vmem:[#allocation2 + $0x1f8] sm:$0xff]  ;;  %v453_v24 = vld [vmem:[#allocation2 + $0xb0] sm:$0xff] }
 0x149   : > { %v2933_v34 = vadd.f32 %v2932_v2, %v2931_v6  ;;  %v1470_v37 = vpop.f32.mrf.mxu0  ;;  %v3475_v6 = vor.u32 %v3891_v62, %v3472_v63  ;;  %v2392_v16 = vpack.c.bf16 %v2280_v11, %v2280_v11  ;;  %v1582_v26 = vpop.f32.mrf.mxu2 }
 0x14a   : > { %3811 = vmatmul.msk.bf16.gmra.mxu1 %vm1235_vm2, %v3467_v20  ;;  %v1760_v35 = vadd.f32 %v4667_v39, %v1470_v37  ;;  %v3463_v20 = vor.u32 %v3890_v8, %v3462_v7  ;;  %v1872_v2 = vadd.f32 %v1871_v29, %v1582_v26 }
 0x14b   : > { %2505 = vst.msk [vmem:[%s4309_s26 + $0xfc] sm:$0xf] %vm2441_vm4, %v2392_v16  ;;  %v498_v16 = vld [vmem:[#allocation2 + $0x218] sm:$0xff] }
 0x14c   : > { %v2009_v44 = vadd.f32 %v1760_v35, %v451_v36  ;;  %1509 = vmatmul.bf16.gmra.mxu0 %v3455_v32  ;;  %v3643_v32 = vor.u32 %v3933_v18, %v3640_v21  ;;  %v3647_v18 = vor.u32 %v3936_v61, %v3646_v0 }
 0x14d   : > { %v2236_v47 = vld [vmem:[#allocation2 + $0x98] sm:$0xff] }
 0x14e   : > { %v2348_v30 = vpack.c.bf16 %v2236_v47, %v2236_v47  ;;  %v2591_v49 = vsel %vm318_vm3, %v2236_v47, 0.0  ;;  %v2804_v50 = vmul.f32 %v2236_v47, %v2236_v47  ;;  %2122 = vst.msk [vmem:[#allocation2 + $0xa0] sm:$0xff] %vm318_vm3, %v2009_v44  ;;  %v2281_v40 = vld [vmem:[#allocation2 + $0x200] sm:$0xff]  ;;  %v454_v44 = vld [vmem:[#allocation2 + $0xb8] sm:$0xff] }
 0x14f   : > { %v4708_v52 = vpop.f32.mrf.mxu1  ;;  %v2592_v39 = vadd.f32 %v2591_v49, %v2590_v28  ;;  %v496_v28 = vld [vmem:[#allocation2 + $0x208] sm:$0xff]  ;;  %v2393_v42 = vpack.c.bf16 %v2281_v40, %v2281_v40  ;;  %v497_v49 = vld [vmem:[#allocation2 + $0x210] sm:$0xff]  ;;  %v3895_v40 = vld [vmem:[%s4131_s7 + $0x164] sm:$0xf] }
 0x150   : > { %2461 = vst.msk [vmem:[%s4309_s26 + $0x4c] sm:$0xf] %vm2441_vm4, %v2348_v30  ;;  %v2934_v55 = vsel %vm318_vm3, %v2804_v50, 0.0  ;;  %v2054_v36 = vadd.f32 %v1872_v2, %v496_v28  ;;  %v1874_v50 = vpop.f32.mrf.mxu3 }
 0x151   : > { %v2935_v56 = vadd.f32 %v2934_v55, %v2933_v34  ;;  %v1472_v58 = vpop.f32.mrf.mxu0  ;;  %1624 = vmatmul.bf16.gmra.mxu2 %v3639_v31  ;;  %2506 = vst.msk [vmem:[%s4309_s26 + $0x100] sm:$0xf] %vm2441_vm4, %v2393_v42  ;;  %v1585_v48 = vpop.f32.mrf.mxu2 }
 0x152   : > { %v1762_v59 = vadd.f32 %v4682_v3, %v1472_v58  ;;  %2167 = vst.msk [vmem:[#allocation2 + $0x208] sm:$0xff] %vm318_vm3, %v2054_v36  ;;  %v1875_v53 = vadd.f32 %v1874_v50, %v1585_v48  ;;  %v3478_v48 = vld [vmem:[%s4131_s7 + $0x150] sm:$0xf] }
 0x154   : > { %v2010_v1 = vadd.f32 %v1762_v59, %v452_v57  ;;  %v2055_v57 = vadd.f32 %v1875_v53, %v497_v49  ;;  %v3892_v59 = vld [vmem:[%s4131_s7 + $0x144] sm:$0xf0]  ;;  %v3654_v53 = vld [vmem:[%s4131_s7 + $0x2b0] sm:$0xf] }
 0x155   : > { %v2237_v5 = vld [vmem:[#allocation2 + $0xa0] sm:$0xff]  ;;  %3833 = vmatmul.msk.bf16.gmra.mxu3 %vm1235_vm2, %v3643_v32  ;;  %v3471_v8 = vor.u32 %v3892_v59, %v3470_v45 }
 0x156   : > { %v2349_v9 = vpack.c.bf16 %v2237_v5, %v2237_v5  ;;  %v2593_v10 = vsel %vm318_vm3, %v2237_v5, 0.0  ;;  %v2805_v3 = vmul.f32 %v2237_v5, %v2237_v5  ;;  %2123 = vst.msk [vmem:[#allocation2 + $0xa8] sm:$0xff] %vm318_vm3, %v2010_v1 }
 0x157   : > { %v4724_v12 = vpop.f32.mrf.mxu1  ;;  %v2594_v15 = vadd.f32 %v2593_v10, %v2592_v39  ;;  %v3480_v39 = vld [vmem:[%s4131_s7 + $0x158] sm:$0xf0]  ;;  %2168 = vst.msk [vmem:[#allocation2 + $0x210] sm:$0xff] %vm318_vm3, %v2055_v57  ;;  %v3938_v57 = vld [vmem:[%s4131_s7 + $0x2b4] sm:$0xf0] }
 0x158   : > { %2462 = vst.msk [vmem:[%s4309_s26 + $0x50] sm:$0xf] %vm2441_vm4, %v2349_v9  ;;  %v2936_v19 = vsel %vm318_vm3, %v2805_v3, 0.0  ;;  %v3483_v58 = vor.u32 %v3893_v51, %v3480_v39  ;;  %v3648_v9 = vld [vmem:[%s4131_s7 + $0x2a8] sm:$0xf0]  ;;  %v455_v3 = vld [vmem:[#allocation2 + $0xc0] sm:$0xff]  ;;  %v1876_v17 = vpop.f32.mrf.mxu3 }
 0x159   : > { %v2937_v22 = vadd.f32 %v2936_v19, %v2935_v56  ;;  %v1475_v4 = vpop.f32.mrf.mxu0  ;;  %v2282_v62 = vld [vmem:[#allocation2 + $0x208] sm:$0xff]  ;;  %v1587_v14 = vpop.f32.mrf.mxu2 }
 0x15a   : > { %3812 = vmatmul.msk.bf16.gmra.mxu1 %vm1235_vm2, %v3475_v6  ;;  %v1765_v27 = vadd.f32 %v4694_v13, %v1475_v4  ;;  %v2394_v5 = vpack.c.bf16 %v2282_v62, %v2282_v62  ;;  %v3935_v6 = vld [vmem:[%s4131_s7 + $0x2a4] sm:$0xf]  ;;  %v1877_v19 = vadd.f32 %v1876_v17, %v1587_v14 }
 0x15c   : > { %v2011_v33 = vadd.f32 %v1765_v27, %v453_v24  ;;  %1514 = vmatmul.bf16.gmra.mxu0 %v3463_v20  ;;  %2507 = vst.msk [vmem:[%s4309_s26 + $0x104] sm:$0xf] %vm2441_vm4, %v2394_v5  ;;  %v3651_v20 = vor.u32 %v3935_v6, %v3648_v9  ;;  %v2056_v24 = vadd.f32 %v1877_v19, %v498_v16  ;;  %v500_v5 = vld [vmem:[#allocation2 + $0x228] sm:$0xff] }
 0x15d   : > { %v2238_v34 = vld [vmem:[#allocation2 + $0xa8] sm:$0xff]  ;;  %v3655_v6 = vor.u32 %v3938_v57, %v3654_v53 }
 0x15e   : > { %v2350_v37 = vpack.c.bf16 %v2238_v34, %v2238_v34  ;;  %v2595_v38 = vsel %vm318_vm3, %v2238_v34, 0.0  ;;  %v2806_v35 = vmul.f32 %v2238_v34, %v2238_v34  ;;  %2124 = vst.msk [vmem:[#allocation2 + $0xb0] sm:$0xff] %vm318_vm3, %v2011_v33  ;;  %v2283_v28 = vld [vmem:[#allocation2 + $0x210] sm:$0xff]  ;;  %v456_v33 = vld [vmem:[#allocation2 + $0xc8] sm:$0xff] }
 0x15f   : > { %v4740_v41 = vpop.f32.mrf.mxu1  ;;  %v2596_v13 = vadd.f32 %v2595_v38, %v2594_v15  ;;  %v2395_v31 = vpack.c.bf16 %v2283_v28, %v2283_v28  ;;  %2169 = vst.msk [vmem:[#allocation2 + $0x218] sm:$0xff] %vm318_vm3, %v2056_v24  ;;  %v499_v38 = vld [vmem:[#allocation2 + $0x220] sm:$0xff]  ;;  %v3897_v28 = vld [vmem:[%s4131_s7 + $0x174] sm:$0xf] }
 0x160   : > { %2463 = vst.msk [vmem:[%s4309_s26 + $0x54] sm:$0xf] %vm2441_vm4, %v2350_v37  ;;  %v2938_v43 = vsel %vm318_vm3, %v2806_v35, 0.0 }
 0x161   : > { %v2939_v25 = vadd.f32 %v2938_v43, %v2937_v22  ;;  %v1477_v47 = vpop.f32.mrf.mxu0  ;;  %1629 = vmatmul.bf16.gmra.mxu2 %v3647_v18  ;;  %2508 = vst.msk [vmem:[%s4309_s26 + $0x108] sm:$0xf] %vm2441_vm4, %v2395_v31 }
 0x162   : > { %v1767_v30 = vadd.f32 %v4708_v52, %v1477_v47  ;;  %v1879_v35 = vpop.f32.mrf.mxu3 }
 0x164   : > { %v2012_v55 = vadd.f32 %v1767_v30, %v454_v44  ;;  %v1590_v36 = vpop.f32.mrf.mxu2  ;;  %v3894_v30 = vld [vmem:[%s4131_s7 + $0x154] sm:$0xf0] }
 0x165   : > { %v2239_v56 = vld [vmem:[#allocation2 + $0xb0] sm:$0xff]  ;;  %3834 = vmatmul.msk.bf16.gmra.mxu3 %vm1235_vm2, %v3651_v20  ;;  %v1880_v42 = vadd.f32 %v1879_v35, %v1590_v36  ;;  %v3479_v59 = vor.u32 %v3894_v30, %v3478_v48  ;;  %v3486_v36 = vld [vmem:[%s4131_s7 + $0x160] sm:$0xf] }
 0x166   : > { %v2351_v60 = vpack.c.bf16 %v2239_v56, %v2239_v56  ;;  %v2597_v54 = vsel %vm318_vm3, %v2239_v56, 0.0  ;;  %v2807_v52 = vmul.f32 %v2239_v56, %v2239_v56  ;;  %2125 = vst.msk [vmem:[#allocation2 + $0xb8] sm:$0xff] %vm318_vm3, %v2012_v55  ;;  %v2284_v51 = vld [vmem:[#allocation2 + $0x218] sm:$0xff] }
 0x167   : > { %v4756_v63 = vpop.f32.mrf.mxu1  ;;  %v2598_v1 = vadd.f32 %v2597_v54, %v2596_v13  ;;  %v3488_v13 = vld [vmem:[%s4131_s7 + $0x168] sm:$0xf0]  ;;  %v2057_v44 = vadd.f32 %v1880_v42, %v499_v38  ;;  %v2396_v56 = vpack.c.bf16 %v2284_v51, %v2284_v51  ;;  %v3662_v42 = vld [vmem:[%s4131_s7 + $0x2c0] sm:$0xf] }
 0x168   : > { %2464 = vst.msk [vmem:[%s4309_s26 + $0x58] sm:$0xf] %vm2441_vm4, %v2351_v60  ;;  %v2940_v7 = vsel %vm318_vm3, %v2807_v52, 0.0  ;;  %v3491_v47 = vor.u32 %v3895_v40, %v3488_v13  ;;  %v3656_v60 = vld [vmem:[%s4131_s7 + $0x2b8] sm:$0xf0]  ;;  %v457_v52 = vld [vmem:[#allocation2 + $0xd0] sm:$0xff] }
 0x169   : > { %v2941_v10 = vadd.f32 %v2940_v7, %v2939_v25  ;;  %v1480_v11 = vpop.f32.mrf.mxu0  ;;  %2170 = vst.msk [vmem:[#allocation2 + $0x220] sm:$0xff] %vm318_vm3, %v2057_v44  ;;  %v3940_v44 = vld [vmem:[%s4131_s7 + $0x2c4] sm:$0xf0] }
 0x16a   : > { %3813 = vmatmul.msk.bf16.gmra.mxu1 %vm1235_vm2, %v3483_v58  ;;  %v1770_v15 = vadd.f32 %v4724_v12, %v1480_v11  ;;  %v3937_v58 = vld [vmem:[%s4131_s7 + $0x2b4] sm:$0xf]  ;;  %2509 = vst.msk [vmem:[%s4309_s26 + $0x10c] sm:$0xf] %vm2441_vm4, %v2396_v56  ;;  %v1881_v61 = vpop.f32.mrf.mxu3  ;;  %v502_v56 = vld [vmem:[#allocation2 + $0x238] sm:$0xff] }
 0x16c   : > { %v2013_v21 = vadd.f32 %v1770_v15, %v455_v3  ;;  %1519 = vmatmul.bf16.gmra.mxu0 %v3471_v8  ;;  %v1592_v0 = vpop.f32.mrf.mxu2  ;;  %v3659_v8 = vor.u32 %v3937_v58, %v3656_v60  ;;  %v3663_v58 = vor.u32 %v3940_v44, %v3662_v42 }
 0x16d   : > { %v2240_v22 = vld [vmem:[#allocation2 + $0xb8] sm:$0xff]  ;;  %v1882_v7 = vadd.f32 %v1881_v61, %v1592_v0 }
 0x16e   : > { %v2352_v4 = vpack.c.bf16 %v2240_v22, %v2240_v22  ;;  %v2599_v26 = vsel %vm318_vm3, %v2240_v22, 0.0  ;;  %v2808_v27 = vmul.f32 %v2240_v22, %v2240_v22  ;;  %2126 = vst.msk [vmem:[#allocation2 + $0xc0] sm:$0xff] %vm318_vm3, %v2013_v21  ;;  %v458_v21 = vld [vmem:[#allocation2 + $0xd8] sm:$0xff] }
 0x16f   : > { %v4772_v29 = vpop.f32.mrf.mxu1  ;;  %v2600_v12 = vadd.f32 %v2599_v26, %v2598_v1  ;;  %v2058_v3 = vadd.f32 %v1882_v7, %v500_v5  ;;  %v501_v26 = vld [vmem:[#allocation2 + $0x230] sm:$0xff] }
 0x170   : > { %2465 = vst.msk [vmem:[%s4309_s26 + $0x5c] sm:$0xf] %vm2441_vm4, %v2352_v4  ;;  %v2942_v2 = vsel %vm318_vm3, %v2808_v27, 0.0  ;;  %v2285_v16 = vld [vmem:[#allocation2 + $0x220] sm:$0xff] }
 0x171   : > { %v2943_v32 = vadd.f32 %v2942_v2, %v2941_v10  ;;  %v1482_v34 = vpop.f32.mrf.mxu0  ;;  %1634 = vmatmul.bf16.gmra.mxu2 %v3655_v6  ;;  %v2397_v18 = vpack.c.bf16 %v2285_v16, %v2285_v16  ;;  %2171 = vst.msk [vmem:[#allocation2 + $0x228] sm:$0xff] %vm318_vm3, %v2058_v3  ;;  %v3899_v16 = vld [vmem:[%s4131_s7 + $0x184] sm:$0xf] }
 0x172   : > { %v1772_v37 = vadd.f32 %v4740_v41, %v1482_v34  ;;  %v1884_v27 = vpop.f32.mrf.mxu3 }
 0x173   : > { %2510 = vst.msk [vmem:[%s4309_s26 + $0x110] sm:$0xf] %vm2441_vm4, %v2397_v18 }
 0x174   : > { %v2014_v43 = vadd.f32 %v1772_v37, %v456_v33  ;;  %v1595_v24 = vpop.f32.mrf.mxu2  ;;  %v3896_v37 = vld [vmem:[%s4131_s7 + $0x164] sm:$0xf0] }
 0x175   : > { %v2241_v25 = vld [vmem:[#allocation2 + $0xc0] sm:$0xff]  ;;  %3835 = vmatmul.msk.bf16.gmra.mxu3 %vm1235_vm2, %v3659_v8  ;;  %v1885_v31 = vadd.f32 %v1884_v27, %v1595_v24  ;;  %v3487_v30 = vor.u32 %v3896_v37, %v3486_v36  ;;  %v3494_v24 = vld [vmem:[%s4131_s7 + $0x170] sm:$0xf] }
 0x176   : > { %v2353_v49 = vpack.c.bf16 %v2241_v25, %v2241_v25  ;;  %v2601_v50 = vsel %vm318_vm3, %v2241_v25, 0.0  ;;  %v2809_v41 = vmul.f32 %v2241_v25, %v2241_v25  ;;  %2127 = vst.msk [vmem:[#allocation2 + $0xc8] sm:$0xff] %vm318_vm3, %v2014_v43 }
 0x177   : > { %v4788_v39 = vpop.f32.mrf.mxu1  ;;  %v2602_v55 = vadd.f32 %v2601_v50, %v2600_v12  ;;  %v3496_v12 = vld [vmem:[%s4131_s7 + $0x178] sm:$0xf0]  ;;  %v2059_v33 = vadd.f32 %v1885_v31, %v501_v26  ;;  %v3670_v31 = vld [vmem:[%s4131_s7 + $0x2d0] sm:$0xf] }
 0x178   : > { %2466 = vst.msk [vmem:[%s4309_s26 + $0x60] sm:$0xf] %vm2441_vm4, %v2353_v49  ;;  %v2944_v45 = vsel %vm318_vm3, %v2809_v41, 0.0  ;;  %v3499_v34 = vor.u32 %v3897_v28, %v3496_v12  ;;  %v2286_v40 = vld [vmem:[#allocation2 + $0x228] sm:$0xff]  ;;  %v459_v41 = vld [vmem:[#allocation2 + $0xe0] sm:$0xff] }
 0x179   : > { %v2945_v54 = vadd.f32 %v2944_v45, %v2943_v32  ;;  %v1485_v62 = vpop.f32.mrf.mxu0  ;;  %v2398_v25 = vpack.c.bf16 %v2286_v40, %v2286_v40  ;;  %2172 = vst.msk [vmem:[#allocation2 + $0x230] sm:$0xff] %vm318_vm3, %v2059_v33  ;;  %v3664_v49 = vld [vmem:[%s4131_s7 + $0x2c8] sm:$0xf0]  ;;  %v3942_v33 = vld [vmem:[%s4131_s7 + $0x2d4] sm:$0xf0] }
 0x17a   : > { %3814 = vmatmul.msk.bf16.gmra.mxu1 %vm1235_vm2, %v3491_v47  ;;  %v1775_v1 = vadd.f32 %v4756_v63, %v1485_v62  ;;  %v3939_v47 = vld [vmem:[%s4131_s7 + $0x2c4] sm:$0xf]  ;;  %v1886_v57 = vpop.f32.mrf.mxu3 }
 0x17b   : > { %2511 = vst.msk [vmem:[%s4309_s26 + $0x114] sm:$0xf] %vm2441_vm4, %v2398_v25  ;;  %v504_v25 = vld [vmem:[#allocation2 + $0x248] sm:$0xff] }
 0x17c   : > { %v2015_v9 = vadd.f32 %v1775_v1, %v457_v52  ;;  %1524 = vmatmul.bf16.gmra.mxu0 %v3479_v59  ;;  %v1597_v53 = vpop.f32.mrf.mxu2  ;;  %v3667_v59 = vor.u32 %v3939_v47, %v3664_v49  ;;  %v3671_v47 = vor.u32 %v3942_v33, %v3670_v31 }
 0x17d   : > { %v2242_v10 = vld [vmem:[#allocation2 + $0xc8] sm:$0xff]  ;;  %v1887_v45 = vadd.f32 %v1886_v57, %v1597_v53 }
 0x17e   : > { %v2354_v11 = vpack.c.bf16 %v2242_v10, %v2242_v10  ;;  %v2603_v14 = vsel %vm318_vm3, %v2242_v10, 0.0  ;;  %v2810_v15 = vmul.f32 %v2242_v10, %v2242_v10  ;;  %2128 = vst.msk [vmem:[#allocation2 + $0xd0] sm:$0xff] %vm318_vm3, %v2015_v9  ;;  %v460_v9 = vld [vmem:[#allocation2 + $0xe8] sm:$0xff] }
 0x17f   : > { %v4804_v17 = vpop.f32.mrf.mxu1  ;;  %v2604_v63 = vadd.f32 %v2603_v14, %v2602_v55  ;;  %v2060_v52 = vadd.f32 %v1887_v45, %v502_v56  ;;  %v503_v14 = vld [vmem:[#allocation2 + $0x240] sm:$0xff] }
 0x180   : > { %2467 = vst.msk [vmem:[%s4309_s26 + $0x64] sm:$0xf] %vm2441_vm4, %v2354_v11  ;;  %v2946_v19 = vsel %vm318_vm3, %v2810_v15, 0.0  ;;  %v2287_v5 = vld [vmem:[#allocation2 + $0x230] sm:$0xff] }
 0x181   : > { %v2947_v20 = vadd.f32 %v2946_v19, %v2945_v54  ;;  %v1487_v22 = vpop.f32.mrf.mxu0  ;;  %1639 = vmatmul.bf16.gmra.mxu2 %v3663_v58  ;;  %v2399_v6 = vpack.c.bf16 %v2287_v5, %v2287_v5  ;;  %2173 = vst.msk [vmem:[#allocation2 + $0x238] sm:$0xff] %vm318_vm3, %v2060_v52  ;;  %v3901_v5 = vld [vmem:[%s4131_s7 + $0x194] sm:$0xf] }
 0x182   : > { %v1777_v4 = vadd.f32 %v4772_v29, %v1487_v22  ;;  %v1889_v15 = vpop.f32.mrf.mxu3 }
 0x183   : > { %2512 = vst.msk [vmem:[%s4309_s26 + $0x118] sm:$0xf] %vm2441_vm4, %v2399_v6 }
 0x184   : > { %v2016_v2 = vadd.f32 %v1777_v4, %v458_v21  ;;  %v1600_v3 = vpop.f32.mrf.mxu2  ;;  %v3898_v4 = vld [vmem:[%s4131_s7 + $0x174] sm:$0xf0] }
 0x185   : > { %v2243_v32 = vld [vmem:[#allocation2 + $0xd0] sm:$0xff]  ;;  %3836 = vmatmul.msk.bf16.gmra.mxu3 %vm1235_vm2, %v3667_v59  ;;  %v1890_v18 = vadd.f32 %v1889_v15, %v1600_v3  ;;  %v3495_v37 = vor.u32 %v3898_v4, %v3494_v24  ;;  %v3502_v3 = vld [vmem:[%s4131_s7 + $0x180] sm:$0xf] }
 0x186   : > { %v2355_v38 = vpack.c.bf16 %v2243_v32, %v2243_v32  ;;  %v2605_v35 = vsel %vm318_vm3, %v2243_v32, 0.0  ;;  %v2811_v29 = vmul.f32 %v2243_v32, %v2243_v32  ;;  %2129 = vst.msk [vmem:[#allocation2 + $0xd8] sm:$0xff] %vm318_vm3, %v2016_v2 }
 0x187   : > { %v4820_v13 = vpop.f32.mrf.mxu1  ;;  %v2606_v43 = vadd.f32 %v2605_v35, %v2604_v63  ;;  %v3504_v63 = vld [vmem:[%s4131_s7 + $0x188] sm:$0xf0]  ;;  %v2061_v21 = vadd.f32 %v1890_v18, %v503_v14  ;;  %v3678_v18 = vld [vmem:[%s4131_s7 + $0x2e0] sm:$0xf] }
 0x188   : > { %2468 = vst.msk [vmem:[%s4309_s26 + $0x68] sm:$0xf] %vm2441_vm4, %v2355_v38  ;;  %v2948_v48 = vsel %vm318_vm3, %v2811_v29, 0.0  ;;  %v3507_v22 = vor.u32 %v3899_v16, %v3504_v63  ;;  %v2288_v28 = vld [vmem:[#allocation2 + $0x238] sm:$0xff]  ;;  %v461_v29 = vld [vmem:[#allocation2 + $0xf0] sm:$0xff] }
 0x189   : > { %v2949_v50 = vadd.f32 %v2948_v48, %v2947_v20  ;;  %v1490_v51 = vpop.f32.mrf.mxu0  ;;  %v2400_v32 = vpack.c.bf16 %v2288_v28, %v2288_v28  ;;  %2174 = vst.msk [vmem:[#allocation2 + $0x240] sm:$0xff] %vm318_vm3, %v2061_v21  ;;  %v3672_v38 = vld [vmem:[%s4131_s7 + $0x2d8] sm:$0xf0]  ;;  %v3944_v21 = vld [vmem:[%s4131_s7 + $0x2e4] sm:$0xf0] }
 0x18a   : > { %3815 = vmatmul.msk.bf16.gmra.mxu1 %vm1235_vm2, %v3499_v34  ;;  %v1780_v55 = vadd.f32 %v4788_v39, %v1490_v51  ;;  %v3941_v34 = vld [vmem:[%s4131_s7 + $0x2d4] sm:$0xf]  ;;  %v1891_v44 = vpop.f32.mrf.mxu3 }
 0x18b   : > { %2513 = vst.msk [vmem:[%s4309_s26 + $0x11c] sm:$0xf] %vm2441_vm4, %v2400_v32  ;;  %v506_v32 = vld [vmem:[#allocation2 + $0x258] sm:$0xff] }
 0x18c   : > { %v2017_v60 = vadd.f32 %v1780_v55, %v459_v41  ;;  %1529 = vmatmul.bf16.gmra.mxu0 %v3487_v30  ;;  %v1602_v42 = vpop.f32.mrf.mxu2  ;;  %v3675_v30 = vor.u32 %v3941_v34, %v3672_v38  ;;  %v3679_v34 = vor.u32 %v3944_v21, %v3678_v18 }
 0x18d   : > { %v2244_v54 = vld [vmem:[#allocation2 + $0xd8] sm:$0xff]  ;;  %v1892_v48 = vadd.f32 %v1891_v44, %v1602_v42 }
 0x18e   : > { %v2356_v62 = vpack.c.bf16 %v2244_v54, %v2244_v54  ;;  %v2607_v0 = vsel %vm318_vm3, %v2244_v54, 0.0  ;;  %v2812_v1 = vmul.f32 %v2244_v54, %v2244_v54  ;;  %2130 = vst.msk [vmem:[#allocation2 + $0xe0] sm:$0xff] %vm318_vm3, %v2017_v60  ;;  %v462_v60 = vld [vmem:[#allocation2 + $0xf8] sm:$0xff] }
 0x18f   : > { %v4836_v61 = vpop.f32.mrf.mxu1  ;;  %v2608_v39 = vadd.f32 %v2607_v0, %v2606_v43  ;;  %v2062_v41 = vadd.f32 %v1892_v48, %v504_v25  ;;  %v505_v0 = vld [vmem:[#allocation2 + $0x250] sm:$0xff] }
 0x190   : > { %2469 = vst.msk [vmem:[%s4309_s26 + $0x6c] sm:$0xf] %vm2441_vm4, %v2356_v62  ;;  %v2950_v7 = vsel %vm318_vm3, %v2812_v1, 0.0  ;;  %v2289_v56 = vld [vmem:[#allocation2 + $0x240] sm:$0xff] }
 0x191   : > { %v2951_v8 = vadd.f32 %v2950_v7, %v2949_v50  ;;  %v1492_v10 = vpop.f32.mrf.mxu0  ;;  %1644 = vmatmul.bf16.gmra.mxu2 %v3671_v47  ;;  %v2401_v58 = vpack.c.bf16 %v2289_v56, %v2289_v56  ;;  %2175 = vst.msk [vmem:[#allocation2 + $0x248] sm:$0xff] %vm318_vm3, %v2062_v41  ;;  %v3903_v56 = vld [vmem:[%s4131_s7 + $0x1a4] sm:$0xf] }
 0x192   : > { %v1782_v11 = vadd.f32 %v4804_v17, %v1492_v10 }
 0x193   : > { %2514 = vst.msk [vmem:[%s4309_s26 + $0x120] sm:$0xf] %vm2441_vm4, %v2401_v58 }
 0x194   : > { %v2018_v19 = vadd.f32 %v1782_v11, %v460_v9  ;;  %v1605_v52 = vpop.f32.mrf.mxu2  ;;  %v3900_v11 = vld [vmem:[%s4131_s7 + $0x184] sm:$0xf0] }
 0x195   : > { %v2245_v20 = vld [vmem:[#allocation2 + $0xe0] sm:$0xff]  ;;  %3837 = vmatmul.msk.bf16.gmra.mxu3 %vm1235_vm2, %v3675_v30  ;;  %v3503_v4 = vor.u32 %v3900_v11, %v3502_v3 }
 0x196   : > { %v2357_v26 = vpack.c.bf16 %v2245_v20, %v2245_v20  ;;  %v2609_v27 = vsel %vm318_vm3, %v2245_v20, 0.0  ;;  %v2813_v17 = vmul.f32 %v2245_v20, %v2245_v20  ;;  %2131 = vst.msk [vmem:[#allocation2 + $0xe8] sm:$0xff] %vm318_vm3, %v2018_v19 }
 0x197   : > { %v4852_v12 = vpop.f32.mrf.mxu1  ;;  %v2610_v2 = vadd.f32 %v2609_v27, %v2608_v39  ;;  %v3512_v39 = vld [vmem:[%s4131_s7 + $0x198] sm:$0xf0] }
 0x198   : > { %2470 = vst.msk [vmem:[%s4309_s26 + $0x70] sm:$0xf] %vm2441_vm4, %v2357_v26  ;;  %v2952_v36 = vsel %vm318_vm3, %v2813_v17, 0.0  ;;  %v1894_v1 = vpop.f32.mrf.mxu3  ;;  %v3515_v10 = vor.u32 %v3901_v5, %v3512_v39  ;;  %v2290_v16 = vld [vmem:[#allocation2 + $0x248] sm:$0xff]  ;;  %v463_v17 = vld [vmem:[#allocation2 + $0x100] sm:$0xff] }
 0x199   : > { %v2953_v35 = vadd.f32 %v2952_v36, %v2951_v8  ;;  %v1495_v40 = vpop.f32.mrf.mxu0  ;;  %v1895_v6 = vadd.f32 %v1894_v1, %v1605_v52  ;;  %v2402_v20 = vpack.c.bf16 %v2290_v16, %v2290_v16  ;;  %v3680_v26 = vld [vmem:[%s4131_s7 + $0x2e8] sm:$0xf0]  ;;  %v3510_v52 = vld [vmem:[%s4131_s7 + $0x190] sm:$0xf] }
 0x19a   : > { %3816 = vmatmul.msk.bf16.gmra.mxu1 %vm1235_vm2, %v3507_v22  ;;  %v1785_v43 = vadd.f32 %v4820_v13, %v1495_v40  ;;  %v3943_v22 = vld [vmem:[%s4131_s7 + $0x2e4] sm:$0xf] }
 0x19b   : > { %v2063_v9 = vadd.f32 %v1895_v6, %v505_v0  ;;  %2515 = vst.msk [vmem:[%s4309_s26 + $0x124] sm:$0xf] %vm2441_vm4, %v2402_v20  ;;  %v3686_v6 = vld [vmem:[%s4131_s7 + $0x2f0] sm:$0xf]  ;;  %v508_v20 = vld [vmem:[#allocation2 + $0x268] sm:$0xff] }
 0x19c   : > { %v2019_v49 = vadd.f32 %v1785_v43, %v461_v29  ;;  %1534 = vmatmul.bf16.gmra.mxu0 %v3495_v37  ;;  %v1607_v31 = vpop.f32.mrf.mxu2  ;;  %v3683_v37 = vor.u32 %v3943_v22, %v3680_v26 }
 0x19d   : > { %v2246_v50 = vld [vmem:[#allocation2 + $0xe8] sm:$0xff]  ;;  %2176 = vst.msk [vmem:[#allocation2 + $0x250] sm:$0xff] %vm318_vm3, %v2063_v9  ;;  %v3946_v9 = vld [vmem:[%s4131_s7 + $0x2f4] sm:$0xf0] }
 0x19e   : > { %v2358_v51 = vpack.c.bf16 %v2246_v50, %v2246_v50  ;;  %v2611_v53 = vsel %vm318_vm3, %v2246_v50, 0.0  ;;  %v2814_v55 = vmul.f32 %v2246_v50, %v2246_v50  ;;  %2132 = vst.msk [vmem:[#allocation2 + $0xf0] sm:$0xff] %vm318_vm3, %v2019_v49  ;;  %v464_v49 = vld [vmem:[#allocation2 + $0x108] sm:$0xff]  ;;  %v3687_v22 = vor.u32 %v3946_v9, %v3686_v6 }
 0x19f   : > { %v4868_v57 = vpop.f32.mrf.mxu1  ;;  %v2612_v13 = vadd.f32 %v2611_v53, %v2610_v2  ;;  %v507_v53 = vld [vmem:[#allocation2 + $0x260] sm:$0xff] }
 0x1a0   : > { %2471 = vst.msk [vmem:[%s4309_s26 + $0x74] sm:$0xf] %vm2441_vm4, %v2358_v51  ;;  %v2954_v45 = vsel %vm318_vm3, %v2814_v55, 0.0  ;;  %v1896_v33 = vpop.f32.mrf.mxu3 }
 0x1a1   : > { %v2955_v59 = vadd.f32 %v2954_v45, %v2953_v35  ;;  %v1497_v54 = vpop.f32.mrf.mxu0  ;;  %v1897_v36 = vadd.f32 %v1896_v33, %v1607_v31  ;;  %1649 = vmatmul.bf16.gmra.mxu2 %v3679_v34 }
 0x1a2   : > { %v1787_v62 = vadd.f32 %v4836_v61, %v1497_v54 }
 0x1a3   : > { %v2064_v29 = vadd.f32 %v1897_v36, %v506_v32 }
 0x1a4   : > { %v2020_v7 = vadd.f32 %v1787_v62, %v462_v60  ;;  %v2291_v25 = vld [vmem:[#allocation2 + $0x250] sm:$0xff]  ;;  %v1610_v41 = vpop.f32.mrf.mxu2  ;;  %v3902_v62 = vld [vmem:[%s4131_s7 + $0x194] sm:$0xf0] }
 0x1a5   : > { %v2247_v8 = vld [vmem:[#allocation2 + $0xf0] sm:$0xff]  ;;  %v2403_v47 = vpack.c.bf16 %v2291_v25, %v2291_v25  ;;  %2177 = vst.msk [vmem:[#allocation2 + $0x258] sm:$0xff] %vm318_vm3, %v2064_v29  ;;  %3838 = vmatmul.msk.bf16.gmra.mxu3 %vm1235_vm2, %v3683_v37  ;;  %v3511_v11 = vor.u32 %v3902_v62, %v3510_v52 }
 0x1a6   : > { %v2359_v14 = vpack.c.bf16 %v2247_v8, %v2247_v8  ;;  %v2613_v15 = vsel %vm318_vm3, %v2247_v8, 0.0  ;;  %v2815_v61 = vmul.f32 %v2247_v8, %v2247_v8  ;;  %2133 = vst.msk [vmem:[#allocation2 + $0xf8] sm:$0xff] %vm318_vm3, %v2020_v7  ;;  %v3905_v25 = vld [vmem:[%s4131_s7 + $0x1b4] sm:$0xf] }
 0x1a7   : > { %v4884_v63 = vpop.f32.mrf.mxu1  ;;  %v2614_v19 = vadd.f32 %v2613_v15, %v2612_v13  ;;  %2516 = vst.msk [vmem:[%s4309_s26 + $0x128] sm:$0xf] %vm2441_vm4, %v2403_v47  ;;  %v3520_v13 = vld [vmem:[%s4131_s7 + $0x1a8] sm:$0xf0] }
 0x1a8   : > { %2472 = vst.msk [vmem:[%s4309_s26 + $0x78] sm:$0xf] %vm2441_vm4, %v2359_v14  ;;  %v2956_v24 = vsel %vm318_vm3, %v2815_v61, 0.0  ;;  %v1899_v55 = vpop.f32.mrf.mxu3  ;;  %v3523_v54 = vor.u32 %v3903_v56, %v3520_v13  ;;  %v3688_v14 = vld [vmem:[%s4131_s7 + $0x2f8] sm:$0xf0]  ;;  %v465_v61 = vld [vmem:[#allocation2 + $0x110] sm:$0xff] }
 0x1a9   : > { %v2957_v27 = vadd.f32 %v2956_v24, %v2955_v59  ;;  %v1500_v28 = vpop.f32.mrf.mxu0  ;;  %v1900_v58 = vadd.f32 %v1899_v55, %v1610_v41  ;;  %v3518_v41 = vld [vmem:[%s4131_s7 + $0x1a0] sm:$0xf] }
 0x1aa   : > { %3817 = vmatmul.msk.bf16.gmra.mxu1 %vm1235_vm2, %v3515_v10  ;;  %v1790_v2 = vadd.f32 %v4852_v12, %v1500_v28  ;;  %v3945_v10 = vld [vmem:[%s4131_s7 + $0x2f4] sm:$0xf] }
 0x1ab   : > { %v2065_v60 = vadd.f32 %v1900_v58, %v507_v53  ;;  %v3694_v58 = vld [vmem:[%s4131_s7 + $0x300] sm:$0xf] }
 0x1ac   : > { %v2021_v38 = vadd.f32 %v1790_v2, %v463_v17  ;;  %1539 = vmatmul.bf16.gmra.mxu0 %v3503_v4  ;;  %v2292_v5 = vld [vmem:[#allocation2 + $0x258] sm:$0xff]  ;;  %v1612_v18 = vpop.f32.mrf.mxu2  ;;  %v3691_v4 = vor.u32 %v3945_v10, %v3688_v14 }
 0x1ad   : > { %v2248_v35 = vld [vmem:[#allocation2 + $0xf8] sm:$0xff]  ;;  %v2404_v8 = vpack.c.bf16 %v2292_v5, %v2292_v5  ;;  %2178 = vst.msk [vmem:[#allocation2 + $0x260] sm:$0xff] %vm318_vm3, %v2065_v60  ;;  %v3948_v60 = vld [vmem:[%s4131_s7 + $0x304] sm:$0xf0] }
 0x1ae   : > { %v2360_v40 = vpack.c.bf16 %v2248_v35, %v2248_v35  ;;  %v2615_v42 = vsel %vm318_vm3, %v2248_v35, 0.0  ;;  %v2816_v43 = vmul.f32 %v2248_v35, %v2248_v35  ;;  %2134 = vst.msk [vmem:[#allocation2 + $0x100] sm:$0xff] %vm318_vm3, %v2021_v38  ;;  %v466_v38 = vld [vmem:[#allocation2 + $0x118] sm:$0xff]  ;;  %v3695_v10 = vor.u32 %v3948_v60, %v3694_v58 }
 0x1af   : > { %v4900_v44 = vpop.f32.mrf.mxu1  ;;  %v2616_v12 = vadd.f32 %v2615_v42, %v2614_v19  ;;  %2517 = vst.msk [vmem:[%s4309_s26 + $0x12c] sm:$0xf] %vm2441_vm4, %v2404_v8  ;;  %v509_v42 = vld [vmem:[#allocation2 + $0x270] sm:$0xff]  ;;  %v510_v8 = vld [vmem:[#allocation2 + $0x278] sm:$0xff] }
 0x1b0   : > { %2473 = vst.msk [vmem:[%s4309_s26 + $0x7c] sm:$0xf] %vm2441_vm4, %v2360_v40  ;;  %v2958_v48 = vsel %vm318_vm3, %v2816_v43, 0.0  ;;  %v1901_v21 = vpop.f32.mrf.mxu3 }
 0x1b1   : > { %v2959_v30 = vadd.f32 %v2958_v48, %v2957_v27  ;;  %v1502_v50 = vpop.f32.mrf.mxu0  ;;  %v1902_v24 = vadd.f32 %v1901_v21, %v1612_v18  ;;  %1654 = vmatmul.bf16.gmra.mxu2 %v3687_v22 }
 0x1b2   : > { %v1792_v51 = vadd.f32 %v4868_v57, %v1502_v50 }
 0x1b3   : > { %v2066_v17 = vadd.f32 %v1902_v24, %v508_v20 }
 0x1b4   : > { %v2022_v45 = vadd.f32 %v1792_v51, %v464_v49  ;;  %v2293_v32 = vld [vmem:[#allocation2 + $0x260] sm:$0xff]  ;;  %v1615_v29 = vpop.f32.mrf.mxu2  ;;  %v3904_v51 = vld [vmem:[%s4131_s7 + $0x1a4] sm:$0xf0] }
 0x1b5   : > { %v2249_v59 = vld [vmem:[#allocation2 + $0x100] sm:$0xff]  ;;  %v2405_v34 = vpack.c.bf16 %v2293_v32, %v2293_v32  ;;  %2179 = vst.msk [vmem:[#allocation2 + $0x268] sm:$0xff] %vm318_vm3, %v2066_v17  ;;  %3839 = vmatmul.msk.bf16.gmra.mxu3 %vm1235_vm2, %v3691_v4  ;;  %v3519_v62 = vor.u32 %v3904_v51, %v3518_v41 }
 0x1b6   : > { %v2361_v0 = vpack.c.bf16 %v2249_v59, %v2249_v59  ;;  %v2617_v1 = vsel %vm318_vm3, %v2249_v59, 0.0  ;;  %v2817_v57 = vmul.f32 %v2249_v59, %v2249_v59  ;;  %2135 = vst.msk [vmem:[#allocation2 + $0x108] sm:$0xff] %vm318_vm3, %v2022_v45  ;;  %v3907_v32 = vld [vmem:[%s4131_s7 + $0x1c4] sm:$0xf] }
 0x1b7   : > { %v4916_v39 = vpop.f32.mrf.mxu1  ;;  %v2618_v7 = vadd.f32 %v2617_v1, %v2616_v12  ;;  %2518 = vst.msk [vmem:[%s4309_s26 + $0x130] sm:$0xf] %vm2441_vm4, %v2405_v34  ;;  %v3528_v12 = vld [vmem:[%s4131_s7 + $0x1b8] sm:$0xf0] }
 0x1b8   : > { %2474 = vst.msk [vmem:[%s4309_s26 + $0x80] sm:$0xf] %vm2441_vm4, %v2361_v0  ;;  %v2960_v3 = vsel %vm318_vm3, %v2817_v57, 0.0  ;;  %v1904_v43 = vpop.f32.mrf.mxu3  ;;  %v3531_v50 = vor.u32 %v3905_v25, %v3528_v12  ;;  %v3696_v0 = vld [vmem:[%s4131_s7 + $0x308] sm:$0xf0]  ;;  %v467_v57 = vld [vmem:[#allocation2 + $0x120] sm:$0xff] }
 0x1b9   : > { %v2961_v15 = vadd.f32 %v2960_v3, %v2959_v30  ;;  %v1505_v16 = vpop.f32.mrf.mxu0  ;;  %v1905_v47 = vadd.f32 %v1904_v43, %v1615_v29  ;;  %v3526_v29 = vld [vmem:[%s4131_s7 + $0x1b0] sm:$0xf] }
 0x1ba   : > { %3818 = vmatmul.msk.bf16.gmra.mxu1 %vm1235_vm2, %v3523_v54  ;;  %v1795_v19 = vadd.f32 %v4884_v63, %v1505_v16  ;;  %v3947_v54 = vld [vmem:[%s4131_s7 + $0x304] sm:$0xf] }
 0x1bb   : > { %v2067_v49 = vadd.f32 %v1905_v47, %v509_v42  ;;  %v3702_v47 = vld [vmem:[%s4131_s7 + $0x310] sm:$0xf] }
 0x1bc   : > { %v2023_v26 = vadd.f32 %v1795_v19, %v465_v61  ;;  %1544 = vmatmul.bf16.gmra.mxu0 %v3511_v11  ;;  %v2294_v56 = vld [vmem:[#allocation2 + $0x268] sm:$0xff]  ;;  %v1617_v6 = vpop.f32.mrf.mxu2  ;;  %v3699_v11 = vor.u32 %v3947_v54, %v3696_v0 }
 0x1bd   : > { %v2250_v27 = vld [vmem:[#allocation2 + $0x108] sm:$0xff]  ;;  %v2406_v59 = vpack.c.bf16 %v2294_v56, %v2294_v56  ;;  %2180 = vst.msk [vmem:[#allocation2 + $0x270] sm:$0xff] %vm318_vm3, %v2067_v49  ;;  %v3950_v49 = vld [vmem:[%s4131_s7 + $0x314] sm:$0xf0] }
 0x1be   : > { %v2362_v28 = vpack.c.bf16 %v2250_v27, %v2250_v27  ;;  %v2619_v31 = vsel %vm318_vm3, %v2250_v27, 0.0  ;;  %v2818_v2 = vmul.f32 %v2250_v27, %v2250_v27  ;;  %2136 = vst.msk [vmem:[#allocation2 + $0x110] sm:$0xff] %vm318_vm3, %v2023_v26  ;;  %v468_v26 = vld [vmem:[#allocation2 + $0x128] sm:$0xff]  ;;  %v3703_v54 = vor.u32 %v3950_v49, %v3702_v47 }
 0x1bf   : > { %v4932_v33 = vpop.f32.mrf.mxu1  ;;  %v2620_v63 = vadd.f32 %v2619_v31, %v2618_v7  ;;  %2519 = vst.msk [vmem:[%s4309_s26 + $0x134] sm:$0xf] %vm2441_vm4, %v2406_v59  ;;  %v511_v31 = vld [vmem:[#allocation2 + $0x280] sm:$0xff]  ;;  %v512_v59 = vld [vmem:[#allocation2 + $0x288] sm:$0xff] }
 0x1c0   : > { %2475 = vst.msk [vmem:[%s4309_s26 + $0x84] sm:$0xf] %vm2441_vm4, %v2362_v28  ;;  %v2962_v36 = vsel %vm318_vm3, %v2818_v2, 0.0  ;;  %v1906_v9 = vpop.f32.mrf.mxu3 }
 0x1c1   : > { %v2963_v37 = vadd.f32 %v2962_v36, %v2961_v15  ;;  %v1507_v35 = vpop.f32.mrf.mxu0  ;;  %v1907_v3 = vadd.f32 %v1906_v9, %v1617_v6  ;;  %1659 = vmatmul.bf16.gmra.mxu2 %v3695_v10 }
 0x1c2   : > { %v1797_v40 = vadd.f32 %v4900_v44, %v1507_v35 }
 0x1c3   : > { %v2068_v61 = vadd.f32 %v1907_v3, %v510_v8 }
 0x1c4   : > { %v2024_v48 = vadd.f32 %v1797_v40, %v466_v38  ;;  %v2295_v20 = vld [vmem:[#allocation2 + $0x270] sm:$0xff]  ;;  %v1620_v17 = vpop.f32.mrf.mxu2  ;;  %v3906_v40 = vld [vmem:[%s4131_s7 + $0x1b4] sm:$0xf0] }
 0x1c5   : > { %v2251_v30 = vld [vmem:[#allocation2 + $0x110] sm:$0xff]  ;;  %v2407_v22 = vpack.c.bf16 %v2295_v20, %v2295_v20  ;;  %2181 = vst.msk [vmem:[#allocation2 + $0x278] sm:$0xff] %vm318_vm3, %v2068_v61  ;;  %3840 = vmatmul.msk.bf16.gmra.mxu3 %vm1235_vm2, %v3699_v11  ;;  %v3527_v51 = vor.u32 %v3906_v40, %v3526_v29 }
 0x1c6   : > { %v2363_v53 = vpack.c.bf16 %v2251_v30, %v2251_v30  ;;  %v2621_v55 = vsel %vm318_vm3, %v2251_v30, 0.0  ;;  %v2819_v44 = vmul.f32 %v2251_v30, %v2251_v30  ;;  %2137 = vst.msk [vmem:[#allocation2 + $0x118] sm:$0xff] %vm318_vm3, %v2024_v48 }
 0x1c7   : > { %v4948_v13 = vpop.f32.mrf.mxu1  ;;  %v2622_v45 = vadd.f32 %v2621_v55, %v2620_v63  ;;  %2520 = vst.msk [vmem:[%s4309_s26 + $0x138] sm:$0xf] %vm2441_vm4, %v2407_v22  ;;  %v3536_v63 = vld [vmem:[%s4131_s7 + $0x1c8] sm:$0xf0] }
 0x1c8   : > { %2476 = vst.msk [vmem:[%s4309_s26 + $0x88] sm:$0xf] %vm2441_vm4, %v2363_v53  ;;  %v2964_v52 = vsel %vm318_vm3, %v2819_v44, 0.0  ;;  %v1909_v2 = vpop.f32.mrf.mxu3  ;;  %v3539_v35 = vor.u32 %v3907_v32, %v3536_v63  ;;  %v3704_v53 = vld [vmem:[%s4131_s7 + $0x318] sm:$0xf0]  ;;  %v469_v44 = vld [vmem:[#allocation2 + $0x130] sm:$0xff] }
 0x1c9   : > { %v2965_v1 = vadd.f32 %v2964_v52, %v2963_v37  ;;  %v1510_v5 = vpop.f32.mrf.mxu0  ;;  %v1910_v34 = vadd.f32 %v1909_v2, %v1620_v17  ;;  %v3952_v32 = vld [vmem:[%s4131_s7 + $0x324] sm:$0xf0]  ;;  %v3951_v63 = vld [vmem:[%s4131_s7 + $0x324] sm:$0xf] }
 0x1ca   : > { %3819 = vmatmul.msk.bf16.gmra.mxu1 %vm1235_vm2, %v3531_v50  ;;  %v1800_v7 = vadd.f32 %v4916_v39, %v1510_v5  ;;  %v3949_v50 = vld [vmem:[%s4131_s7 + $0x314] sm:$0xf] }
 0x1cb   : > { %v2069_v38 = vadd.f32 %v1910_v34, %v511_v31 }
 0x1cc   : > { %v2025_v14 = vadd.f32 %v1800_v7, %v467_v57  ;;  %1549 = vmatmul.bf16.gmra.mxu0 %v3519_v62  ;;  %v2296_v25 = vld [vmem:[#allocation2 + $0x278] sm:$0xff]  ;;  %v1622_v58 = vpop.f32.mrf.mxu2  ;;  %v3707_v62 = vor.u32 %v3949_v50, %v3704_v53 }
 0x1cd   : > { %v2252_v15 = vld [vmem:[#allocation2 + $0x118] sm:$0xff]  ;;  %v2408_v30 = vpack.c.bf16 %v2296_v25, %v2296_v25  ;;  %2182 = vst.msk [vmem:[#allocation2 + $0x280] sm:$0xff] %vm318_vm3, %v2069_v38  ;;  %v471_v38 = vld [vmem:[#allocation2 + $0x140] sm:$0xff] }
 0x1ce   : > { %v2364_v16 = vpack.c.bf16 %v2252_v15, %v2252_v15  ;;  %v2623_v18 = vsel %vm318_vm3, %v2252_v15, 0.0  ;;  %v2820_v19 = vmul.f32 %v2252_v15, %v2252_v15  ;;  %2138 = vst.msk [vmem:[#allocation2 + $0x120] sm:$0xff] %vm318_vm3, %v2025_v14  ;;  %v470_v14 = vld [vmem:[#allocation2 + $0x138] sm:$0xff] }
 0x1cf   : > { %v4964_v21 = vpop.f32.mrf.mxu1  ;;  %v2624_v39 = vadd.f32 %v2623_v18, %v2622_v45  ;;  %2521 = vst.msk [vmem:[%s4309_s26 + $0x13c] sm:$0xf] %vm2441_vm4, %v2408_v30  ;;  %v513_v18 = vld [vmem:[#allocation2 + $0x290] sm:$0xff] }
 0x1d0   : > { %2477 = vst.msk [vmem:[%s4309_s26 + $0x8c] sm:$0xf] %vm2441_vm4, %v2364_v16  ;;  %v2966_v24 = vsel %vm318_vm3, %v2820_v19, 0.0  ;;  %v1911_v60 = vpop.f32.mrf.mxu3 }
 0x1d1   : > { %v2967_v4 = vadd.f32 %v2966_v24, %v2965_v1  ;;  %v1512_v27 = vpop.f32.mrf.mxu0  ;;  %v1912_v52 = vadd.f32 %v1911_v60, %v1622_v58  ;;  %1664 = vmatmul.bf16.gmra.mxu2 %v3703_v54 }
 0x1d2   : > { %v1802_v28 = vadd.f32 %v4932_v33, %v1512_v27 }
 0x1d3   : > { %v2070_v57 = vadd.f32 %v1912_v52, %v512_v59  ;;  %v515_v52 = vld [vmem:[#allocation2 + $0x2a0] sm:$0xff] }
 0x1d4   : > { %v2026_v36 = vadd.f32 %v1802_v28, %v468_v26  ;;  %v2297_v8 = vld [vmem:[#allocation2 + $0x280] sm:$0xff]  ;;  %v1625_v61 = vpop.f32.mrf.mxu2 }
 0x1d5   : > { %v2253_v37 = vld [vmem:[#allocation2 + $0x120] sm:$0xff]  ;;  %v2409_v10 = vpack.c.bf16 %v2297_v8, %v2297_v8  ;;  %2183 = vst.msk [vmem:[#allocation2 + $0x288] sm:$0xff] %vm318_vm3, %v2070_v57  ;;  %3841 = vmatmul.msk.bf16.gmra.mxu3 %vm1235_vm2, %v3707_v62 }
 0x1d6   : > { %v2365_v42 = vpack.c.bf16 %v2253_v37, %v2253_v37  ;;  %v2625_v43 = vsel %vm318_vm3, %v2253_v37, 0.0  ;;  %v2821_v33 = vmul.f32 %v2253_v37, %v2253_v37  ;;  %2139 = vst.msk [vmem:[#allocation2 + $0x128] sm:$0xff] %vm318_vm3, %v2026_v36  ;;  %v3712_v36 = vld [vmem:[%s4131_s7 + $0x328] sm:$0xf0] }
 0x1d7   : > { %v4980_v12 = vpop.f32.mrf.mxu1  ;;  %v2626_v48 = vadd.f32 %v2625_v43, %v2624_v39  ;;  %2522 = vst.msk [vmem:[%s4309_s26 + $0x140] sm:$0xf] %vm2441_vm4, %v2409_v10  ;;  %v3715_v47 = vor.u32 %v3951_v63, %v3712_v36 }
 0x1d8   : > { %2478 = vst.msk [vmem:[%s4309_s26 + $0x90] sm:$0xf] %vm2441_vm4, %v2365_v42  ;;  %v2968_v41 = vsel %vm318_vm3, %v2821_v33, 0.0  ;;  %v1914_v19 = vpop.f32.mrf.mxu3  ;;  %v514_v42 = vld [vmem:[#allocation2 + $0x298] sm:$0xff] }
 0x1d9   : > { %v2969_v55 = vadd.f32 %v2968_v41, %v2967_v4  ;;  %v1515_v56 = vpop.f32.mrf.mxu0  ;;  %v1915_v20 = vadd.f32 %v1914_v19, %v1625_v61  ;;  %v473_v19 = vld [vmem:[#allocation2 + $0x150] sm:$0xff] }
 0x1da   : > { %3820 = vmatmul.msk.bf16.gmra.mxu1 %vm1235_vm2, %v3539_v35  ;;  %v1805_v45 = vadd.f32 %v4948_v13, %v1515_v56 }
 0x1db   : > { %v2071_v24 = vadd.f32 %v1915_v20, %v513_v18 }
 0x1dc   : > { %v2027_v0 = vadd.f32 %v1805_v45, %v469_v44  ;;  %1554 = vmatmul.bf16.gmra.mxu0 %v3527_v51  ;;  %v2298_v17 = vld [vmem:[#allocation2 + $0x288] sm:$0xff]  ;;  %v1627_v29 = vpop.f32.mrf.mxu2 }
 0x1dd   : > { %v2254_v1 = vld [vmem:[#allocation2 + $0x128] sm:$0xff]  ;;  %v2410_v2 = vpack.c.bf16 %v2298_v17, %v2298_v17  ;;  %2184 = vst.msk [vmem:[#allocation2 + $0x290] sm:$0xff] %vm318_vm3, %v2071_v24 }
 0x1de   : > { %v2366_v5 = vpack.c.bf16 %v2254_v1, %v2254_v1  ;;  %v2627_v6 = vsel %vm318_vm3, %v2254_v1, 0.0  ;;  %v2822_v7 = vmul.f32 %v2254_v1, %v2254_v1  ;;  %2140 = vst.msk [vmem:[#allocation2 + $0x130] sm:$0xff] %vm318_vm3, %v2027_v0  ;;  %v472_v45 = vld [vmem:[#allocation2 + $0x148] sm:$0xff] }
 0x1df   : > { %v4996_v9 = vpop.f32.mrf.mxu1  ;;  %v2628_v13 = vadd.f32 %v2627_v6, %v2626_v48  ;;  %2523 = vst.msk [vmem:[%s4309_s26 + $0x144] sm:$0xf] %vm2441_vm4, %v2410_v2  ;;  %v516_v24 = vld [vmem:[#allocation2 + $0x2a8] sm:$0xff] }
 0x1e0   : > { %2479 = vst.msk [vmem:[%s4309_s26 + $0x94] sm:$0xf] %vm2441_vm4, %v2366_v5  ;;  %v2970_v3 = vsel %vm318_vm3, %v2822_v7, 0.0  ;;  %v1916_v43 = vpop.f32.mrf.mxu3 }
 0x1e1   : > { %v2971_v11 = vadd.f32 %v2970_v3, %v2969_v55  ;;  %v1517_v15 = vpop.f32.mrf.mxu0  ;;  %v1917_v25 = vadd.f32 %v1916_v43, %v1627_v29 }
 0x1e2   : > { %v1807_v16 = vadd.f32 %v4964_v21, %v1517_v15  ;;  %v3710_v21 = vld [vmem:[%s4131_s7 + $0x320] sm:$0xf]  ;;  %v3953_v15 = vld [vmem:[%s4131_s7 + $0x334] sm:$0xf] }
 0x1e3   : > { %v3711_v33 = vor.u32 %v3952_v32, %v3710_v21  ;;  %v2072_v49 = vadd.f32 %v1917_v25, %v514_v42  ;;  %v517_v25 = vld [vmem:[#allocation2 + $0x2b0] sm:$0xff] }
 0x1e4   : > { %v2028_v39 = vadd.f32 %v1807_v16, %v470_v14  ;;  %v2299_v53 = vld [vmem:[#allocation2 + $0x290] sm:$0xff]  ;;  %v1630_v60 = vpop.f32.mrf.mxu2  ;;  %v3954_v14 = vld [vmem:[%s4131_s7 + $0x334] sm:$0xf0]  ;;  %v3720_v16 = vld [vmem:[%s4131_s7 + $0x338] sm:$0xf0] }
 0x1e5   : > { %v2255_v22 = vld [vmem:[#allocation2 + $0x130] sm:$0xff]  ;;  %1669 = vmatmul.bf16.gmra.mxu2 %v3711_v33  ;;  %v2411_v44 = vpack.c.bf16 %v2299_v53, %v2299_v53  ;;  %2185 = vst.msk [vmem:[#allocation2 + $0x298] sm:$0xff] %vm318_vm3, %v2072_v49  ;;  %3842 = vmatmul.msk.bf16.gmra.mxu3 %vm1235_vm2, %v3715_v47  ;;  %v3723_v17 = vor.u32 %v3953_v15, %v3720_v16 }
 0x1e6   : > { %v2367_v4 = vpack.c.bf16 %v2255_v22, %v2255_v22  ;;  %v2629_v26 = vsel %vm318_vm3, %v2255_v22, 0.0  ;;  %v2823_v27 = vmul.f32 %v2255_v22, %v2255_v22  ;;  %2141 = vst.msk [vmem:[#allocation2 + $0x138] sm:$0xff] %vm318_vm3, %v2028_v39 }
 0x1e7   : > { %v5008_v28 = vpop.f32.mrf.mxu1  ;;  %v2630_v31 = vadd.f32 %v2629_v26, %v2628_v13  ;;  %2524 = vst.msk [vmem:[%s4309_s26 + $0x148] sm:$0xf] %vm2441_vm4, %v2411_v44 }
 0x1e8   : > { %2480 = vst.msk [vmem:[%s4309_s26 + $0x98] sm:$0xf] %vm2441_vm4, %v2367_v4  ;;  %v2972_v34 = vsel %vm318_vm3, %v2823_v27, 0.0  ;;  %v1919_v62 = vpop.f32.mrf.mxu3 }
 0x1e9   : > { %v2973_v37 = vadd.f32 %v2972_v34, %v2971_v11  ;;  %v1520_v35 = vpop.f32.mrf.mxu0  ;;  %v1920_v0 = vadd.f32 %v1919_v62, %v1630_v60  ;;  %v475_v62 = vld [vmem:[#allocation2 + $0x160] sm:$0xff] }
 0x1ea   : > { %v1810_v40 = vadd.f32 %v4980_v12, %v1520_v35 }
 0x1eb   : > { %v2073_v5 = vadd.f32 %v1920_v0, %v515_v52 }
 0x1ec   : > { %v2029_v48 = vadd.f32 %v1810_v40, %v471_v38  ;;  %v2300_v13 = vld [vmem:[#allocation2 + $0x298] sm:$0xff]  ;;  %v1632_v39 = vpop.f32.mrf.mxu2 }
 0x1ed   : > { %v2256_v30 = vld [vmem:[#allocation2 + $0x138] sm:$0xff]  ;;  %v2412_v11 = vpack.c.bf16 %v2300_v13, %v2300_v13  ;;  %2186 = vst.msk [vmem:[#allocation2 + $0x2a0] sm:$0xff] %vm318_vm3, %v2073_v5 }
 0x1ee   : > { %v2368_v50 = vpack.c.bf16 %v2256_v30, %v2256_v30  ;;  %v2631_v41 = vsel %vm318_vm3, %v2256_v30, 0.0  ;;  %v2824_v51 = vmul.f32 %v2256_v30, %v2256_v30  ;;  %2142 = vst.msk [vmem:[#allocation2 + $0x140] sm:$0xff] %vm318_vm3, %v2029_v48  ;;  %v474_v40 = vld [vmem:[#allocation2 + $0x158] sm:$0xff] }
 0x1ef   : > { %v5023_v55 = vpop.f32.mrf.mxu1  ;;  %v2632_v12 = vadd.f32 %v2631_v41, %v2630_v31  ;;  %2525 = vst.msk [vmem:[%s4309_s26 + $0x14c] sm:$0xf] %vm2441_vm4, %v2412_v11  ;;  %v518_v5 = vld [vmem:[#allocation2 + $0x2b8] sm:$0xff] }
 0x1f0   : > { %2481 = vst.msk [vmem:[%s4309_s26 + $0x9c] sm:$0xf] %vm2441_vm4, %v2368_v50  ;;  %v2974_v56 = vsel %vm318_vm3, %v2824_v51, 0.0  ;;  %v1921_v4 = vpop.f32.mrf.mxu3 }
 0x1f1   : > { %v2975_v58 = vadd.f32 %v2974_v56, %v2973_v37  ;;  %v1522_v59 = vpop.f32.mrf.mxu0  ;;  %v1922_v27 = vadd.f32 %v1921_v4, %v1632_v39 }
 0x1f2   : > { %v1812_v54 = vadd.f32 %v4996_v9, %v1522_v59  ;;  %v3718_v9 = vld [vmem:[%s4131_s7 + $0x330] sm:$0xf]  ;;  %v3955_v59 = vld [vmem:[%s4131_s7 + $0x344] sm:$0xf] }
 0x1f3   : > { %v3719_v26 = vor.u32 %v3954_v14, %v3718_v9  ;;  %v2074_v2 = vadd.f32 %v1922_v27, %v516_v24  ;;  %v519_v27 = vld [vmem:[#allocation2 + $0x2c0] sm:$0xff] }
 0x1f4   : > { %v2030_v1 = vadd.f32 %v1812_v54, %v472_v45  ;;  %v2301_v36 = vld [vmem:[#allocation2 + $0x2a0] sm:$0xff]  ;;  %v1635_v43 = vpop.f32.mrf.mxu2  ;;  %v3956_v45 = vld [vmem:[%s4131_s7 + $0x344] sm:$0xf0]  ;;  %v3728_v54 = vld [vmem:[%s4131_s7 + $0x348] sm:$0xf0] }
 0x1f5   : > { %v2257_v57 = vld [vmem:[#allocation2 + $0x140] sm:$0xff]  ;;  %1674 = vmatmul.bf16.gmra.mxu2 %v3719_v26  ;;  %v2413_v38 = vpack.c.bf16 %v2301_v36, %v2301_v36  ;;  %2187 = vst.msk [vmem:[#allocation2 + $0x2a8] sm:$0xff] %vm318_vm3, %v2074_v2  ;;  %3843 = vmatmul.msk.bf16.gmra.mxu3 %vm1235_vm2, %v3723_v17  ;;  %v3731_v13 = vor.u32 %v3955_v59, %v3728_v54  ;;  %v478_v54 = vld [vmem:[#allocation2 + $0x178] sm:$0xff] }
 0x1f6   : > { %v2369_v6 = vpack.c.bf16 %v2257_v57, %v2257_v57  ;;  %v2633_v7 = vsel %vm318_vm3, %v2257_v57, 0.0  ;;  %v2825_v8 = vmul.f32 %v2257_v57, %v2257_v57  ;;  %2143 = vst.msk [vmem:[#allocation2 + $0x148] sm:$0xff] %vm318_vm3, %v2030_v1 }
 0x1f7   : > { %v5035_v10 = vpop.f32.mrf.mxu1  ;;  %v2634_v3 = vadd.f32 %v2633_v7, %v2632_v12  ;;  %2526 = vst.msk [vmem:[%s4309_s26 + $0x150] sm:$0xf] %vm2441_vm4, %v2413_v38  ;;  %v3734_v38 = vld [vmem:[%s4131_s7 + $0x350] sm:$0xf] }
 0x1f8   : > { %2482 = vst.msk [vmem:[%s4309_s26 + $0xa0] sm:$0xf] %vm2441_vm4, %v2369_v6  ;;  %v2976_v61 = vsel %vm318_vm3, %v2825_v8, 0.0  ;;  %v1924_v47 = vpop.f32.mrf.mxu3 }
 0x1f9   : > { %v2977_v18 = vadd.f32 %v2976_v61, %v2975_v58  ;;  %v1525_v20 = vpop.f32.mrf.mxu0  ;;  %v1925_v48 = vadd.f32 %v1924_v47, %v1635_v43  ;;  %v477_v47 = vld [vmem:[#allocation2 + $0x170] sm:$0xff] }
 0x1fa   : > { %v1815_v22 = vadd.f32 %v5008_v28, %v1525_v20 }
 0x1fb   : > { %v2075_v50 = vadd.f32 %v1925_v48, %v517_v25 }
 0x1fc   : > { %v2031_v21 = vadd.f32 %v1815_v22, %v473_v19  ;;  %v2302_v12 = vld [vmem:[#allocation2 + $0x2a8] sm:$0xff]  ;;  %v1637_v1 = vpop.f32.mrf.mxu2 }
 0x1fd   : > { %v2258_v31 = vld [vmem:[#allocation2 + $0x148] sm:$0xff]  ;;  %v2414_v58 = vpack.c.bf16 %v2302_v12, %v2302_v12  ;;  %2188 = vst.msk [vmem:[#allocation2 + $0x2b0] sm:$0xff] %vm318_vm3, %v2075_v50 }
 0x1fe   : > { %v2370_v32 = vpack.c.bf16 %v2258_v31, %v2258_v31  ;;  %v2635_v63 = vsel %vm318_vm3, %v2258_v31, 0.0  ;;  %v2826_v34 = vmul.f32 %v2258_v31, %v2258_v31  ;;  %2144 = vst.msk [vmem:[#allocation2 + $0x150] sm:$0xff] %vm318_vm3, %v2031_v21  ;;  %v476_v22 = vld [vmem:[#allocation2 + $0x168] sm:$0xff] }
 0x1ff   : > { %v5050_v37 = vpop.f32.mrf.mxu1  ;;  %v2636_v28 = vadd.f32 %v2635_v63, %v2634_v3  ;;  %2527 = vst.msk [vmem:[%s4309_s26 + $0x154] sm:$0xf] %vm2441_vm4, %v2414_v58  ;;  %v520_v50 = vld [vmem:[#allocation2 + $0x2c8] sm:$0xff] }
 0x200   : > { %2483 = vst.msk [vmem:[%s4309_s26 + $0xa4] sm:$0xf] %vm2441_vm4, %v2370_v32  ;;  %v2978_v35 = vsel %vm318_vm3, %v2826_v34, 0.0  ;;  %v1926_v6 = vpop.f32.mrf.mxu3 }
 0x201   : > { %v2979_v29 = vadd.f32 %v2978_v35, %v2977_v18  ;;  %v1527_v42 = vpop.f32.mrf.mxu0  ;;  %v1927_v8 = vadd.f32 %v1926_v6, %v1637_v1  ;;  %v521_v1 = vld [vmem:[#allocation2 + $0x2d0] sm:$0xff] }
 0x202   : > { %v1817_v33 = vadd.f32 %v5023_v55, %v1527_v42  ;;  %v3726_v55 = vld [vmem:[%s4131_s7 + $0x340] sm:$0xf]  ;;  %v3957_v42 = vld [vmem:[%s4131_s7 + $0x354] sm:$0xf] }
 0x203   : > { %v3727_v7 = vor.u32 %v3956_v45, %v3726_v55  ;;  %v2076_v11 = vadd.f32 %v1927_v8, %v518_v5 }
 0x204   : > { %v2032_v30 = vadd.f32 %v1817_v33, %v474_v40  ;;  %v2303_v16 = vld [vmem:[#allocation2 + $0x2b0] sm:$0xff]  ;;  %v1640_v4 = vpop.f32.mrf.mxu2  ;;  %v3958_v40 = vld [vmem:[%s4131_s7 + $0x354] sm:$0xf0]  ;;  %v3736_v33 = vld [vmem:[%s4131_s7 + $0x358] sm:$0xf0] }
 0x205   : > { %v2259_v49 = vld [vmem:[#allocation2 + $0x150] sm:$0xff]  ;;  %1679 = vmatmul.bf16.gmra.mxu2 %v3727_v7  ;;  %v2415_v19 = vpack.c.bf16 %v2303_v16, %v2303_v16  ;;  %2189 = vst.msk [vmem:[#allocation2 + $0x2b8] sm:$0xff] %vm318_vm3, %v2076_v11  ;;  %3844 = vmatmul.msk.bf16.gmra.mxu3 %vm1235_vm2, %v3731_v13  ;;  %v3739_v12 = vor.u32 %v3957_v42, %v3736_v33  ;;  %v3744_v16 = vld [vmem:[%s4131_s7 + $0x368] sm:$0xf0] }
 0x206   : > { %v2371_v41 = vpack.c.bf16 %v2259_v49, %v2259_v49  ;;  %v2637_v51 = vsel %vm318_vm3, %v2259_v49, 0.0  ;;  %v2827_v53 = vmul.f32 %v2259_v49, %v2259_v49  ;;  %2145 = vst.msk [vmem:[#allocation2 + $0x158] sm:$0xff] %vm318_vm3, %v2032_v30 }
 0x207   : > { %v5062_v44 = vpop.f32.mrf.mxu1  ;;  %v2638_v56 = vadd.f32 %v2637_v51, %v2636_v28  ;;  %2528 = vst.msk [vmem:[%s4309_s26 + $0x158] sm:$0xf] %vm2441_vm4, %v2415_v19  ;;  %v3735_v51 = vor.u32 %v3958_v40, %v3734_v38 }
 0x208   : > { %2484 = vst.msk [vmem:[%s4309_s26 + $0xa8] sm:$0xf] %vm2441_vm4, %v2371_v41  ;;  %v2980_v60 = vsel %vm318_vm3, %v2827_v53, 0.0  ;;  %v1929_v17 = vpop.f32.mrf.mxu3 }
 0x209   : > { %v2981_v52 = vadd.f32 %v2980_v60, %v2979_v29  ;;  %v1530_v0 = vpop.f32.mrf.mxu0  ;;  %v1930_v21 = vadd.f32 %v1929_v17, %v1640_v4 }
 0x20a   : > { %v1820_v57 = vadd.f32 %v5035_v10, %v1530_v0 }
 0x20b   : > { %v2077_v32 = vadd.f32 %v1930_v21, %v519_v27 }
 0x20c   : > { %v2033_v9 = vadd.f32 %v1820_v57, %v475_v62  ;;  %v5086_v28 = vld [vmem:[#allocation2 + $0x2b8] sm:$0xff]  ;;  %v1642_v30 = vpop.f32.mrf.mxu2 }
 0x20d   : > { %v2260_v3 = vld [vmem:[#allocation2 + $0x158] sm:$0xff]  ;;  %v2416_v29 = vpack.c.bf16 %v5086_v28, %v5086_v28  ;;  %2190 = vst.msk [vmem:[#allocation2 + $0x2c0] sm:$0xff] %vm318_vm3, %v2077_v32 }
 0x20e   : > { %v2372_v14 = vpack.c.bf16 %v2260_v3, %v2260_v3  ;;  %v2639_v15 = vsel %vm318_vm3, %v2260_v3, 0.0  ;;  %v2828_v61 = vmul.f32 %v2260_v3, %v2260_v3  ;;  %2146 = vst.msk [vmem:[#allocation2 + $0x160] sm:$0xff] %vm318_vm3, %v2033_v9 }
 0x20f   : > { %v1826_v18 = vpop.f32.mrf.mxu1  ;;  %v2640_v10 = vadd.f32 %v2639_v15, %v2638_v56  ;;  %2529 = vst.msk [vmem:[%s4309_s26 + $0x15c] sm:$0xf] %vm2441_vm4, %v2416_v29  ;;  %v3960_v15 = vld [vmem:[%s4131_s7 + $0x364] sm:$0xf0]  ;;  %v523_v29 = vld [vmem:[#allocation2 + $0x2e0] sm:$0xff] }
 0x210   : > { %2485 = vst.msk [vmem:[%s4309_s26 + $0xac] sm:$0xf] %vm2441_vm4, %v2372_v14  ;;  %v2982_v20 = vsel %vm318_vm3, %v2828_v61, 0.0  ;;  %v1931_v41 = vpop.f32.mrf.mxu3  ;;  %v3742_v14 = vld [vmem:[%s4131_s7 + $0x360] sm:$0xf] }
 0x211   : > { %v2983_v39 = vadd.f32 %v2982_v20, %v2981_v52  ;;  %v1532_v24 = vpop.f32.mrf.mxu0  ;;  %v1932_v53 = vadd.f32 %v1931_v41, %v1642_v30  ;;  %v3959_v61 = vld [vmem:[%s4131_s7 + $0x364] sm:$0xf]  ;;  %v3750_v41 = vld [vmem:[%s4131_s7 + $0x370] sm:$0xf] }
 0x212   : > { %v1822_v26 = vadd.f32 %v5050_v37, %v1532_v24  ;;  %v3743_v24 = vor.u32 %v3960_v15, %v3742_v14 }
 0x213   : > { %v2078_v58 = vadd.f32 %v1932_v53, %v520_v50  ;;  %v3961_v53 = vld [vmem:[%s4131_s7 + $0x374] sm:$0xf] }
 0x214   : > { %v2034_v31 = vadd.f32 %v1822_v26, %v476_v22  ;;  %v5110_v59 = vld [vmem:[#allocation2 + $0x2c0] sm:$0xff]  ;;  %v1645_v62 = vpop.f32.mrf.mxu2  ;;  %v3747_v26 = vor.u32 %v3959_v61, %v3744_v16  ;;  %v525_v16 = vld [vmem:[#allocation2 + $0x2f0] sm:$0xff] }
 0x215   : > { %v2261_v2 = vld [vmem:[#allocation2 + $0x160] sm:$0xff]  ;;  %1684 = vmatmul.bf16.gmra.mxu2 %v3735_v51  ;;  %2191 = vst.msk [vmem:[#allocation2 + $0x2c8] sm:$0xff] %vm318_vm3, %v2078_v58  ;;  %3845 = vmatmul.msk.bf16.gmra.mxu3 %vm1235_vm2, %v3739_v12  ;;  %v3962_v51 = vld [vmem:[%s4131_s7 + $0x374] sm:$0xf0]  ;;  %v3752_v12 = vld [vmem:[%s4131_s7 + $0x378] sm:$0xf0] }
 0x216   : > { %v2373_v63 = vpack.c.bf16 %v2261_v2, %v2261_v2  ;;  %v2641_v34 = vsel %vm318_vm3, %v2261_v2, 0.0  ;;  %v2829_v36 = vmul.f32 %v2261_v2, %v2261_v2  ;;  %2147 = vst.msk [vmem:[#allocation2 + $0x168] sm:$0xff] %vm318_vm3, %v2034_v31 }
 0x217   : > { %v1829_v37 = vpop.f32.mrf.mxu1  ;;  %v5090_v35 = vadd.f32 %v2641_v34, %v2640_v10  ;;  %v480_v34 = vld [vmem:[#allocation2 + $0x188] sm:$0xff] }
 0x218   : > { %2486 = vst.msk [vmem:[%s4309_s26 + $0xb0] sm:$0xf] %vm2441_vm4, %v2373_v63  ;;  %v2984_v43 = vsel %vm318_vm3, %v2829_v36, 0.0  ;;  %v1934_v57 = vpop.f32.mrf.mxu3 }
 0x219   : > { %v5101_v25 = vadd.f32 %v2984_v43, %v2983_v39  ;;  %v1535_v48 = vpop.f32.mrf.mxu0  ;;  %v1935_v5 = vadd.f32 %v1934_v57, %v1645_v62  ;;  %v522_v39 = vld [vmem:[#allocation2 + $0x2d8] sm:$0xff] }
 0x21a   : > { %v1825_v49 = vadd.f32 %v5062_v44, %v1535_v48  ;;  %v2417_v44 = vpack.c.bf16 %v5110_v59, %v5110_v59 }
 0x21b   : > { %v2079_v8 = vadd.f32 %v1935_v5, %v521_v1 }
 0x21c   : > { %v2035_v55 = vadd.f32 %v1825_v49, %v477_v47  ;;  %2530 = vst.msk [vmem:[%s4309_s26 + $0x160] sm:$0xf] %vm2441_vm4, %v2417_v44  ;;  %v5125_v9 = vld [vmem:[#allocation2 + $0x2c8] sm:$0xff]  ;;  %v1647_v19 = vpop.f32.mrf.mxu2 }
 0x21d   : > { %v5106_v56 = vld [vmem:[#allocation2 + $0x168] sm:$0xff]  ;;  %v2418_v11 = vpack.c.bf16 %v5125_v9, %v5125_v9  ;;  %2192 = vst.msk [vmem:[#allocation2 + $0x2d0] sm:$0xff] %vm318_vm3, %v2079_v8 }
 0x21e   : > { %v2374_v45 = vpack.c.bf16 %v5106_v56, %v5106_v56  ;;  %2148 = vst.msk [vmem:[#allocation2 + $0x170] sm:$0xff] %vm318_vm3, %v2035_v55  ;;  %v481_v55 = vld [vmem:[#allocation2 + $0x190] sm:$0xff]  ;;  %v524_v44 = vld [vmem:[#allocation2 + $0x2e8] sm:$0xff] }
 0x21f   : > { %v1831_v60 = vpop.f32.mrf.mxu1  ;;  %2531 = vst.msk [vmem:[%s4309_s26 + $0x164] sm:$0xf] %vm2441_vm4, %v2418_v11  ;;  %v482_v11 = vld [vmem:[#allocation2 + $0x198] sm:$0xff] }
 0x220   : > { %2487 = vst.msk [vmem:[%s4309_s26 + $0xb4] sm:$0xf] %vm2441_vm4, %v2374_v45  ;;  %v1936_v22 = vpop.f32.mrf.mxu3 }
 0x221   : > { %v1537_v52 = vpop.f32.mrf.mxu0  ;;  %v1937_v4 = vadd.f32 %v1936_v22, %v1647_v19 }
 0x222   : > { %v1827_v0 = vadd.f32 %v1826_v18, %v1537_v52  ;;  %v479_v18 = vld [vmem:[#allocation2 + $0x180] sm:$0xff]  ;;  %v3751_v52 = vor.u32 %v3962_v51, %v3750_v41 }
 0x223   : > { %v2080_v21 = vadd.f32 %v1937_v4, %v522_v39  ;;  %v527_v51 = vld [vmem:[#allocation2 + $0x300] sm:$0xff] }
 0x224   : > { %v2036_v6 = vadd.f32 %v1827_v0, %v478_v54  ;;  %v5143_v2 = vld [vmem:[#allocation2 + $0x2d0] sm:$0xff]  ;;  %v3755_v0 = vor.u32 %v3961_v53, %v3752_v12 }
 0x225   : > { %v5121_v7 = vld [vmem:[#allocation2 + $0x170] sm:$0xff]  ;;  %1689 = vmatmul.bf16.gmra.mxu2 %v3743_v24  ;;  %v2419_v63 = vpack.c.bf16 %v5143_v2, %v5143_v2  ;;  %2193 = vst.msk [vmem:[#allocation2 + $0x2d8] sm:$0xff] %vm318_vm3, %v2080_v21  ;;  %3846 = vmatmul.msk.bf16.gmra.mxu3 %vm1235_vm2, %v3747_v26 }
 0x226   : > { %v2375_v13 = vpack.c.bf16 %v5121_v7, %v5121_v7  ;;  %2149 = vst.msk [vmem:[#allocation2 + $0x178] sm:$0xff] %vm318_vm3, %v2036_v6 }
 0x227   : > { %v1834_v3 = vpop.f32.mrf.mxu1  ;;  %2532 = vst.msk [vmem:[%s4309_s26 + $0x168] sm:$0xf] %vm2441_vm4, %v2419_v63  ;;  %v526_v63 = vld [vmem:[#allocation2 + $0x2f8] sm:$0xff] }
 0x228   : > { %2488 = vst.msk [vmem:[%s4309_s26 + $0xb8] sm:$0xf] %vm2441_vm4, %v2375_v13  ;;  %v1939_v40 = vpop.f32.mrf.mxu3 }
 0x229   : > { %v1540_v10 = vpop.f32.mrf.mxu0 }
 0x22a   : > { %v1830_v20 = vadd.f32 %v1829_v37, %v1540_v10  ;;  %v1650_v37 = vpop.f32.mrf.mxu2 }
 0x22b   : > { %v1940_v42 = vadd.f32 %v1939_v40, %v1650_v37 }
 0x22c   : > { %v2037_v27 = vadd.f32 %v1830_v20, %v479_v18  ;;  %v5158_v30 = vld [vmem:[#allocation2 + $0x2d8] sm:$0xff] }
 0x22d   : > { %v5139_v17 = vld [vmem:[#allocation2 + $0x178] sm:$0xff]  ;;  %v2081_v47 = vadd.f32 %v1940_v42, %v523_v29  ;;  %v2420_v50 = vpack.c.bf16 %v5158_v30, %v5158_v30 }
 0x22e   : > { %v2376_v31 = vpack.c.bf16 %v5139_v17, %v5139_v17  ;;  %2150 = vst.msk [vmem:[#allocation2 + $0x180] sm:$0xff] %vm318_vm3, %v2037_v27  ;;  %v483_v27 = vld [vmem:[#allocation2 + $0x1a0] sm:$0xff] }
 0x22f   : > { %v1836_v32 = vpop.f32.mrf.mxu1  ;;  %2194 = vst.msk [vmem:[#allocation2 + $0x2e0] sm:$0xff] %vm318_vm3, %v2081_v47 }
 0x230   : > { %2489 = vst.msk [vmem:[%s4309_s26 + $0xbc] sm:$0xf] %vm2441_vm4, %v2376_v31  ;;  %v1941_v54 = vpop.f32.mrf.mxu3 }
 0x231   : > { %v1542_v36 = vpop.f32.mrf.mxu0  ;;  %2533 = vst.msk [vmem:[%s4309_s26 + $0x16c] sm:$0xf] %vm2441_vm4, %v2420_v50 }
 0x232   : > { %v1832_v38 = vadd.f32 %v1831_v60, %v1542_v36  ;;  %v1652_v45 = vpop.f32.mrf.mxu2 }
 0x233   : > { %v1942_v62 = vadd.f32 %v1941_v54, %v1652_v45 }
 0x234   : > { %v2038_v43 = vadd.f32 %v1832_v38, %v480_v34 }
 0x235   : > { %v5154_v33 = vld [vmem:[#allocation2 + $0x180] sm:$0xff]  ;;  %v2082_v5 = vadd.f32 %v1942_v62, %v524_v44  ;;  %1694 = vmatmul.bf16.gmra.mxu2 %v3751_v52  ;;  %3847 = vmatmul.msk.bf16.gmra.mxu3 %vm1235_vm2, %v3755_v0  ;;  %v2830_v52 = vmul.f32 %v5106_v56, %v5106_v56 }
 0x236   : > { %v2377_v48 = vpack.c.bf16 %v5154_v33, %v5154_v33  ;;  %2151 = vst.msk [vmem:[#allocation2 + $0x188] sm:$0xff] %vm318_vm3, %v2038_v43  ;;  %v5176_v8 = vld [vmem:[#allocation2 + $0x2e0] sm:$0xff] }
 0x237   : > { %v1839_v49 = vpop.f32.mrf.mxu1  ;;  %2195 = vst.msk [vmem:[#allocation2 + $0x2e8] sm:$0xff] %vm318_vm3, %v2082_v5  ;;  %v487_v0 = vld [vmem:[#allocation2 + $0x1c0] sm:$0xff]  ;;  %v2643_v5 = vsel %vm318_vm3, %v5106_v56, 0.0  ;;  %v2832_v56 = vmul.f32 %v5139_v17, %v5139_v17 }
 0x238   : > { %2490 = vst.msk [vmem:[%s4309_s26 + $0xc0] sm:$0xf] %vm2441_vm4, %v2377_v48  ;;  %v1944_v18 = vpop.f32.mrf.mxu3  ;;  %v484_v48 = vld [vmem:[#allocation2 + $0x1a8] sm:$0xff] }
 0x239   : > { %v1545_v58 = vpop.f32.mrf.mxu0 }
 0x23a   : > { %v1835_v60 = vadd.f32 %v1834_v3, %v1545_v58  ;;  %v2421_v3 = vpack.c.bf16 %v5176_v8, %v5176_v8  ;;  %v1655_v15 = vpop.f32.mrf.mxu2 }
 0x23b   : > { %v1945_v10 = vadd.f32 %v1944_v18, %v1655_v15  ;;  %v2986_v18 = vsel %vm318_vm3, %v2830_v52, 0.0 }
 0x23c   : > { %v2039_v1 = vadd.f32 %v1835_v60, %v481_v55  ;;  %2534 = vst.msk [vmem:[%s4309_s26 + $0x170] sm:$0xf] %vm2441_vm4, %v2421_v3 }
 0x23d   : > { %v5172_v57 = vld [vmem:[#allocation2 + $0x188] sm:$0xff]  ;;  %v2083_v39 = vadd.f32 %v1945_v10, %v525_v16 }
 0x23e   : > { %v2378_v6 = vpack.c.bf16 %v5172_v57, %v5172_v57  ;;  %2152 = vst.msk [vmem:[#allocation2 + $0x190] sm:$0xff] %vm318_vm3, %v2039_v1  ;;  %v5191_v24 = vld [vmem:[#allocation2 + $0x2e8] sm:$0xff] }
 0x23f   : > { %v1841_v13 = vpop.f32.mrf.mxu1  ;;  %v2422_v26 = vpack.c.bf16 %v5191_v24, %v5191_v24  ;;  %2196 = vst.msk [vmem:[#allocation2 + $0x2f0] sm:$0xff] %vm318_vm3, %v2083_v39 }
 0x240   : > { %2491 = vst.msk [vmem:[%s4309_s26 + $0xc4] sm:$0xf] %vm2441_vm4, %v2378_v6  ;;  %v1946_v34 = vpop.f32.mrf.mxu3  ;;  %v2831_v6 = vmul.f32 %v5121_v7, %v5121_v7 }
 0x241   : > { %v1547_v14 = vpop.f32.mrf.mxu0  ;;  %2535 = vst.msk [vmem:[%s4309_s26 + $0x174] sm:$0xf] %vm2441_vm4, %v2422_v26  ;;  %v2833_v26 = vmul.f32 %v5154_v33, %v5154_v33 }
 0x242   : > { %v1837_v61 = vadd.f32 %v1836_v32, %v1547_v14  ;;  %v1657_v31 = vpop.f32.mrf.mxu2 }
 0x243   : > { %v1947_v36 = vadd.f32 %v1946_v34, %v1657_v31  ;;  %v2990_v34 = vsel %vm318_vm3, %v2832_v56, 0.0 }
 0x244   : > { %v2040_v19 = vadd.f32 %v1837_v61, %v482_v11  ;;  %v528_v61 = vld [vmem:[#allocation2 + $0x308] sm:$0xff] }
 0x245   : > { %v5187_v20 = vld [vmem:[#allocation2 + $0x190] sm:$0xff]  ;;  %v2084_v29 = vadd.f32 %v1947_v36, %v526_v63  ;;  %v2834_v36 = vmul.f32 %v5172_v57, %v5172_v57 }
 0x246   : > { %v2379_v22 = vpack.c.bf16 %v5187_v20, %v5187_v20  ;;  %2153 = vst.msk [vmem:[#allocation2 + $0x198] sm:$0xff] %vm318_vm3, %v2040_v19  ;;  %v5205_v42 = vld [vmem:[#allocation2 + $0x2f0] sm:$0xff]  ;;  %v2644_v19 = vadd.f32 %v2643_v5, %v5090_v35 }
 0x247   : > { %v1844_v4 = vpop.f32.mrf.mxu1  ;;  %v2423_v47 = vpack.c.bf16 %v5205_v42, %v5205_v42  ;;  %2197 = vst.msk [vmem:[#allocation2 + $0x2f8] sm:$0xff] %vm318_vm3, %v2084_v29 }
 0x248   : > { %2492 = vst.msk [vmem:[%s4309_s26 + $0xc8] sm:$0xf] %vm2441_vm4, %v2379_v22  ;;  %v1949_v53 = vpop.f32.mrf.mxu3  ;;  %v2988_v22 = vsel %vm318_vm3, %v2831_v6, 0.0 }
 0x249   : > { %v1550_v21 = vpop.f32.mrf.mxu0  ;;  %2536 = vst.msk [vmem:[%s4309_s26 + $0x178] sm:$0xf] %vm2441_vm4, %v2423_v47 }
 0x24a   : > { %v1840_v32 = vadd.f32 %v1839_v49, %v1550_v21  ;;  %v1660_v50 = vpop.f32.mrf.mxu2  ;;  %v2987_v21 = vadd.f32 %v2986_v18, %v5101_v25  ;;  %v488_v25 = vld [vmem:[#allocation2 + $0x1c8] sm:$0xff] }
 0x24b   : > { %v1950_v12 = vadd.f32 %v1949_v53, %v1660_v50  ;;  %v486_v50 = vld [vmem:[#allocation2 + $0x1b8] sm:$0xff] }
 0x24c   : > { %v2041_v37 = vadd.f32 %v1840_v32, %v483_v27  ;;  %v2989_v29 = vadd.f32 %v2988_v22, %v2987_v21 }
 0x24d   : > { %v5201_v38 = vld [vmem:[#allocation2 + $0x198] sm:$0xff]  ;;  %v2085_v45 = vadd.f32 %v1950_v12, %v527_v51 }
 0x24e   : > { %v2380_v40 = vpack.c.bf16 %v5201_v38, %v5201_v38  ;;  %2154 = vst.msk [vmem:[#allocation2 + $0x1a0] sm:$0xff] %vm318_vm3, %v2041_v37  ;;  %v5221_v44 = vld [vmem:[#allocation2 + $0x2f8] sm:$0xff]  ;;  %v2991_v53 = vadd.f32 %v2990_v34, %v2989_v29 }
 0x24f   : > { %v5208_v43 = vpop.f32.mrf.mxu1  ;;  %v2424_v62 = vpack.c.bf16 %v5221_v44, %v5221_v44  ;;  %2198 = vst.msk [vmem:[#allocation2 + $0x300] sm:$0xff] %vm318_vm3, %v2085_v45  ;;  %v530_v34 = vld [vmem:[#allocation2 + $0x318] sm:$0xff] }
 0x250   : > { %2493 = vst.msk [vmem:[%s4309_s26 + $0xcc] sm:$0xf] %vm2441_vm4, %v2380_v40  ;;  %v1951_v16 = vpop.f32.mrf.mxu3 }
 0x251   : > { %v1552_v49 = vpop.f32.mrf.mxu0  ;;  %2537 = vst.msk [vmem:[%s4309_s26 + $0x17c] sm:$0xf] %vm2441_vm4, %v2424_v62 }
 0x252   : > { %v1842_v41 = vadd.f32 %v1841_v13, %v1552_v49  ;;  %v485_v13 = vld [vmem:[#allocation2 + $0x1b0] sm:$0xff]  ;;  %v1662_v11 = vpop.f32.mrf.mxu2  ;;  %v2835_v49 = vmul.f32 %v5187_v20, %v5187_v20 }
 0x253   : > { %v1952_v10 = vadd.f32 %v1951_v16, %v1662_v11 }
 0x254   : > { %v2042_v55 = vadd.f32 %v1842_v41, %v484_v48  ;;  %v2992_v48 = vsel %vm318_vm3, %v2833_v26, 0.0  ;;  %v2996_v6 = vsel %vm318_vm3, %v2835_v49, 0.0 }
 0x255   : > { %v5217_v58 = vld [vmem:[#allocation2 + $0x1a0] sm:$0xff]  ;;  %v2993_v62 = vadd.f32 %v2992_v48, %v2991_v53 }
 0x256   : > { %v2381_v60 = vpack.c.bf16 %v5217_v58, %v5217_v58  ;;  %2155 = vst.msk [vmem:[#allocation2 + $0x1a8] sm:$0xff] %vm318_vm3, %v2042_v55  ;;  %v5251_v63 = vld [vmem:[#allocation2 + $0x300] sm:$0xff]  ;;  %v2657_v16 = vsel %vm318_vm3, %v5217_v58, 0.0 }
 0x257   : > { %v1849_v54 = vpop.f32.mrf.mxu1  ;;  %v2425_v37 = vpack.c.bf16 %v5251_v63, %v5251_v63 }
 0x258   : > { %2494 = vst.msk [vmem:[%s4309_s26 + $0xd0] sm:$0xf] %vm2441_vm4, %v2381_v60  ;;  %v1850_v1 = vadd.f32 %v1849_v54, %v4573_v23  ;;  %v2645_v23 = vsel %vm318_vm3, %v5121_v7, 0.0  ;;  %v2086_v7 = vadd.f32 %v1952_v10, %v528_v61  ;;  %v1954_v60 = vpop.f32.mrf.mxu3  ;;  %v2836_v54 = vmul.f32 %v5201_v38, %v5201_v38 }
 0x259   : > { %v1555_v3 = vpop.f32.mrf.mxu0  ;;  %v2646_v31 = vadd.f32 %v2645_v23, %v2644_v19  ;;  %2538 = vst.msk [vmem:[%s4309_s26 + $0x180] sm:$0xf] %vm2441_vm4, %v2425_v37 }
 0x25a   : > { %v2045_v14 = vadd.f32 %v1850_v1, %v487_v0  ;;  %v1845_v15 = vadd.f32 %v1844_v4, %v1555_v3  ;;  %v2647_v4 = vsel %vm318_vm3, %v5139_v17, 0.0  ;;  %v2649_v17 = vsel %vm318_vm3, %v5154_v33, 0.0  ;;  %2199 = vst.msk [vmem:[#allocation2 + $0x308] sm:$0xff] %vm318_vm3, %v2086_v7  ;;  %v1665_v51 = vpop.f32.mrf.mxu2 }
 0x25b   : > { %v2648_v40 = vadd.f32 %v2647_v4, %v2646_v31  ;;  %v2651_v33 = vsel %vm318_vm3, %v5172_v57, 0.0  ;;  %v2653_v57 = vsel %vm318_vm3, %v5187_v20, 0.0  ;;  %v2998_v61 = vsel %vm318_vm3, %v2836_v54, 0.0 }
 0x25c   : > { %2158 = vst.msk [vmem:[#allocation2 + $0x1c0] sm:$0xff] %vm318_vm3, %v2045_v14  ;;  %v2043_v39 = vadd.f32 %v1845_v15, %v485_v13  ;;  %v2837_v13 = vmul.f32 %v5217_v58, %v5217_v58  ;;  %v1955_v26 = vadd.f32 %v1954_v60, %v1665_v51 }
 0x25d   : > { %v2270_v27 = vld [vmem:[#allocation2 + $0x1a8] sm:$0xff]  ;;  %v2650_v12 = vadd.f32 %v2649_v17, %v2648_v40 }
 0x25e   : > { %v2382_v32 = vpack.c.bf16 %v2270_v27, %v2270_v27  ;;  %2156 = vst.msk [vmem:[#allocation2 + $0x1b0] sm:$0xff] %vm318_vm3, %v2043_v39  ;;  %v2838_v18 = vmul.f32 %v2270_v27, %v2270_v27  ;;  %v3000_v10 = vsel %vm318_vm3, %v2837_v13, 0.0  ;;  %v2659_v19 = vsel %vm318_vm3, %v2270_v27, 0.0 }
 0x25f   : > { %v1851_v35 = vpop.f32.mrf.mxu1  ;;  %v2652_v0 = vadd.f32 %v2651_v33, %v2650_v12 }
 0x260   : > { %2495 = vst.msk [vmem:[%s4309_s26 + $0xd4] sm:$0xf] %vm2441_vm4, %v2382_v32  ;;  %v1852_v47 = vadd.f32 %v1851_v35, %v4591_v46  ;;  %v2994_v46 = vsel %vm318_vm3, %v2834_v36, 0.0  ;;  %v1956_v7 = vpop.f32.mrf.mxu3  ;;  %v3002_v21 = vsel %vm318_vm3, %v2838_v18, 0.0  ;;  %v529_v35 = vld [vmem:[#allocation2 + $0x310] sm:$0xff] }
 0x261   : > { %v1557_v41 = vpop.f32.mrf.mxu0  ;;  %v2995_v3 = vadd.f32 %v2994_v46, %v2993_v62  ;;  %v2654_v11 = vadd.f32 %v2653_v57, %v2652_v0  ;;  %v5286_v15 = vld [vmem:[#allocation2 + $0x308] sm:$0xff]  ;;  %v4008_v0 = vld [vmem:[#allocation2 + $0x1d0] sm:$0xff] }
 0x262   : > { %v2046_v55 = vadd.f32 %v1852_v47, %v488_v25  ;;  %v1847_v45 = vadd.f32 %v5208_v43, %v1557_v41  ;;  %v2655_v43 = vsel %vm318_vm3, %v5201_v38, 0.0  ;;  %v2426_v38 = vpack.c.bf16 %v5286_v15, %v5286_v15  ;;  %v1667_v22 = vpop.f32.mrf.mxu2 }
 0x263   : > { %v2273_v52 = vld [vmem:[#allocation2 + $0x1c0] sm:$0xff]  ;;  %v2997_v23 = vadd.f32 %v2996_v6, %v2995_v3  ;;  %v2656_v56 = vadd.f32 %v2655_v43, %v2654_v11  ;;  %v1957_v17 = vadd.f32 %v1956_v7, %v1667_v22  ;;  %v2087_v25 = vadd.f32 %v1955_v26, %v529_v35  ;;  %v4011_v7 = vld [vmem:[#allocation2 + $0x1e8] sm:$0xff] }
 0x264   : > { %v2385_v1 = vpack.c.bf16 %v2273_v52, %v2273_v52  ;;  %2159 = vst.msk [vmem:[#allocation2 + $0x1c8] sm:$0xff] %vm318_vm3, %v2046_v55  ;;  %v2044_v5 = vadd.f32 %v1847_v45, %v486_v50  ;;  %v2841_v49 = vmul.f32 %v2273_v52, %v2273_v52  ;;  %v2665_v55 = vsel %vm318_vm3, %v2273_v52, 0.0  ;;  %v4009_v52 = vld [vmem:[#allocation2 + $0x1d8] sm:$0xff] }
 0x265   : > { %v2271_v20 = vld [vmem:[#allocation2 + $0x1b0] sm:$0xff]  ;;  %2539 = vst.msk [vmem:[%s4309_s26 + $0x184] sm:$0xf] %vm2441_vm4, %v2426_v38  ;;  %v2999_v4 = vadd.f32 %v2998_v61, %v2997_v23  ;;  %v2658_v58 = vadd.f32 %v2657_v16, %v2656_v56  ;;  %v2088_v40 = vadd.f32 %v1957_v17, %v530_v34  ;;  %v2844_v3 = vmul.f32 %v4009_v52, %v4009_v52  ;;  %v4010_v23 = vld [vmem:[#allocation2 + $0x1e0] sm:$0xff] }
 0x266   : > { %2498 = vst.msk [vmem:[%s4309_s26 + $0xe0] sm:$0xf] %vm2441_vm4, %v2385_v1  ;;  %v2383_v14 = vpack.c.bf16 %v2271_v20, %v2271_v20  ;;  %v2839_v39 = vmul.f32 %v2271_v20, %v2271_v20  ;;  %v2661_v31 = vsel %vm318_vm3, %v2271_v20, 0.0  ;;  %v2843_v1 = vmul.f32 %v4008_v0, %v4008_v0 }
 0x267   : > { %2157 = vst.msk [vmem:[#allocation2 + $0x1b8] sm:$0xff] %vm318_vm3, %v2044_v5  ;;  %v3001_v36 = vadd.f32 %v3000_v10, %v2999_v4  ;;  %v2660_v37 = vadd.f32 %v2659_v19, %v2658_v58  ;;  %v3008_v5 = vsel %vm318_vm3, %v2841_v49, 0.0  ;;  %v2669_v20 = vsel %vm318_vm3, %v4008_v0, 0.0 }
 0x268   : > { %2496 = vst.msk [vmem:[%s4309_s26 + $0xd8] sm:$0xf] %vm2441_vm4, %v2383_v14  ;;  %v3004_v29 = vsel %vm318_vm3, %v2839_v39, 0.0  ;;  %v1959_v62 = vpop.f32.mrf.mxu3  ;;  %v3012_v18 = vsel %vm318_vm3, %v2843_v1, 0.0  ;;  %v2671_v38 = vsel %vm318_vm3, %v4009_v52, 0.0  ;;  %v2845_v56 = vmul.f32 %v4010_v23, %v4010_v23 }
 0x269   : > { %v3003_v47 = vadd.f32 %v3002_v21, %v3001_v36  ;;  %v2662_v48 = vadd.f32 %v2661_v31, %v2660_v37  ;;  %2200 = vst.msk [vmem:[#allocation2 + $0x310] sm:$0xff] %vm318_vm3, %v2087_v25  ;;  %v3014_v58 = vsel %vm318_vm3, %v2844_v3, 0.0  ;;  %v2673_v26 = vsel %vm318_vm3, %v4010_v23, 0.0 }
 0x26a   : > { %2201 = vst.msk [vmem:[#allocation2 + $0x318] sm:$0xff] %vm318_vm3, %v2088_v40  ;;  %v1670_v46 = vpop.f32.mrf.mxu2  ;;  %v2846_v21 = vmul.f32 %v4011_v7, %v4011_v7  ;;  %v3016_v36 = vsel %vm318_vm3, %v2845_v56, 0.0  ;;  %v2675_v37 = vsel %vm318_vm3, %v4011_v7, 0.0  ;;  %v532_v40 = vld [vmem:[#allocation2 + $0x328] sm:$0xff] }
 0x26b   : > { %v2274_v32 = vld [vmem:[#allocation2 + $0x1c8] sm:$0xff]  ;;  %v3005_v53 = vadd.f32 %v3004_v29, %v3003_v47  ;;  %v1960_v34 = vadd.f32 %v1959_v62, %v1670_v46  ;;  %v531_v29 = vld [vmem:[#allocation2 + $0x320] sm:$0xff] }
 0x26c   : > { %v2386_v27 = vpack.c.bf16 %v2274_v32, %v2274_v32  ;;  %v2842_v45 = vmul.f32 %v2274_v32, %v2274_v32  ;;  %v2667_v6 = vsel %vm318_vm3, %v2274_v32, 0.0 }
 0x26d   : > { %v2089_v49 = vadd.f32 %v1960_v34, %v531_v29  ;;  %v4019_v29 = vld [vmem:[#allocation2 + $0x228] sm:$0xff] }
 0x26e   : > { %2499 = vst.msk [vmem:[%s4309_s26 + $0xe4] sm:$0xf] %vm2441_vm4, %v2386_v27  ;;  %v2272_v33 = vld [vmem:[#allocation2 + $0x1b8] sm:$0xff]  ;;  %v3010_v11 = vsel %vm318_vm3, %v2842_v45, 0.0  ;;  %v4012_v27 = vld [vmem:[#allocation2 + $0x1f0] sm:$0xff] }
 0x26f   : > { %v2384_v50 = vpack.c.bf16 %v2272_v33, %v2272_v33  ;;  %v2663_v41 = vsel %vm318_vm3, %v2272_v33, 0.0  ;;  %v2840_v51 = vmul.f32 %v2272_v33, %v2272_v33  ;;  %v2847_v25 = vmul.f32 %v4012_v27, %v4012_v27  ;;  %2202 = vst.msk [vmem:[#allocation2 + $0x320] sm:$0xff] %vm318_vm3, %v2089_v49 }
 0x270   : > { %v2664_v12 = vadd.f32 %v2663_v41, %v2662_v48  ;;  %v5316_v16 = vld [vmem:[#allocation2 + $0x310] sm:$0xff]  ;;  %v1961_v17 = vpop.f32.mrf.mxu3  ;;  %v2677_v41 = vsel %vm318_vm3, %v4012_v27, 0.0 }
 0x271   : > { %2497 = vst.msk [vmem:[%s4309_s26 + $0xdc] sm:$0xf] %vm2441_vm4, %v2384_v50  ;;  %v3006_v60 = vsel %vm318_vm3, %v2840_v51, 0.0  ;;  %v2427_v10 = vpack.c.bf16 %v5316_v16, %v5316_v16  ;;  %v5322_v19 = vld [vmem:[#allocation2 + $0x318] sm:$0xff]  ;;  %v3018_v50 = vsel %vm318_vm3, %v2846_v21, 0.0 }
 0x272   : > { %v2666_v57 = vadd.f32 %v2665_v55, %v2664_v12  ;;  %v3007_v54 = vadd.f32 %v3006_v60, %v3005_v53  ;;  %v2428_v4 = vpack.c.bf16 %v5322_v19, %v5322_v19  ;;  %v1672_v31 = vpop.f32.mrf.mxu2  ;;  %v4013_v51 = vld [vmem:[#allocation2 + $0x1f8] sm:$0xff]  ;;  %v3020_v60 = vsel %vm318_vm3, %v2847_v25, 0.0 }
 0x273   : > { %2540 = vst.msk [vmem:[%s4309_s26 + $0x188] sm:$0xf] %vm2441_vm4, %v2427_v10  ;;  %v1962_v47 = vadd.f32 %v1961_v17, %v1672_v31  ;;  %v2848_v53 = vmul.f32 %v4013_v51, %v4013_v51  ;;  %v2679_v46 = vsel %vm318_vm3, %v4013_v51, 0.0  ;;  %v2691_v51 = vsel %vm318_vm3, %v4019_v29, 0.0 }
 0x274   : > { %v2668_v43 = vadd.f32 %v2667_v6, %v2666_v57  ;;  %v3009_v13 = vadd.f32 %v3008_v5, %v3007_v54  ;;  %2541 = vst.msk [vmem:[%s4309_s26 + $0x18c] sm:$0xf] %vm2441_vm4, %v2428_v4  ;;  %v4014_v57 = vld [vmem:[#allocation2 + $0x200] sm:$0xff]  ;;  %v4015_v6 = vld [vmem:[#allocation2 + $0x208] sm:$0xff] }
 0x275   : > { %v2090_v12 = vadd.f32 %v1962_v47, %v532_v40  ;;  %v2849_v54 = vmul.f32 %v4014_v57, %v4014_v57  ;;  %v3022_v1 = vsel %vm318_vm3, %v2848_v53, 0.0  ;;  %v2681_v5 = vsel %vm318_vm3, %v4014_v57, 0.0  ;;  %v4020_v53 = vld [vmem:[#allocation2 + $0x230] sm:$0xff] }
 0x276   : > { %v2670_v14 = vadd.f32 %v2669_v20, %v2668_v43  ;;  %v3011_v61 = vadd.f32 %v3010_v11, %v3009_v13  ;;  %v2850_v43 = vmul.f32 %v4015_v6, %v4015_v6  ;;  %v5346_v4 = vld [vmem:[#allocation2 + $0x320] sm:$0xff]  ;;  %v2854_v40 = vmul.f32 %v4019_v29, %v4019_v29 }
 0x277   : > { %2203 = vst.msk [vmem:[#allocation2 + $0x328] sm:$0xff] %vm318_vm3, %v2090_v12  ;;  %v3024_v11 = vsel %vm318_vm3, %v2849_v54, 0.0  ;;  %v2429_v7 = vpack.c.bf16 %v5346_v4, %v5346_v4  ;;  %v2855_v12 = vmul.f32 %v4020_v53, %v4020_v53 }
 0x278   : > { %v2672_v39 = vadd.f32 %v2671_v38, %v2670_v14  ;;  %v3013_v22 = vadd.f32 %v3012_v18, %v3011_v61  ;;  %v1964_v3 = vpop.f32.mrf.mxu3  ;;  %v2683_v14 = vsel %vm318_vm3, %v4015_v6, 0.0  ;;  %v4016_v61 = vld [vmem:[#allocation2 + $0x210] sm:$0xff]  ;;  %v3026_v56 = vsel %vm318_vm3, %v2850_v43, 0.0 }
 0x279   : > { %v2851_v18 = vmul.f32 %v4016_v61, %v4016_v61  ;;  %v2685_v10 = vsel %vm318_vm3, %v4016_v61, 0.0  ;;  %2542 = vst.msk [vmem:[%s4309_s26 + $0x190] sm:$0xf] %vm2441_vm4, %v2429_v7 }
 0x27a   : > { %v2674_v32 = vadd.f32 %v2673_v26, %v2672_v39  ;;  %v3015_v35 = vadd.f32 %v3014_v58, %v3013_v22  ;;  %v1675_v13 = vpop.f32.mrf.mxu2  ;;  %v4017_v39 = vld [vmem:[#allocation2 + $0x218] sm:$0xff] }
 0x27b   : > { %v2852_v22 = vmul.f32 %v4017_v39, %v4017_v39  ;;  %v3028_v31 = vsel %vm318_vm3, %v2851_v18, 0.0  ;;  %v1965_v49 = vadd.f32 %v1964_v3, %v1675_v13  ;;  %v4022_v3 = vld [vmem:[#allocation2 + $0x240] sm:$0xff] }
 0x27c   : > { %v2676_v48 = vadd.f32 %v2675_v37, %v2674_v32  ;;  %v3017_v33 = vadd.f32 %v3016_v36, %v3015_v35  ;;  %v2687_v32 = vsel %vm318_vm3, %v4017_v39, 0.0  ;;  %v4018_v35 = vld [vmem:[#allocation2 + $0x220] sm:$0xff] }
 0x27d   : > { %v2853_v34 = vmul.f32 %v4018_v35, %v4018_v35  ;;  %v3030_v27 = vsel %vm318_vm3, %v2852_v22, 0.0  ;;  %v2689_v25 = vsel %vm318_vm3, %v4018_v35, 0.0 }
 0x27e   : > { %v2678_v55 = vadd.f32 %v2677_v41, %v2676_v48  ;;  %v3019_v45 = vadd.f32 %v3018_v50, %v3017_v33  ;;  %v5350_v21 = vld [vmem:[#allocation2 + $0x328] sm:$0xff] }
 0x27f   : > { %v2430_v17 = vpack.c.bf16 %v5350_v21, %v5350_v21  ;;  %v3032_v41 = vsel %vm318_vm3, %v2853_v34, 0.0 }
 0x280   : > { %v2680_v62 = vadd.f32 %v2679_v46, %v2678_v55  ;;  %v3021_v0 = vadd.f32 %v3020_v60, %v3019_v45  ;;  %v1966_v50 = vpop.f32.mrf.mxu3  ;;  %v533_v55 = vld [vmem:[#allocation2 + $0x330] sm:$0xff]  ;;  %v534_v45 = vld [vmem:[#allocation2 + $0x338] sm:$0xff] }
 0x281   : > { %2543 = vst.msk [vmem:[%s4309_s26 + $0x194] sm:$0xf] %vm2441_vm4, %v2430_v17  ;;  %v2091_v54 = vadd.f32 %v1965_v49, %v533_v55 }
 0x282   : > { %v2682_v20 = vadd.f32 %v2681_v5, %v2680_v62  ;;  %v3023_v52 = vadd.f32 %v3022_v1, %v3021_v0  ;;  %v1677_v47 = vpop.f32.mrf.mxu2  ;;  %v3034_v62 = vsel %vm318_vm3, %v2854_v40, 0.0  ;;  %v2693_v0 = vsel %vm318_vm3, %v4020_v53, 0.0  ;;  %v4021_v1 = vld [vmem:[#allocation2 + $0x238] sm:$0xff] }
 0x283   : > { %v1967_v60 = vadd.f32 %v1966_v50, %v1677_v47  ;;  %v2856_v5 = vmul.f32 %v4021_v1, %v4021_v1  ;;  %2204 = vst.msk [vmem:[#allocation2 + $0x330] sm:$0xff] %vm318_vm3, %v2091_v54  ;;  %v4026_v50 = vld [vmem:[#allocation2 + $0x260] sm:$0xff] }
 0x284   : > { %v2684_v38 = vadd.f32 %v2683_v14, %v2682_v20  ;;  %v3025_v23 = vadd.f32 %v3024_v11, %v3023_v52  ;;  %v3036_v20 = vsel %vm318_vm3, %v2855_v12, 0.0  ;;  %v2695_v52 = vsel %vm318_vm3, %v4021_v1, 0.0 }
 0x285   : > { %v2092_v6 = vadd.f32 %v1967_v60, %v534_v45  ;;  %v2857_v11 = vmul.f32 %v4022_v3, %v4022_v3  ;;  %v3038_v18 = vsel %vm318_vm3, %v2856_v5, 0.0  ;;  %v2705_v45 = vsel %vm318_vm3, %v4026_v50, 0.0  ;;  %v4027_v60 = vld [vmem:[#allocation2 + $0x268] sm:$0xff] }
 0x286   : > { %v2686_v58 = vadd.f32 %v2685_v10, %v2684_v38  ;;  %v3027_v26 = vadd.f32 %v3026_v56, %v3025_v23  ;;  %v2697_v38 = vsel %vm318_vm3, %v4022_v3, 0.0  ;;  %v4023_v23 = vld [vmem:[#allocation2 + $0x248] sm:$0xff] }
 0x287   : > { %2205 = vst.msk [vmem:[#allocation2 + $0x338] sm:$0xff] %vm318_vm3, %v2092_v6  ;;  %v2858_v56 = vmul.f32 %v4023_v23, %v4023_v23  ;;  %v2699_v7 = vsel %vm318_vm3, %v4023_v23, 0.0  ;;  %v2707_v6 = vsel %vm318_vm3, %v4027_v60, 0.0  ;;  %v4029_v23 = vld [vmem:[#allocation2 + $0x278] sm:$0xff] }
 0x288   : > { %v2688_v36 = vadd.f32 %v2687_v32, %v2686_v58  ;;  %v3029_v37 = vadd.f32 %v3028_v31, %v3027_v26  ;;  %v1969_v58 = vpop.f32.mrf.mxu3  ;;  %v3040_v26 = vsel %vm318_vm3, %v2857_v11, 0.0  ;;  %v4024_v31 = vld [vmem:[#allocation2 + $0x250] sm:$0xff] }
 0x289   : > { %v2859_v32 = vmul.f32 %v4024_v31, %v4024_v31  ;;  %v3042_v17 = vsel %vm318_vm3, %v2858_v56, 0.0  ;;  %v2864_v56 = vmul.f32 %v4029_v23, %v4029_v23 }
 0x28a   : > { %v2690_v48 = vadd.f32 %v2689_v25, %v2688_v36  ;;  %v3031_v33 = vadd.f32 %v3030_v27, %v3029_v37  ;;  %v1680_v10 = vpop.f32.mrf.mxu2  ;;  %v2701_v36 = vsel %vm318_vm3, %v4024_v31, 0.0  ;;  %v4025_v37 = vld [vmem:[#allocation2 + $0x258] sm:$0xff]  ;;  %v5376_v25 = vld [vmem:[#allocation2 + $0x330] sm:$0xff] }
 0x28b   : > { %v2860_v27 = vmul.f32 %v4025_v37, %v4025_v37  ;;  %v2431_v47 = vpack.c.bf16 %v5376_v25, %v5376_v25  ;;  %v2703_v49 = vsel %vm318_vm3, %v4025_v37, 0.0 }
 0x28c   : > { %v2692_v46 = vadd.f32 %v2691_v51, %v2690_v48  ;;  %v3033_v57 = vadd.f32 %v3032_v41, %v3031_v33  ;;  %v3044_v33 = vsel %vm318_vm3, %v2859_v32, 0.0  ;;  %v2861_v41 = vmul.f32 %v4026_v50, %v4026_v50  ;;  %v4032_v50 = vld [vmem:[#allocation2 + $0x290] sm:$0xff] }
 0x28d   : > { %2544 = vst.msk [vmem:[%s4309_s26 + $0x198] sm:$0xf] %vm2441_vm4, %v2431_v47  ;;  %v3046_v55 = vsel %vm318_vm3, %v2860_v27, 0.0 }
 0x28e   : > { %v2694_v43 = vadd.f32 %v2693_v0, %v2692_v46  ;;  %v3035_v13 = vadd.f32 %v3034_v62, %v3033_v57  ;;  %v5380_v48 = vld [vmem:[#allocation2 + $0x338] sm:$0xff]  ;;  %v2862_v46 = vmul.f32 %v4027_v60, %v4027_v60  ;;  %v1970_v0 = vadd.f32 %v1969_v58, %v1680_v10 }
 0x28f   : > { %v2432_v51 = vpack.c.bf16 %v5380_v48, %v5380_v48  ;;  %v3048_v5 = vsel %vm318_vm3, %v2861_v41, 0.0  ;;  %v2867_v41 = vmul.f32 %v4032_v50, %v4032_v50 }
 0x290   : > { %v2696_v14 = vadd.f32 %v2695_v52, %v2694_v43  ;;  %v3037_v61 = vadd.f32 %v3036_v20, %v3035_v13  ;;  %v1971_v1 = vpop.f32.mrf.mxu3  ;;  %v4028_v43 = vld [vmem:[#allocation2 + $0x270] sm:$0xff]  ;;  %v535_v20 = vld [vmem:[#allocation2 + $0x340] sm:$0xff]  ;;  %v536_v52 = vld [vmem:[#allocation2 + $0x348] sm:$0xff] }
 0x291   : > { %2545 = vst.msk [vmem:[%s4309_s26 + $0x19c] sm:$0xf] %vm2441_vm4, %v2432_v51  ;;  %v2863_v13 = vmul.f32 %v4028_v43, %v4028_v43 }
 0x292   : > { %v2698_v39 = vadd.f32 %v2697_v38, %v2696_v14  ;;  %v3039_v22 = vadd.f32 %v3038_v18, %v3037_v61  ;;  %v1682_v57 = vpop.f32.mrf.mxu2  ;;  %v2093_v61 = vadd.f32 %v1970_v0, %v535_v20  ;;  %v3050_v18 = vsel %vm318_vm3, %v2862_v46, 0.0 }
 0x293   : > { %v1972_v3 = vadd.f32 %v1971_v1, %v1682_v57  ;;  %v2709_v38 = vsel %vm318_vm3, %v4028_v43, 0.0  ;;  %v3052_v58 = vsel %vm318_vm3, %v2863_v13, 0.0  ;;  %v3060_v1 = vsel %vm318_vm3, %v2867_v41, 0.0 }
 0x294   : > { %v2700_v35 = vadd.f32 %v2699_v7, %v2698_v39  ;;  %v3041_v34 = vadd.f32 %v3040_v26, %v3039_v22  ;;  %2206 = vst.msk [vmem:[#allocation2 + $0x340] sm:$0xff] %vm318_vm3, %v2093_v61  ;;  %v2711_v26 = vsel %vm318_vm3, %v4029_v23, 0.0  ;;  %v4030_v7 = vld [vmem:[#allocation2 + $0x280] sm:$0xff]  ;;  %v2873_v41 = vmul.f32 %v5110_v59, %v5110_v59 }
 0x295   : > { %v2094_v10 = vadd.f32 %v1972_v3, %v536_v52  ;;  %v2865_v31 = vmul.f32 %v4030_v7, %v4030_v7 }
 0x296   : > { %v2702_v29 = vadd.f32 %v2701_v36, %v2700_v35  ;;  %v3043_v40 = vadd.f32 %v3042_v17, %v3041_v34  ;;  %v3054_v34 = vsel %vm318_vm3, %v2864_v56, 0.0  ;;  %v2713_v17 = vsel %vm318_vm3, %v4030_v7, 0.0  ;;  %v4031_v36 = vld [vmem:[#allocation2 + $0x288] sm:$0xff]  ;;  %v537_v7 = vld [vmem:[#allocation2 + $0x350] sm:$0xff] }
 0x297   : > { %2207 = vst.msk [vmem:[#allocation2 + $0x348] sm:$0xff] %vm318_vm3, %v2094_v10  ;;  %v2866_v37 = vmul.f32 %v4031_v36, %v4031_v36 }
 0x298   : > { %v2704_v53 = vadd.f32 %v2703_v49, %v2702_v29  ;;  %v3045_v12 = vadd.f32 %v3044_v33, %v3043_v40  ;;  %v1974_v47 = vpop.f32.mrf.mxu3  ;;  %v3056_v33 = vsel %vm318_vm3, %v2865_v31, 0.0  ;;  %v2715_v49 = vsel %vm318_vm3, %v4031_v36, 0.0  ;;  %v538_v31 = vld [vmem:[#allocation2 + $0x358] sm:$0xff] }
 0x29a   : > { %v2706_v54 = vadd.f32 %v2705_v45, %v2704_v53  ;;  %v3047_v62 = vadd.f32 %v3046_v55, %v3045_v12  ;;  %v1685_v27 = vpop.f32.mrf.mxu2  ;;  %v3058_v12 = vsel %vm318_vm3, %v2866_v37, 0.0  ;;  %v2717_v55 = vsel %vm318_vm3, %v4032_v50, 0.0  ;;  %v4033_v45 = vld [vmem:[#allocation2 + $0x298] sm:$0xff] }
 0x29b   : > { %v2868_v60 = vmul.f32 %v4033_v45, %v4033_v45  ;;  %v5406_v46 = vld [vmem:[#allocation2 + $0x340] sm:$0xff]  ;;  %v1975_v56 = vadd.f32 %v1974_v47, %v1685_v27  ;;  %v2872_v27 = vmul.f32 %v5086_v28, %v5086_v28  ;;  %v2729_v28 = vsel %vm318_vm3, %v5110_v59, 0.0 }
 0x29c   : > { %v3049_v11 = vadd.f32 %v3048_v5, %v3047_v62  ;;  %v2708_v14 = vadd.f32 %v2707_v6, %v2706_v54  ;;  %v2433_v62 = vpack.c.bf16 %v5406_v46, %v5406_v46  ;;  %v2719_v5 = vsel %vm318_vm3, %v4033_v45, 0.0  ;;  %v4034_v6 = vld [vmem:[#allocation2 + $0x2a0] sm:$0xff] }
 0x29d   : > { %v2869_v43 = vmul.f32 %v4034_v6, %v4034_v6  ;;  %v3062_v3 = vsel %vm318_vm3, %v2868_v60, 0.0 }
 0x29e   : > { %v2710_v39 = vadd.f32 %v2709_v38, %v2708_v14  ;;  %v3051_v22 = vadd.f32 %v3050_v18, %v3049_v11  ;;  %v5410_v0 = vld [vmem:[#allocation2 + $0x348] sm:$0xff]  ;;  %2546 = vst.msk [vmem:[%s4309_s26 + $0x1a0] sm:$0xf] %vm2441_vm4, %v2433_v62  ;;  %v2721_v11 = vsel %vm318_vm3, %v4034_v6, 0.0  ;;  %v3072_v62 = vsel %vm318_vm3, %v2873_v41, 0.0 }
 0x29f   : > { %v2434_v13 = vpack.c.bf16 %v5410_v0, %v5410_v0  ;;  %v4035_v14 = vld [vmem:[#allocation2 + $0x2a8] sm:$0xff] }
 0x2a0   : > { %v2712_v32 = vadd.f32 %v2711_v26, %v2710_v39  ;;  %v3053_v35 = vadd.f32 %v3052_v58, %v3051_v22  ;;  %v2870_v61 = vmul.f32 %v4035_v14, %v4035_v14  ;;  %v1976_v10 = vpop.f32.mrf.mxu3  ;;  %v3064_v39 = vsel %vm318_vm3, %v2869_v43, 0.0  ;;  %v4036_v58 = vld [vmem:[#allocation2 + $0x2b0] sm:$0xff] }
 0x2a1   : > { %2547 = vst.msk [vmem:[%s4309_s26 + $0x1a4] sm:$0xf] %vm2441_vm4, %v2434_v13  ;;  %v2723_v22 = vsel %vm318_vm3, %v4035_v14, 0.0  ;;  %v2871_v26 = vmul.f32 %v4036_v58, %v4036_v58  ;;  %v2725_v37 = vsel %vm318_vm3, %v4036_v58, 0.0  ;;  %v2733_v13 = vsel %vm318_vm3, %v5143_v2, 0.0 }
 0x2a2   : > { %v2714_v29 = vadd.f32 %v2713_v17, %v2712_v32  ;;  %v3055_v40 = vadd.f32 %v3054_v34, %v3053_v35  ;;  %v1687_v18 = vpop.f32.mrf.mxu2  ;;  %v2095_v17 = vadd.f32 %v1975_v56, %v537_v7  ;;  %v3066_v36 = vsel %vm318_vm3, %v2870_v61, 0.0  ;;  %v539_v7 = vld [vmem:[#allocation2 + $0x360] sm:$0xff] }
 0x2a3   : > { %v1977_v32 = vadd.f32 %v1976_v10, %v1687_v18  ;;  %v2735_v18 = vsel %vm318_vm3, %v5158_v30, 0.0 }
 0x2a4   : > { %v2716_v51 = vadd.f32 %v2715_v49, %v2714_v29  ;;  %v3057_v53 = vadd.f32 %v3056_v33, %v3055_v40  ;;  %2208 = vst.msk [vmem:[#allocation2 + $0x350] sm:$0xff] %vm318_vm3, %v2095_v17  ;;  %v3068_v33 = vsel %vm318_vm3, %v2871_v26, 0.0  ;;  %v4037_v49 = vld [vmem:[#allocation2 + $0x2b8] sm:$0xff]  ;;  %v2879_v17 = vmul.f32 %v5205_v42, %v5205_v42 }
 0x2a5   : > { %v2096_v29 = vadd.f32 %v1977_v32, %v538_v31  ;;  %v2727_v50 = vsel %vm318_vm3, %v4037_v49, 0.0 }
 0x2a6   : > { %v2718_v57 = vadd.f32 %v2717_v55, %v2716_v51  ;;  %v3059_v54 = vadd.f32 %v3058_v12, %v3057_v53  ;;  %v3070_v12 = vsel %vm318_vm3, %v2872_v27, 0.0  ;;  %v2874_v55 = vmul.f32 %v5125_v9, %v5125_v9 }
 0x2a7   : > { %2209 = vst.msk [vmem:[#allocation2 + $0x358] sm:$0xff] %vm318_vm3, %v2096_v29 }
 0x2a8   : > { %v2720_v20 = vadd.f32 %v2719_v5, %v2718_v57  ;;  %v3061_v52 = vadd.f32 %v3060_v1, %v3059_v54  ;;  %v1979_v54 = vpop.f32.mrf.mxu3  ;;  %v2731_v1 = vsel %vm318_vm3, %v5125_v9, 0.0  ;;  %v2875_v5 = vmul.f32 %v5143_v2, %v5143_v2 }
 0x2a9   : > { %v3074_v59 = vsel %vm318_vm3, %v2874_v55, 0.0  ;;  %v2877_v2 = vmul.f32 %v5176_v8, %v5176_v8  ;;  %v2745_v55 = vsel %vm318_vm3, %v5251_v63, 0.0 }
 0x2aa   : > { %v2722_v38 = vadd.f32 %v2721_v11, %v2720_v20  ;;  %v3063_v23 = vadd.f32 %v3062_v3, %v3061_v52  ;;  %v1690_v45 = vpop.f32.mrf.mxu2  ;;  %v2876_v20 = vmul.f32 %v5158_v30, %v5158_v30  ;;  %v3076_v61 = vsel %vm318_vm3, %v2875_v5, 0.0 }
 0x2ab   : > { %v5449_v52 = vld [vmem:[#allocation2 + $0x350] sm:$0xff]  ;;  %v1980_v31 = vadd.f32 %v1979_v54, %v1690_v45  ;;  %v2882_v45 = vmul.f32 %v5286_v15, %v5286_v15  ;;  %v2747_v5 = vsel %vm318_vm3, %v5286_v15, 0.0 }
 0x2ac   : > { %v2724_v35 = vadd.f32 %v2723_v22, %v2722_v38  ;;  %v3065_v34 = vadd.f32 %v3064_v39, %v3063_v23  ;;  %v2435_v9 = vpack.c.bf16 %v5449_v52, %v5449_v52  ;;  %v3078_v10 = vsel %vm318_vm3, %v2876_v20, 0.0 }
 0x2ad   : > { %v2737_v39 = vsel %vm318_vm3, %v5176_v8, 0.0  ;;  %v2878_v22 = vmul.f32 %v5191_v24, %v5191_v24  ;;  %v540_v8 = vld [vmem:[#allocation2 + $0x368] sm:$0xff]  ;;  %v2097_v29 = vadd.f32 %v1980_v31, %v539_v7  ;;  %v2749_v20 = vsel %vm318_vm3, %v5316_v16, 0.0  ;;  %v542_v31 = vld [vmem:[#allocation2 + $0x378] sm:$0xff] }
 0x2ae   : > { %v2726_v40 = vadd.f32 %v2725_v37, %v2724_v35  ;;  %v3067_v47 = vadd.f32 %v3066_v36, %v3065_v34  ;;  %v5453_v14 = vld [vmem:[#allocation2 + $0x358] sm:$0xff]  ;;  %2548 = vst.msk [vmem:[%s4309_s26 + $0x1a8] sm:$0xf] %vm2441_vm4, %v2435_v9  ;;  %v3080_v35 = vsel %vm318_vm3, %v2877_v2, 0.0  ;;  %v2739_v34 = vsel %vm318_vm3, %v5191_v24, 0.0 }
 0x2af   : > { %v2436_v38 = vpack.c.bf16 %v5453_v14, %v5453_v14  ;;  %2210 = vst.msk [vmem:[#allocation2 + $0x360] sm:$0xff] %vm318_vm3, %v2097_v29  ;;  %v3084_v24 = vsel %vm318_vm3, %v2879_v17, 0.0  ;;  %v2887_v17 = vmul.f32 %v5376_v25, %v5376_v25  ;;  %v2888_v29 = vmul.f32 %v5380_v48, %v5380_v48 }
 0x2b0   : > { %v2728_v51 = vadd.f32 %v2727_v50, %v2726_v40  ;;  %v3069_v53 = vadd.f32 %v3068_v33, %v3067_v47  ;;  %v1981_v32 = vpop.f32.mrf.mxu3  ;;  %v3082_v40 = vsel %vm318_vm3, %v2878_v22, 0.0  ;;  %v2741_v47 = vsel %vm318_vm3, %v5205_v42, 0.0 }
 0x2b1   : > { %2549 = vst.msk [vmem:[%s4309_s26 + $0x1ac] sm:$0xf] %vm2441_vm4, %v2436_v38  ;;  %v2880_v33 = vmul.f32 %v5221_v44, %v5221_v44 }
 0x2b2   : > { %v2730_v60 = vadd.f32 %v2729_v28, %v2728_v51  ;;  %v3071_v57 = vadd.f32 %v3070_v12, %v3069_v53  ;;  %v1692_v30 = vpop.f32.mrf.mxu2  ;;  %v2743_v51 = vsel %vm318_vm3, %v5221_v44, 0.0  ;;  %v2881_v53 = vmul.f32 %v5251_v63, %v5251_v63 }
 0x2b3   : > { %v1982_v36 = vadd.f32 %v1981_v32, %v1692_v30  ;;  %v3086_v28 = vsel %vm318_vm3, %v2880_v33, 0.0  ;;  %v3090_v63 = vsel %vm318_vm3, %v2882_v45, 0.0  ;;  %v2753_v30 = vsel %vm318_vm3, %v5346_v4, 0.0 }
 0x2b4   : > { %v2732_v6 = vadd.f32 %v2731_v1, %v2730_v60  ;;  %v3073_v43 = vadd.f32 %v3072_v62, %v3071_v57  ;;  %v541_v62 = vld [vmem:[#allocation2 + $0x370] sm:$0xff]  ;;  %v3088_v1 = vsel %vm318_vm3, %v2881_v53, 0.0  ;;  %v3102_v53 = vsel %vm318_vm3, %v2888_v29, 0.0 }
 0x2b5   : > { %v2098_v49 = vadd.f32 %v1982_v36, %v540_v8  ;;  %v2763_v45 = vsel %vm318_vm3, %v5410_v0, 0.0 }
 0x2b6   : > { %v2734_v3 = vadd.f32 %v2733_v13, %v2732_v6  ;;  %v3075_v11 = vadd.f32 %v3074_v59, %v3073_v43  ;;  %v2883_v6 = vmul.f32 %v5316_v16, %v5316_v16  ;;  %v2885_v16 = vmul.f32 %v5346_v4, %v5346_v4 }
 0x2b7   : > { %2211 = vst.msk [vmem:[#allocation2 + $0x368] sm:$0xff] %vm318_vm3, %v2098_v49 }
 0x2b8   : > { %v2736_v23 = vadd.f32 %v2735_v18, %v2734_v3  ;;  %v3077_v56 = vadd.f32 %v3076_v61, %v3075_v11  ;;  %v1984_v44 = vpop.f32.mrf.mxu3  ;;  %v2884_v3 = vmul.f32 %v5322_v19, %v5322_v19  ;;  %v5503_v11 = vld [vmem:[#allocation2 + $0x360] sm:$0xff]  ;;  %v3092_v38 = vsel %vm318_vm3, %v2883_v6, 0.0 }
 0x2b9   : > { %v2437_v18 = vpack.c.bf16 %v5503_v11, %v5503_v11 }
 0x2ba   : > { %v2738_v58 = vadd.f32 %v2737_v39, %v2736_v23  ;;  %v3079_v26 = vadd.f32 %v3078_v10, %v3077_v56  ;;  %v1695_v60 = vpop.f32.mrf.mxu2  ;;  %v2751_v23 = vsel %vm318_vm3, %v5322_v19, 0.0  ;;  %v3094_v22 = vsel %vm318_vm3, %v2884_v3, 0.0 }
 0x2bb   : > { %v1985_v43 = vadd.f32 %v1984_v44, %v1695_v60  ;;  %2550 = vst.msk [vmem:[%s4309_s26 + $0x1b0] sm:$0xf] %vm2441_vm4, %v2437_v18  ;;  %v2886_v19 = vmul.f32 %v5350_v21, %v5350_v21  ;;  %v2891_v60 = vmul.f32 %v5449_v52, %v5449_v52  ;;  %v2892_v44 = vmul.f32 %v5453_v14, %v5453_v14 }
 0x2bc   : > { %v2740_v37 = vadd.f32 %v2739_v34, %v2738_v58  ;;  %v3081_v27 = vadd.f32 %v3080_v35, %v3079_v26  ;;  %v3096_v35 = vsel %vm318_vm3, %v2885_v16, 0.0  ;;  %v2755_v34 = vsel %vm318_vm3, %v5350_v21, 0.0 }
 0x2bd   : > { %v2099_v9 = vadd.f32 %v1985_v43, %v541_v62  ;;  %v3100_v21 = vsel %vm318_vm3, %v2887_v17, 0.0  ;;  %v2765_v62 = vsel %vm318_vm3, %v5449_v52, 0.0  ;;  %v3108_v43 = vsel %vm318_vm3, %v2891_v60, 0.0 }
 0x2be   : > { %v2742_v50 = vadd.f32 %v2741_v47, %v2740_v37  ;;  %v3083_v41 = vadd.f32 %v3082_v40, %v3081_v27  ;;  %v5507_v2 = vld [vmem:[#allocation2 + $0x368] sm:$0xff]  ;;  %v3098_v37 = vsel %vm318_vm3, %v2886_v19, 0.0  ;;  %v2757_v27 = vsel %vm318_vm3, %v5376_v25, 0.0 }
 0x2bf   : > { %v2438_v56 = vpack.c.bf16 %v5507_v2, %v5507_v2  ;;  %2212 = vst.msk [vmem:[#allocation2 + $0x370] sm:$0xff] %vm318_vm3, %v2099_v9  ;;  %v3110_v3 = vsel %vm318_vm3, %v2892_v44, 0.0  ;;  %v2769_v52 = vsel %vm318_vm3, %v5503_v11, 0.0  ;;  %v2894_v9 = vmul.f32 %v5507_v2, %v5507_v2 }
 0x2c0   : > { %v2744_v12 = vadd.f32 %v2743_v51, %v2742_v50  ;;  %v3085_v42 = vadd.f32 %v3084_v24, %v3083_v41  ;;  %v1986_v32 = vpop.f32.mrf.mxu3  ;;  %v2759_v50 = vsel %vm318_vm3, %v5380_v48, 0.0  ;;  %v2889_v41 = vmul.f32 %v5406_v46, %v5406_v46 }
 0x2c1   : > { %2551 = vst.msk [vmem:[%s4309_s26 + $0x1b4] sm:$0xf] %vm2441_vm4, %v2438_v56  ;;  %v2771_v18 = vsel %vm318_vm3, %v5507_v2, 0.0  ;;  %v3114_v56 = vsel %vm318_vm3, %v2894_v9, 0.0 }
 0x2c2   : > { %v2746_v57 = vadd.f32 %v2745_v55, %v2744_v12  ;;  %v3087_v54 = vadd.f32 %v3086_v28, %v3085_v42  ;;  %v1697_v58 = vpop.f32.mrf.mxu2  ;;  %v2761_v12 = vsel %vm318_vm3, %v5406_v46, 0.0  ;;  %v2890_v42 = vmul.f32 %v5410_v0, %v5410_v0 }
 0x2c3   : > { %v1987_v8 = vadd.f32 %v1986_v32, %v1697_v58  ;;  %v3104_v55 = vsel %vm318_vm3, %v2889_v41, 0.0  ;;  %v2767_v0 = vsel %vm318_vm3, %v5453_v14, 0.0 }
 0x2c4   : > { %v2748_v59 = vadd.f32 %v2747_v5, %v2746_v57  ;;  %v3089_v13 = vadd.f32 %v3088_v1, %v3087_v54  ;;  %v3106_v46 = vsel %vm318_vm3, %v2890_v42, 0.0 }
 0x2c5   : > { %v2100_v40 = vadd.f32 %v1987_v8, %v542_v31 }
 0x2c6   : > { %v2750_v15 = vadd.f32 %v2749_v20, %v2748_v59  ;;  %v3091_v61 = vadd.f32 %v3090_v63, %v3089_v13  ;;  %v2327_v49 = vld [vmem:[#allocation2 + $0x370] sm:$0xff]  ;;  %v2893_v59 = vmul.f32 %v5503_v11, %v5503_v11 }
 0x2c7   : > { %v2439_v24 = vpack.c.bf16 %v2327_v49, %v2327_v49  ;;  %2213 = vst.msk [vmem:[#allocation2 + $0x378] sm:$0xff] %vm318_vm3, %v2100_v40  ;;  %v2773_v11 = vsel %vm318_vm3, %v2327_v49, 0.0 }
 0x2c8   : > { %v3093_v10 = vadd.f32 %v3092_v38, %v3091_v61  ;;  %v2752_v39 = vadd.f32 %v2751_v23, %v2750_v15  ;;  %v3112_v14 = vsel %vm318_vm3, %v2893_v59, 0.0  ;;  %v2895_v38 = vmul.f32 %v2327_v49, %v2327_v49 }
 0x2c9   : > { %2552 = vst.msk [vmem:[%s4309_s26 + $0x1b8] sm:$0xf] %vm2441_vm4, %v2439_v24 }
 0x2ca   : > { %v3095_v26 = vadd.f32 %v3094_v22, %v3093_v10  ;;  %v2754_v7 = vadd.f32 %v2753_v30, %v2752_v39  ;;  %v3116_v30 = vsel %vm318_vm3, %v2895_v38, 0.0 }
 0x2cc   : > { %v3097_v4 = vadd.f32 %v3096_v35, %v3095_v26  ;;  %v2756_v36 = vadd.f32 %v2755_v34, %v2754_v7 }
 0x2ce   : > { %v3099_v47 = vadd.f32 %v3098_v37, %v3097_v4  ;;  %v2758_v33 = vadd.f32 %v2757_v27, %v2756_v36  ;;  %v2328_v6 = vld [vmem:[#allocation2 + $0x378] sm:$0xff] }
 0x2cf   : > { %v2440_v13 = vpack.c.bf16 %v2328_v6, %v2328_v6  ;;  %v2896_v10 = vmul.f32 %v2328_v6, %v2328_v6  ;;  %v2775_v19 = vsel %vm318_vm3, %v2328_v6, 0.0 }
 0x2d0   : > { %v3101_v25 = vadd.f32 %v3100_v21, %v3099_v47  ;;  %v2760_v51 = vadd.f32 %v2759_v50, %v2758_v33 }
 0x2d1   : > { %2553 = vst.msk [vmem:[%s4309_s26 + $0x1bc] sm:$0xf] %vm2441_vm4, %v2440_v13  ;;  %v3118_v2 = vsel %vm318_vm3, %v2896_v10, 0.0 }
 0x2d2   : > { %v3103_v28 = vadd.f32 %v3102_v53, %v3101_v25  ;;  %v2762_v48 = vadd.f32 %v2761_v12, %v2760_v51 }
 0x2d4   : > { %v3105_v57 = vadd.f32 %v3104_v55, %v3103_v28  ;;  %v2764_v54 = vadd.f32 %v2763_v45, %v2762_v48 }
 0x2d6   : > { %v3107_v1 = vadd.f32 %v3106_v46, %v3105_v57  ;;  %v2766_v5 = vadd.f32 %v2765_v62, %v2764_v54 }
 0x2d8   : > { %v3109_v63 = vadd.f32 %v3108_v43, %v3107_v1  ;;  %v2768_v20 = vadd.f32 %v2767_v0, %v2766_v5 }
 0x2da   : > { %v3111_v15 = vadd.f32 %v3110_v3, %v3109_v63  ;;  %v2770_v61 = vadd.f32 %v2769_v52, %v2768_v20 }
 0x2dc   : > { %v3113_v23 = vadd.f32 %v3112_v14, %v3111_v15  ;;  %v2772_v16 = vadd.f32 %v2771_v18, %v2770_v61 }
 0x2de   : > { %v3115_v39 = vadd.f32 %v3114_v56, %v3113_v23  ;;  %v2774_v22 = vadd.f32 %v2773_v11, %v2772_v16 }
 0x2e0   : > { %v3117_v58 = vadd.f32 %v3116_v30, %v3115_v39  ;;  %v2776_v26 = vadd.f32 %v2775_v19, %v2774_v22 }
 0x2e2   : > { %v2777_v7 = vrot.slane %v2776_v26, 4  ;;  %v3119_v31 = vadd.f32 %v3118_v2, %v3117_v58 }
 0x2e4   : > { %v2778_v32 = vadd.f32 %v2777_v7, %v2776_v26  ;;  %v3120_v35 = vrot.slane %v3119_v31, 4 }
 0x2e6   : > { %v2779_v34 = vrot.slane %v2778_v32, 2  ;;  %v3121_v17 = vadd.f32 %v3120_v35, %v3119_v31 }
 0x2e8   : > { %v2780_v8 = vadd.f32 %v2779_v34, %v2778_v32  ;;  %v3122_v4 = vrot.slane %v3121_v17, 2 }
 0x2ea   : > { %v2781_v36 = vrot.slane %v2780_v8, 1  ;;  %v3123_v37 = vadd.f32 %v3122_v4, %v3121_v17 }
 0x2ec   : > { %v2782_v27 = vadd.f32 %v2781_v36, %v2780_v8  ;;  %v3124_v29 = vrot.slane %v3123_v37, 1 }
 0x2ee   : > { %2784 = vst.msk [vmem:[%s306_s28] sm:$0x1] %vm2783_vm5, %v2782_v27  ;;  %v3125_v40 = vadd.f32 %v3124_v29, %v3123_v37 }
 0x2f0   : > { %3126 = vst.msk [vmem:[%s312_s5] sm:$0x1] %vm2783_vm5, %v3125_v40 }
 0x2f1 PF: > { %s15_s17 = sadd.s32 1, %s4060_s17   ;;  %s5601_s15 = smov %s4056_s16 }
 0x2f2   : > { %p12_p6 = scmp.ge.s32.totalorder %s15_s17, 30   ;;  %s5602_s16 = smov %s5604_s18 }
 0x2f4   :  { %14 = sbr.rel (!%p12_p6) target bundleno = 2 (0x2), region = 93 }

</bundles_post_ra>
